<compile_context>
chip_gen: v7x
topology: tpu7x:2x2x1
jax: 0.10.0
libtpu: 0.0.40
codegen_flags: <defaults>
</compile_context>

<pallas_src>
import functools

import jax
import jax.numpy as jnp
from jax.experimental import pallas as pl
from jax.experimental.pallas import tpu as pltpu

PATCH = (2, 4, 4)                       # swin3d patch size (T, H, W)
EMBED_DIMS = (32, 64, 128, 256, 512)    # stem + 4 stages (small synthetic dims -> 512)
NUM_CLASSES = 2
LANE = 128


def _pad_to(n, m=LANE):
    return ((n + m - 1) // m) * m


def _m_tiling(M):
    """Token-row tile size and padded token count.

    256-row tiles fill the 256-wide MXU on v6e/v7x (v5e's 128x128 MXU is
    already saturated at 128 rows); small inputs get a single 128-multiple
    tile.  Padded token rows are masked out by zero pooling weights.
    """
    tm = 256 if M > 128 else 128
    return tm, _pad_to(M, tm)


# ---------------------------------------------------------------------------
# Single fused Pallas kernel: stem -> stages -> avgpool(accumulated) -> head
# ---------------------------------------------------------------------------
def _fused_forward_kernel(*refs, num_stages):
    tokens_ref, pool_ref = refs[0], refs[1]
    stage_refs = refs[2:2 + 2 * num_stages]
    hw_ref = refs[2 + 2 * num_stages]
    hb_ref = refs[3 + 2 * num_stages]
    out_ref = refs[4 + 2 * num_stages]
    acc_ref = refs[5 + 2 * num_stages]          # VMEM scratch (B, C_last) f32

    i = pl.program_id(0)

    @pl.when(i == 0)
    def _init():
        acc_ref[...] = jnp.zeros_like(acc_ref)

    # This tile's patch tokens (tm, K0p), already bf16 + lane-padded.
    h = tokens_ref[...]

    # stem + "layer1..layer4": linear + GELU.  bf16 MXU operands, f32
    # accumulation; the inter-stage activation is carried in bf16 (one cast at
    # the GELU output instead of a re-cast in front of every dot).
    for s in range(num_stages):
        w_ref = stage_refs[2 * s]
        b_ref = stage_refs[2 * s + 1]
        acc = jnp.dot(h, w_ref[...], preferred_element_type=jnp.float32)
        acc = acc + b_ref[...]                          # (1, Np) f32 bias
        h = jax.nn.gelu(acc, approximate=True).astype(jnp.bfloat16)

    # Partial global-avgpool for this token tile, accumulated across the M
    # grid on the MXU: (B, tm)bf16 @ (tm, C)bf16 -> f32.
    acc_ref[...] += jnp.dot(pool_ref[...], h, preferred_element_type=jnp.float32)

    # Last tile: head Linear(512, 2) (output lanes padded to 128) + writeback.
    @pl.when(i == pl.num_programs(0) - 1)
    def _finalize():
        pooled = acc_ref[...].astype(jnp.bfloat16)
        logits = jnp.dot(pooled, hw_ref[...],
                         preferred_element_type=jnp.float32) + hb_ref[...]
        out_ref[...] = logits.astype(out_ref.dtype)


# ---------------------------------------------------------------------------
# Deterministic parameter construction (synthetic; no checkpoint load)
# ---------------------------------------------------------------------------
def init_params(key, in_ch=3):
    pt, ph, pw = PATCH
    patch_dim = in_ch * pt * ph * pw
    dims = (patch_dim,) + EMBED_DIMS
    keys = jax.random.split(key, len(EMBED_DIMS) + 1)

    ws, bs = [], []
    for i in range(len(EMBED_DIMS)):
        kw, kb = jax.random.split(keys[i])
        fan_in = dims[i]
        ws.append(jax.random.normal(kw, (dims[i], dims[i + 1]), jnp.float32)
                  / jnp.sqrt(jnp.float32(fan_in)))
        bs.append(jax.random.normal(kb, (1, dims[i + 1]), jnp.float32) * 0.01)

    khw, _ = jax.random.split(keys[-1])
    head_w = jax.random.normal(khw, (EMBED_DIMS[-1], NUM_CLASSES), jnp.float32) \
        / jnp.sqrt(jnp.float32(EMBED_DIMS[-1]))
    head_b = jnp.zeros((1, NUM_CLASSES), jnp.float32)
    return {"ws": ws, "bs": bs, "head_w": head_w, "head_b": head_b}


def prepare_params(params):
    """Zero-pad channel dims to multiples of 128 (lane-dense) and cast weights
    to bf16 for the MXU; biases stay f32.  Zero padding keeps numerics exact
    (padded pre-activations are 0 and gelu(0) == 0).  Built once, outside jit."""
    def pad_wb(w, b):
        K, N = w.shape
        Kp, Np = _pad_to(K), _pad_to(N)
        wp = jnp.zeros((Kp, Np), jnp.float32).at[:K, :N].set(w).astype(jnp.bfloat16)
        bp = jnp.zeros((1, Np), jnp.float32).at[:, :N].set(b)
        return wp, bp

    out = {"ws": [], "bs": []}
    for w, b in zip(params["ws"], params["bs"]):
        wp, bp = pad_wb(w, b)
        out["ws"].append(wp)
        out["bs"].append(bp)
    out["head_w"], out["head_b"] = pad_wb(params["head_w"], params["head_b"])
    return out


def make_pool(B, L, Mp):
    """(B, Mp) block-diagonal 1/L mean matrix (batch-major token layout), bf16.
    Built once outside the jitted forward.  1/L is exact in bf16 for the
    power-of-two token counts produced by (2,4,4) patching; padded token
    columns are zero so padded rows never contribute."""
    pool = jnp.repeat(jnp.eye(B, dtype=jnp.float32), L, axis=1) / jnp.float32(L)
    pool = jnp.pad(pool, ((0, 0), (0, Mp - B * L)))
    return pool.astype(jnp.bfloat16)


# ---------------------------------------------------------------------------
# Forward pass (mirrors network.forward(x, output)); call under jax.jit.
# ---------------------------------------------------------------------------
def forward(params_padded, pool, x, output=None):
    del output  # mirrors the PyTorch signature; unused by the forward pass.
    B, C, T, H, W = x.shape
    pt, ph, pw = PATCH
    assert T % pt == 0 and H % ph == 0 and W % pw == 0
    Tp, Hp, Wp = T // pt, H // ph, W // pw
    L = Tp * Hp * Wp
    M = B * L
    tm, Mp = _m_tiling(M)
    assert pool.shape == (B, Mp) and pool.dtype == jnp.bfloat16

    # --- stem / patch embed: Conv3d(kernel=stride=PATCH) == matmul over patches.
    # This rearrange/pad/cast chain is traced under the same jit as the
    # pallas_call, so XLA fuses it into a single producer of the token slab.
    K0 = C * pt * ph * pw
    K0p = _pad_to(K0)
    patches = x.reshape(B, C, Tp, pt, Hp, ph, Wp, pw)
    patches = patches.transpose(0, 2, 4, 6, 1, 3, 5, 7)   # (B,Tp,Hp,Wp, C,pt,ph,pw)
    tokens = patches.reshape(M, K0)
    tokens = jnp.pad(tokens, ((0, Mp - M), (0, K0p - K0))).astype(jnp.bfloat16)

    num_stages = len(EMBED_DIMS)
    ws, bs = params_padded["ws"], params_padded["bs"]
    head_w, head_b = params_padded["head_w"], params_padded["head_b"]
    C_last = head_w.shape[0]            # 512 (already a lane multiple)
    Np_head = head_b.shape[1]           # 128 (2 real classes, lane-padded)

    # Resident operands (same block every grid step): single pipeline buffer.
    resident = pl.Buffered(1)
    in_specs = [
        pl.BlockSpec((tm, K0p), lambda i: (i, 0)),    # token tile (double-buffered)
        pl.BlockSpec((B, tm), lambda i: (0, i)),      # pooling-matrix tile
    ]
    flat_inputs = [tokens, pool]
    for w, b in zip(ws, bs):
        in_specs.append(pl.BlockSpec(w.shape, lambda i: (0, 0), pipeline_mode=resident))
        in_specs.append(pl.BlockSpec(b.shape, lambda i: (0, 0), pipeline_mode=resident))
        flat_inputs += [w, b]
    in_specs.append(pl.BlockSpec(head_w.shape, lambda i: (0, 0), pipeline_mode=resident))
    in_specs.append(pl.BlockSpec(head_b.shape, lambda i: (0, 0), pipeline_mode=resident))
    flat_inputs += [head_w, head_b]

    # Advisory cost estimate (all matmuls + one tanh per gelu element).
    flops = 0
    for w in ws:
        flops += 2 * Mp * w.shape[0] * w.shape[1]
    flops += 2 * B * Mp * C_last            # pooling matmul
    flops += 2 * B * C_last * Np_head       # head matmul
    transcendentals = Mp * sum(int(w.shape[1]) for w in ws)
    bytes_accessed = sum(int(a.size) * a.dtype.itemsize for a in flat_inputs) \
        + B * Np_head * 4

    logits_padded = pl.pallas_call(
        functools.partial(_fused_forward_kernel, num_stages=num_stages),
        grid=(Mp // tm,),
        in_specs=in_specs,
        out_specs=pl.BlockSpec((B, Np_head), lambda i: (0, 0)),
        out_shape=jax.ShapeDtypeStruct((B, Np_head), jnp.float32),
        scratch_shapes=[pltpu.VMEM((B, C_last), jnp.float32)],   # pooled accumulator
        compiler_params=pltpu.CompilerParams(
            # The M axis carries the pooled accumulator + final writeback.
            dimension_semantics=("arbitrary",),
            vmem_limit_bytes=32 * 1024 * 1024,   # <= 32 MiB also on v7x (64 MiB phys)
        ),
        cost_estimate=pl.CostEstimate(
            flops=int(flops),
            transcendentals=int(transcendentals),
            bytes_accessed=int(bytes_accessed),
        ),
    )(*flat_inputs)

    # Only the lane-padded logits touch HBM; slice the 2 real classes (fused in jit).
    return logits_padded[:, :NUM_CLASSES]


if __name__ == "__main__":
    key = jax.random.PRNGKey(0)
    pkey, xkey = jax.random.split(key)
    params = init_params(pkey)
    params_padded = prepare_params(params)               # built once, outside jit

    # Small video input consistent with the module: (B=2, C=3, T=8, H=16, W=16)
    # -> M = 128 tokens.  Real deployments should pack M >= 256 (e.g. >= 2
    # clips per call) to fill the 256-wide MXU on v6e/v7x; _m_tiling then
    # selects 256-row tiles automatically.
    x = jax.random.normal(xkey, (2, 3, 8, 16, 16), jnp.float32)
    output = jnp.zeros((2,), jnp.int32)                  # unused 2nd arg of forward(x, output)

    B, _, T, H, W = x.shape
    L = (T // PATCH[0]) * (H // PATCH[1]) * (W // PATCH[2])
    _, Mp = _m_tiling(B * L)
    pool = make_pool(B, L, Mp)                           # built once, outside jit

    fwd = jax.jit(forward)
    logits = fwd(params_padded, pool, x, output)
    jax.block_until_ready(logits)
    assert logits.shape == (B, NUM_CLASSES) and logits.dtype == jnp.float32
    print("KERNEL_OK")
</pallas_src>

<mosaic_0001>
module attributes {stable_mosaic.version = 11 : i64} {
  func.func @_fused_forward_kernel(%arg0: i32, %arg1: memref<128x128xbf16, #tpu.memory_space<vmem>>, %arg2: memref<2x128xbf16, #tpu.memory_space<vmem>>, %arg3: memref<128x128xbf16, #tpu.memory_space<vmem>>, %arg4: memref<1x128xf32, #tpu.memory_space<vmem>>, %arg5: memref<128x128xbf16, #tpu.memory_space<vmem>>, %arg6: memref<1x128xf32, #tpu.memory_space<vmem>>, %arg7: memref<128x128xbf16, #tpu.memory_space<vmem>>, %arg8: memref<1x128xf32, #tpu.memory_space<vmem>>, %arg9: memref<128x256xbf16, #tpu.memory_space<vmem>>, %arg10: memref<1x256xf32, #tpu.memory_space<vmem>>, %arg11: memref<256x512xbf16, #tpu.memory_space<vmem>>, %arg12: memref<1x512xf32, #tpu.memory_space<vmem>>, %arg13: memref<512x128xbf16, #tpu.memory_space<vmem>>, %arg14: memref<1x128xf32, #tpu.memory_space<vmem>>, %arg15: memref<2x128xf32, #tpu.memory_space<vmem>>, %arg16: memref<2x512xf32, #tpu.memory_space<vmem>>) attributes {dimension_semantics = [#tpu.dimension_semantics<arbitrary>], iteration_bounds = array<i64: 1>, scalar_prefetch = 0 : i64, scratch_operands = 1 : i64, tpu.core_type = #tpu.core_type<tc>, window_params = [{transform_indices = @transform_0, window_bounds = array<i64: 128, 128>}, {transform_indices = @transform_1, window_bounds = array<i64: 2, 128>}, {pipeline_mode = #tpu.pipeline_mode<synchronous>, transform_indices = @transform_2, window_bounds = array<i64: 128, 128>}, {pipeline_mode = #tpu.pipeline_mode<synchronous>, transform_indices = @transform_3, window_bounds = array<i64: 1, 128>}, {pipeline_mode = #tpu.pipeline_mode<synchronous>, transform_indices = @transform_4, window_bounds = array<i64: 128, 128>}, {pipeline_mode = #tpu.pipeline_mode<synchronous>, transform_indices = @transform_5, window_bounds = array<i64: 1, 128>}, {pipeline_mode = #tpu.pipeline_mode<synchronous>, transform_indices = @transform_6, window_bounds = array<i64: 128, 128>}, {pipeline_mode = #tpu.pipeline_mode<synchronous>, transform_indices = @transform_7, window_bounds = array<i64: 1, 128>}, {pipeline_mode = #tpu.pipeline_mode<synchronous>, transform_indices = @transform_8, window_bounds = array<i64: 128, 256>}, {pipeline_mode = #tpu.pipeline_mode<synchronous>, transform_indices = @transform_9, window_bounds = array<i64: 1, 256>}, {pipeline_mode = #tpu.pipeline_mode<synchronous>, transform_indices = @transform_10, window_bounds = array<i64: 256, 512>}, {pipeline_mode = #tpu.pipeline_mode<synchronous>, transform_indices = @transform_11, window_bounds = array<i64: 1, 512>}, {pipeline_mode = #tpu.pipeline_mode<synchronous>, transform_indices = @transform_12, window_bounds = array<i64: 512, 128>}, {pipeline_mode = #tpu.pipeline_mode<synchronous>, transform_indices = @transform_13, window_bounds = array<i64: 1, 128>}, {pipeline_mode = #tpu.pipeline_mode<synchronous>, transform_indices = @transform_14, window_bounds = array<i64: 2, 128>}]} {
    %c0_i32 = arith.constant 0 : i32
    %0 = arith.cmpi eq, %arg0, %c0_i32 : i32
    %1 = arith.extui %0 : i1 to i32
    %c0_i32_0 = arith.constant 0 : i32
    %2 = arith.cmpi ne, %1, %c0_i32_0 : i32
    scf.if %2 {
      %cst_55 = arith.constant 0.000000e+00 : f32
      %107 = vector.broadcast %cst_55 : f32 to vector<2x512xf32>
      %c0_56 = arith.constant 0 : index
      %c0_57 = arith.constant 0 : index
      %108 = vector.load %arg16[%c0_56, %c0_57] : memref<2x512xf32, #tpu.memory_space<vmem>>, vector<2x512xf32>
      tpu.vector_store %arg16[%c0_56, %c0_57], %107 {strides = array<i32>} : memref<2x512xf32, #tpu.memory_space<vmem>>, vector<2x512xf32>,
    } else {
    }
    %c0 = arith.constant 0 : index
    %c0_1 = arith.constant 0 : index
    %3 = vector.load %arg1[%c0, %c0_1] : memref<128x128xbf16, #tpu.memory_space<vmem>>, vector<128x128xbf16>
    %c0_2 = arith.constant 0 : index
    %c0_3 = arith.constant 0 : index
    %4 = vector.load %arg3[%c0_2, %c0_3] : memref<128x128xbf16, #tpu.memory_space<vmem>>, vector<128x128xbf16>
    %cst = arith.constant dense<0.000000e+00> : vector<128x128xf32>
    %5 = tpu.matmul %3, %4, %cst {dimension_numbers = #tpu.dot_dimension_numbers<[1], [0], [0], [1], [0, 0, 1, 1], [], []>} : vector<128x128xbf16>, vector<128x128xbf16>, vector<128x128xf32> -> vector<128x128xf32>
    %c0_4 = arith.constant 0 : index
    %c0_5 = arith.constant 0 : index
    %6 = vector.load %arg4[%c0_4, %c0_5] : memref<1x128xf32, #tpu.memory_space<vmem>>, vector<1x128xf32>
    %7 = vector.broadcast %6 : vector<1x128xf32> to vector<128x128xf32>
    %8 = arith.addf %5, %7 : vector<128x128xf32>
    %9 = arith.mulf %8, %8 : vector<128x128xf32>
    %10 = arith.mulf %8, %9 : vector<128x128xf32>
    %cst_6 = arith.constant 4.471500e-02 : f32
    %11 = vector.broadcast %cst_6 : f32 to vector<128x128xf32>
    %12 = arith.mulf %11, %10 : vector<128x128xf32>
    %13 = arith.addf %8, %12 : vector<128x128xf32>
    %cst_7 = arith.constant 0.797884583 : f32
    %14 = vector.broadcast %cst_7 : f32 to vector<128x128xf32>
    %15 = arith.mulf %14, %13 : vector<128x128xf32>
    %16 = math.tanh %15 : vector<128x128xf32>
    %cst_8 = arith.constant 1.000000e+00 : f32
    %17 = vector.broadcast %cst_8 : f32 to vector<128x128xf32>
    %18 = arith.addf %17, %16 : vector<128x128xf32>
    %cst_9 = arith.constant 5.000000e-01 : f32
    %19 = vector.broadcast %cst_9 : f32 to vector<128x128xf32>
    %20 = arith.mulf %19, %18 : vector<128x128xf32>
    %21 = arith.mulf %8, %20 : vector<128x128xf32>
    %22 = arith.truncf %21 : vector<128x128xf32> to vector<128x128xbf16>
    %c0_10 = arith.constant 0 : index
    %c0_11 = arith.constant 0 : index
    %23 = vector.load %arg5[%c0_10, %c0_11] : memref<128x128xbf16, #tpu.memory_space<vmem>>, vector<128x128xbf16>
    %cst_12 = arith.constant dense<0.000000e+00> : vector<128x128xf32>
    %24 = tpu.matmul %22, %23, %cst_12 {dimension_numbers = #tpu.dot_dimension_numbers<[1], [0], [0], [1], [0, 0, 1, 1], [], []>} : vector<128x128xbf16>, vector<128x128xbf16>, vector<128x128xf32> -> vector<128x128xf32>
    %c0_13 = arith.constant 0 : index
    %c0_14 = arith.constant 0 : index
    %25 = vector.load %arg6[%c0_13, %c0_14] : memref<1x128xf32, #tpu.memory_space<vmem>>, vector<1x128xf32>
    %26 = vector.broadcast %25 : vector<1x128xf32> to vector<128x128xf32>
    %27 = arith.addf %24, %26 : vector<128x128xf32>
    %28 = arith.mulf %27, %27 : vector<128x128xf32>
    %29 = arith.mulf %27, %28 : vector<128x128xf32>
    %cst_15 = arith.constant 4.471500e-02 : f32
    %30 = vector.broadcast %cst_15 : f32 to vector<128x128xf32>
    %31 = arith.mulf %30, %29 : vector<128x128xf32>
    %32 = arith.addf %27, %31 : vector<128x128xf32>
    %cst_16 = arith.constant 0.797884583 : f32
    %33 = vector.broadcast %cst_16 : f32 to vector<128x128xf32>
    %34 = arith.mulf %33, %32 : vector<128x128xf32>
    %35 = math.tanh %34 : vector<128x128xf32>
    %cst_17 = arith.constant 1.000000e+00 : f32
    %36 = vector.broadcast %cst_17 : f32 to vector<128x128xf32>
    %37 = arith.addf %36, %35 : vector<128x128xf32>
    %cst_18 = arith.constant 5.000000e-01 : f32
    %38 = vector.broadcast %cst_18 : f32 to vector<128x128xf32>
    %39 = arith.mulf %38, %37 : vector<128x128xf32>
    %40 = arith.mulf %27, %39 : vector<128x128xf32>
    %41 = arith.truncf %40 : vector<128x128xf32> to vector<128x128xbf16>
    %c0_19 = arith.constant 0 : index
    %c0_20 = arith.constant 0 : index
    %42 = vector.load %arg7[%c0_19, %c0_20] : memref<128x128xbf16, #tpu.memory_space<vmem>>, vector<128x128xbf16>
    %cst_21 = arith.constant dense<0.000000e+00> : vector<128x128xf32>
    %43 = tpu.matmul %41, %42, %cst_21 {dimension_numbers = #tpu.dot_dimension_numbers<[1], [0], [0], [1], [0, 0, 1, 1], [], []>} : vector<128x128xbf16>, vector<128x128xbf16>, vector<128x128xf32> -> vector<128x128xf32>
    %c0_22 = arith.constant 0 : index
    %c0_23 = arith.constant 0 : index
    %44 = vector.load %arg8[%c0_22, %c0_23] : memref<1x128xf32, #tpu.memory_space<vmem>>, vector<1x128xf32>
    %45 = vector.broadcast %44 : vector<1x128xf32> to vector<128x128xf32>
    %46 = arith.addf %43, %45 : vector<128x128xf32>
    %47 = arith.mulf %46, %46 : vector<128x128xf32>
    %48 = arith.mulf %46, %47 : vector<128x128xf32>
    %cst_24 = arith.constant 4.471500e-02 : f32
    %49 = vector.broadcast %cst_24 : f32 to vector<128x128xf32>
    %50 = arith.mulf %49, %48 : vector<128x128xf32>
    %51 = arith.addf %46, %50 : vector<128x128xf32>
    %cst_25 = arith.constant 0.797884583 : f32
    %52 = vector.broadcast %cst_25 : f32 to vector<128x128xf32>
    %53 = arith.mulf %52, %51 : vector<128x128xf32>
    %54 = math.tanh %53 : vector<128x128xf32>
    %cst_26 = arith.constant 1.000000e+00 : f32
    %55 = vector.broadcast %cst_26 : f32 to vector<128x128xf32>
    %56 = arith.addf %55, %54 : vector<128x128xf32>
    %cst_27 = arith.constant 5.000000e-01 : f32
    %57 = vector.broadcast %cst_27 : f32 to vector<128x128xf32>
    %58 = arith.mulf %57, %56 : vector<128x128xf32>
    %59 = arith.mulf %46, %58 : vector<128x128xf32>
    %60 = arith.truncf %59 : vector<128x128xf32> to vector<128x128xbf16>
    %c0_28 = arith.constant 0 : index
    %c0_29 = arith.constant 0 : index
    %61 = vector.load %arg9[%c0_28, %c0_29] : memref<128x256xbf16, #tpu.memory_space<vmem>>, vector<128x256xbf16>
    %cst_30 = arith.constant dense<0.000000e+00> : vector<128x256xf32>
    %62 = tpu.matmul %60, %61, %cst_30 {dimension_numbers = #tpu.dot_dimension_numbers<[1], [0], [0], [1], [0, 0, 1, 1], [], []>} : vector<128x128xbf16>, vector<128x256xbf16>, vector<128x256xf32> -> vector<128x256xf32>
    %c0_31 = arith.constant 0 : index
    %c0_32 = arith.constant 0 : index
    %63 = vector.load %arg10[%c0_31, %c0_32] : memref<1x256xf32, #tpu.memory_space<vmem>>, vector<1x256xf32>
    %64 = vector.broadcast %63 : vector<1x256xf32> to vector<128x256xf32>
    %65 = arith.addf %62, %64 : vector<128x256xf32>
    %66 = arith.mulf %65, %65 : vector<128x256xf32>
    %67 = arith.mulf %65, %66 : vector<128x256xf32>
    %cst_33 = arith.constant 4.471500e-02 : f32
    %68 = vector.broadcast %cst_33 : f32 to vector<128x256xf32>
    %69 = arith.mulf %68, %67 : vector<128x256xf32>
    %70 = arith.addf %65, %69 : vector<128x256xf32>
    %cst_34 = arith.constant 0.797884583 : f32
    %71 = vector.broadcast %cst_34 : f32 to vector<128x256xf32>
    %72 = arith.mulf %71, %70 : vector<128x256xf32>
    %73 = math.tanh %72 : vector<128x256xf32>
    %cst_35 = arith.constant 1.000000e+00 : f32
    %74 = vector.broadcast %cst_35 : f32 to vector<128x256xf32>
    %75 = arith.addf %74, %73 : vector<128x256xf32>
    %cst_36 = arith.constant 5.000000e-01 : f32
    %76 = vector.broadcast %cst_36 : f32 to vector<128x256xf32>
    %77 = arith.mulf %76, %75 : vector<128x256xf32>
    %78 = arith.mulf %65, %77 : vector<128x256xf32>
    %79 = arith.truncf %78 : vector<128x256xf32> to vector<128x256xbf16>
    %c0_37 = arith.constant 0 : index
    %c0_38 = arith.constant 0 : index
    %80 = vector.load %arg11[%c0_37, %c0_38] : memref<256x512xbf16, #tpu.memory_space<vmem>>, vector<256x512xbf16>
    %cst_39 = arith.constant dense<0.000000e+00> : vector<128x512xf32>
    %81 = tpu.matmul %79, %80, %cst_39 {dimension_numbers = #tpu.dot_dimension_numbers<[1], [0], [0], [1], [0, 0, 1, 1], [], []>} : vector<128x256xbf16>, vector<256x512xbf16>, vector<128x512xf32> -> vector<128x512xf32>
    %c0_40 = arith.constant 0 : index
    %c0_41 = arith.constant 0 : index
    %82 = vector.load %arg12[%c0_40, %c0_41] : memref<1x512xf32, #tpu.memory_space<vmem>>, vector<1x512xf32>
    %83 = vector.broadcast %82 : vector<1x512xf32> to vector<128x512xf32>
    %84 = arith.addf %81, %83 : vector<128x512xf32>
    %85 = arith.mulf %84, %84 : vector<128x512xf32>
    %86 = arith.mulf %84, %85 : vector<128x512xf32>
    %cst_42 = arith.constant 4.471500e-02 : f32
    %87 = vector.broadcast %cst_42 : f32 to vector<128x512xf32>
    %88 = arith.mulf %87, %86 : vector<128x512xf32>
    %89 = arith.addf %84, %88 : vector<128x512xf32>
    %cst_43 = arith.constant 0.797884583 : f32
    %90 = vector.broadcast %cst_43 : f32 to vector<128x512xf32>
    %91 = arith.mulf %90, %89 : vector<128x512xf32>
    %92 = math.tanh %91 : vector<128x512xf32>
    %cst_44 = arith.constant 1.000000e+00 : f32
    %93 = vector.broadcast %cst_44 : f32 to vector<128x512xf32>
    %94 = arith.addf %93, %92 : vector<128x512xf32>
    %cst_45 = arith.constant 5.000000e-01 : f32
    %95 = vector.broadcast %cst_45 : f32 to vector<128x512xf32>
    %96 = arith.mulf %95, %94 : vector<128x512xf32>
    %97 = arith.mulf %84, %96 : vector<128x512xf32>
    %98 = arith.truncf %97 : vector<128x512xf32> to vector<128x512xbf16>
    %c0_46 = arith.constant 0 : index
    %c0_47 = arith.constant 0 : index
    %99 = vector.load %arg16[%c0_46, %c0_47] : memref<2x512xf32, #tpu.memory_space<vmem>>, vector<2x512xf32>
    %c0_48 = arith.constant 0 : index
    %c0_49 = arith.constant 0 : index
    %100 = vector.load %arg2[%c0_48, %c0_49] : memref<2x128xbf16, #tpu.memory_space<vmem>>, vector<2x128xbf16>
    %cst_50 = arith.constant dense<0.000000e+00> : vector<2x512xf32>
    %101 = tpu.matmul %100, %98, %cst_50 {dimension_numbers = #tpu.dot_dimension_numbers<[1], [0], [0], [1], [0, 0, 1, 1], [], []>} : vector<2x128xbf16>, vector<128x512xbf16>, vector<2x512xf32> -> vector<2x512xf32>
    %102 = arith.addf %99, %101 : vector<2x512xf32>
    %c0_51 = arith.constant 0 : index
    %c0_52 = arith.constant 0 : index
    %103 = vector.load %arg16[%c0_51, %c0_52] : memref<2x512xf32, #tpu.memory_space<vmem>>, vector<2x512xf32>
    tpu.vector_store %arg16[%c0_51, %c0_52], %102 {strides = array<i32>} : memref<2x512xf32, #tpu.memory_space<vmem>>, vector<2x512xf32>,
    %c0_i32_53 = arith.constant 0 : i32
    %104 = arith.cmpi eq, %arg0, %c0_i32_53 : i32
    %105 = arith.extui %104 : i1 to i32
    %c0_i32_54 = arith.constant 0 : i32
    %106 = arith.cmpi ne, %105, %c0_i32_54 : i32
    scf.if %106 {
      %c0_55 = arith.constant 0 : index
      %c0_56 = arith.constant 0 : index
      %107 = vector.load %arg16[%c0_55, %c0_56] : memref<2x512xf32, #tpu.memory_space<vmem>>, vector<2x512xf32>
      %108 = arith.truncf %107 : vector<2x512xf32> to vector<2x512xbf16>
      %c0_57 = arith.constant 0 : index
      %c0_58 = arith.constant 0 : index
      %109 = vector.load %arg13[%c0_57, %c0_58] : memref<512x128xbf16, #tpu.memory_space<vmem>>, vector<512x128xbf16>
      %cst_59 = arith.constant dense<0.000000e+00> : vector<2x128xf32>
      %110 = tpu.matmul %108, %109, %cst_59 {dimension_numbers = #tpu.dot_dimension_numbers<[1], [0], [0], [1], [0, 0, 1, 1], [], []>} : vector<2x512xbf16>, vector<512x128xbf16>, vector<2x128xf32> -> vector<2x128xf32>
      %c0_60 = arith.constant 0 : index
      %c0_61 = arith.constant 0 : index
      %111 = vector.load %arg14[%c0_60, %c0_61] : memref<1x128xf32, #tpu.memory_space<vmem>>, vector<1x128xf32>
      %112 = vector.broadcast %111 : vector<1x128xf32> to vector<2x128xf32>
      %113 = arith.addf %110, %112 : vector<2x128xf32>
      %c0_62 = arith.constant 0 : index
      %c0_63 = arith.constant 0 : index
      %114 = vector.load %arg15[%c0_62, %c0_63] : memref<2x128xf32, #tpu.memory_space<vmem>>, vector<2x128xf32>
      tpu.vector_store %arg15[%c0_62, %c0_63], %113 {strides = array<i32>} : memref<2x128xf32, #tpu.memory_space<vmem>>, vector<2x128xf32>,
    } else {
    }
    return
  }
  func.func @transform_0(%arg0: i32) -> (i32, i32) {
    %c0_i32 = arith.constant 0 : i32
    %c0_i32_0 = arith.constant 0 : i32
    return %arg0, %c0_i32 : i32, i32
  }
  func.func @transform_1(%arg0: i32) -> (i32, i32) {
    %c0_i32 = arith.constant 0 : i32
    %c0_i32_0 = arith.constant 0 : i32
    return %c0_i32, %arg0 : i32, i32
  }
  func.func @transform_2(%arg0: i32) -> (i32, i32) {
    %c0_i32 = arith.constant 0 : i32
    %c0_i32_0 = arith.constant 0 : i32
    %c0_i32_1 = arith.constant 0 : i32
    return %c0_i32, %c0_i32_0 : i32, i32
  }
  func.func @transform_3(%arg0: i32) -> (i32, i32) {
    %c0_i32 = arith.constant 0 : i32
    %c0_i32_0 = arith.constant 0 : i32
    %c0_i32_1 = arith.constant 0 : i32
    return %c0_i32, %c0_i32_0 : i32, i32
  }
  func.func @transform_4(%arg0: i32) -> (i32, i32) {
    %c0_i32 = arith.constant 0 : i32
    %c0_i32_0 = arith.constant 0 : i32
    %c0_i32_1 = arith.constant 0 : i32
    return %c0_i32, %c0_i32_0 : i32, i32
  }
  func.func @transform_5(%arg0: i32) -> (i32, i32) {
    %c0_i32 = arith.constant 0 : i32
    %c0_i32_0 = arith.constant 0 : i32
    %c0_i32_1 = arith.constant 0 : i32
    return %c0_i32, %c0_i32_0 : i32, i32
  }
  func.func @transform_6(%arg0: i32) -> (i32, i32) {
    %c0_i32 = arith.constant 0 : i32
    %c0_i32_0 = arith.constant 0 : i32
    %c0_i32_1 = arith.constant 0 : i32
    return %c0_i32, %c0_i32_0 : i32, i32
  }
  func.func @transform_7(%arg0: i32) -> (i32, i32) {
    %c0_i32 = arith.constant 0 : i32
    %c0_i32_0 = arith.constant 0 : i32
    %c0_i32_1 = arith.constant 0 : i32
    return %c0_i32, %c0_i32_0 : i32, i32
  }
  func.func @transform_8(%arg0: i32) -> (i32, i32) {
    %c0_i32 = arith.constant 0 : i32
    %c0_i32_0 = arith.constant 0 : i32
    %c0_i32_1 = arith.constant 0 : i32
    return %c0_i32, %c0_i32_0 : i32, i32
  }
  func.func @transform_9(%arg0: i32) -> (i32, i32) {
    %c0_i32 = arith.constant 0 : i32
    %c0_i32_0 = arith.constant 0 : i32
    %c0_i32_1 = arith.constant 0 : i32
    return %c0_i32, %c0_i32_0 : i32, i32
  }
  func.func @transform_10(%arg0: i32) -> (i32, i32) {
    %c0_i32 = arith.constant 0 : i32
    %c0_i32_0 = arith.constant 0 : i32
    %c0_i32_1 = arith.constant 0 : i32
    return %c0_i32, %c0_i32_0 : i32, i32
  }
  func.func @transform_11(%arg0: i32) -> (i32, i32) {
    %c0_i32 = arith.constant 0 : i32
    %c0_i32_0 = arith.constant 0 : i32
    %c0_i32_1 = arith.constant 0 : i32
    return %c0_i32, %c0_i32_0 : i32, i32
  }
  func.func @transform_12(%arg0: i32) -> (i32, i32) {
    %c0_i32 = arith.constant 0 : i32
    %c0_i32_0 = arith.constant 0 : i32
    %c0_i32_1 = arith.constant 0 : i32
    return %c0_i32, %c0_i32_0 : i32, i32
  }
  func.func @transform_13(%arg0: i32) -> (i32, i32) {
    %c0_i32 = arith.constant 0 : i32
    %c0_i32_0 = arith.constant 0 : i32
    %c0_i32_1 = arith.constant 0 : i32
    return %c0_i32, %c0_i32_0 : i32, i32
  }
  func.func @transform_14(%arg0: i32) -> (i32, i32) {
    %c0_i32 = arith.constant 0 : i32
    %c0_i32_0 = arith.constant 0 : i32
    %c0_i32_1 = arith.constant 0 : i32
    return %c0_i32, %c0_i32_0 : i32, i32
  }
}

</mosaic_0001>

<bundles_post_ra>
// kernel: forward.1
= control target key start
LH: loop header
LB: loop body
LE: loop exit
PB: predicated region body
PF: predicated region fallthrough
CT: control target
= control target key end

     0   :  { %s6277_s0 = inlined_call_operand.vmem [shape: bf16[128,128], index: 0, kind: input, shape index: {}]   ;;  %s6278_s1 = inlined_call_operand.vmem [shape: bf16[2,128], index: 1, kind: input, shape index: {}]   ;;  %s6279_s2 = inlined_call_operand.vmem [shape: bf16[128,128], index: 2, kind: input, shape index: {}]   ;;  %s6280_s3 = inlined_call_operand.vmem [shape: f32[1,128], index: 3, kind: input, shape index: {}]   ;;  %s6281_s4 = inlined_call_operand.vmem [shape: bf16[128,128], index: 4, kind: input, shape index: {}]   ;;  %s6282_s5 = inlined_call_operand.vmem [shape: f32[1,128], index: 5, kind: input, shape index: {}]   ;;  %s6283_s6 = inlined_call_operand.vmem [shape: bf16[128,128], index: 6, kind: input, shape index: {}]   ;;  %s6284_s7 = inlined_call_operand.vmem [shape: f32[1,128], index: 7, kind: input, shape index: {}]   ;;  %s6285_s8 = inlined_call_operand.vmem [shape: bf16[128,256], index: 8, kind: input, shape index: {}]   ;;  %s6286_s9 = inlined_call_operand.vmem [shape: f32[1,256], index: 9, kind: input, shape index: {}]   ;;  %s6287_s10 = inlined_call_operand.vmem [shape: bf16[256,512], index: 10, kind: input, shape index: {}]   ;;  %s6288_s11 = inlined_call_operand.vmem [shape: f32[1,512], index: 11, kind: input, shape index: {}]   ;;  %s6289_s12 = inlined_call_operand.vmem [shape: bf16[512,128], index: 12, kind: input, shape index: {}]   ;;  %s6290_s13 = inlined_call_operand.vmem [shape: f32[1,128], index: 13, kind: input, shape index: {}]   ;;  %s6291_s14 = inlined_call_operand.hbm [shape: f32[2,128], index: 14, kind: output, shape index: {}]  }
   0x1   :  { %v3679_v0 = vld [vmem:[%s6279_s2] sm:$0xff]   ;;  %v3680_v1 = vld [vmem:[%s6279_s2 + $0x8] sm:$0xff]   ;;  %v3681_v2 = vld [vmem:[%s6279_s2 + $0x10] sm:$0xff]  }
   0x2   :  { %3580 = vmatprep.subr.bf16.mxu0 %v3679_v0  ;;  %v3682_v3 = vld [vmem:[%s6279_s2 + $0x18] sm:$0xff]   ;;  %v3687_v4 = vld [vmem:[%s6277_s0] sm:$0xff]   ;;  %v3684_v6 = vld [vmem:[%s6279_s2 + $0x28] sm:$0xff]  }
   0x3   :  { %3581 = vmatpush3.bf16.msra.mxu0 %v3679_v0  ;;  %3596 = vmatprep.mubr.bf16.mxu0 %v3687_v4  ;;  %v3683_v5 = vld [vmem:[%s6279_s2 + $0x20] sm:$0xff]   ;;  %v3685_v7 = vld [vmem:[%s6279_s2 + $0x30] sm:$0xff]   ;;  %v3686_v8 = vld [vmem:[%s6279_s2 + $0x38] sm:$0xff]  }
   0x4   :  { %3582 = vmatprep.subr.bf16.mxu0 %v3680_v1  ;;  %v3688_v9 = vld [vmem:[%s6277_s0 + $0x8] sm:$0xff]   ;;  %v3689_v10 = vld [vmem:[%s6277_s0 + $0x10] sm:$0xff]   ;;  %v3690_v11 = vld [vmem:[%s6277_s0 + $0x18] sm:$0xff]  }
   0x5   :  { %v3691_v12 = vld [vmem:[%s6277_s0 + $0x20] sm:$0xff]   ;;  %v3692_v13 = vld [vmem:[%s6277_s0 + $0x28] sm:$0xff]   ;;  %v3693_v14 = vld [vmem:[%s6277_s0 + $0x30] sm:$0xff]  }
   0x6   :  { %v3694_v15 = vld [vmem:[%s6277_s0 + $0x38] sm:$0xff]  }
   0x7   :  { %3583 = vmatpush3.bf16.msra.mxu0 %v3680_v1 }
   0x8   :  { %3584 = vmatprep.subr.bf16.mxu0 %v3681_v2 }
   0xb   :  { %3585 = vmatpush3.bf16.msra.mxu0 %v3681_v2 }
   0xc   :  { %3586 = vmatprep.subr.bf16.mxu0 %v3682_v3 }
   0xf   :  { %3587 = vmatpush3.bf16.msra.mxu0 %v3682_v3 }
  0x10   :  { %3588 = vmatprep.subr.bf16.mxu0 %v3683_v5 }
  0x13   :  { %3589 = vmatpush3.bf16.msra.mxu0 %v3683_v5 }
  0x14   :  { %3590 = vmatprep.subr.bf16.mxu0 %v3684_v6 }
  0x17   :  { %3591 = vmatpush3.bf16.msra.mxu0 %v3684_v6 }
  0x18   :  { %3592 = vmatprep.subr.bf16.mxu0 %v3685_v7 }
  0x1b   :  { %3593 = vmatpush3.bf16.msra.mxu0 %v3685_v7 }
  0x1c   :  { %3594 = vmatprep.subr.bf16.mxu0 %v3686_v8 }
  0x1f   :  { %3595 = vmatpush3.bf16.msra.mxu0 %v3686_v8 }
  0x22   :  { %3597 = vmatmul.mubr.bf16.vlgmr.msra.gmra.mrb[0].mxu0 %v3688_v9 }
  0x23   :  { %3600 = vmatprep.mubr.bf16.mxu0 %v3689_v10 }
  0x2a   :  { %3601 = vmatmul.mubr.bf16.gmra.mrb[4].mxu0 %v3690_v11 }
  0x2b   :  { %3604 = vmatprep.mubr.bf16.mxu0 %v3691_v12 }
  0x32   :  { %3605 = vmatmul.mubr.bf16.gmra.mrb[8].mxu0 %v3692_v13 }
  0x33   :  { %3608 = vmatprep.mubr.bf16.mxu0 %v3693_v14 }
  0x3a   :  { %3609 = vmatmul.mubr.bf16.gmra.mrb[12].mxu0 %v3694_v15 }
  0x3b   :  { %19 = vsyncpa [#allocation4], 0  ;;  %v3695_v16 = vld [vmem:[%s6281_s4] sm:$0xff]   ;;  %v3696_v17 = vld [vmem:[%s6281_s4 + $0x8] sm:$0xff]   ;;  %s4177_s15 = smov [#allocation3]  }
  0x3c   :  { %3612 = vmatprep.subr.bf16.mxu1 %v3695_v16  ;;  %v3697_v18 = vld [vmem:[%s6281_s4 + $0x10] sm:$0xff]   ;;  %v3698_v19 = vld [vmem:[%s6281_s4 + $0x18] sm:$0xff]   ;;  %v3699_v20 = vld [vmem:[%s6281_s4 + $0x20] sm:$0xff]   ;;  %s3331_s16 = sshll.u32 %s4177_s15, 4  ;;  %s3332_s16 = int_to_ptr.vmem [resolvable:$true] %s3331_s16 }
  0x3d   :  { %3613 = vmatpush3.bf16.msra.mxu1 %v3695_v16  ;;  %v3700_v21 = vld [vmem:[%s6281_s4 + $0x28] sm:$0xff]   ;;  %v3701_v22 = vld [vmem:[%s6281_s4 + $0x30] sm:$0xff]   ;;  %v3702_v23 = vld [vmem:[%s6281_s4 + $0x38] sm:$0xff]   ;;  %s4151_s17 = scalar_lea.vmem %s3332_s16, 32  ;;  %p4156_p1 = scmp.lt.s32.totalorder %s3332_s16, %s3332_s16 }
  0x3e   :  { %3614 = vmatprep.subr.bf16.mxu1 %v3696_v17  ;;  %v4328_v24 = vld [vmem:[%s6280_s3] ss:$0 sm:$0xff]  ;;  %p4152_p0 = scmp.ne.s32.totalorder %s3332_s16, %s4151_s17  ;;  %p4157_p2 = scmp.lt.s32.totalorder %s4151_s17, %s4151_s17 }
  0x40   :  { %p4158_p3 = por %p4157_p2, %p4156_p1 }
  0x41   :  { %3615 = vmatpush3.bf16.msra.mxu1 %v3696_v17 }
  0x42   :  { %3616 = vmatprep.subr.bf16.mxu1 %v3697_v18  ;;  %p4159_p4 = pnand %p4158_p3, %p4152_p0 }
  0x45   :  { %3617 = vmatpush3.bf16.msra.mxu1 %v3697_v18 }
  0x46   :  { %3618 = vmatprep.subr.bf16.mxu1 %v3698_v19 }
  0x49   :  { %3619 = vmatpush3.bf16.msra.mxu1 %v3698_v19 }
  0x4a   :  { %3620 = vmatprep.subr.bf16.mxu1 %v3699_v20 }
  0x4d   :  { %3621 = vmatpush3.bf16.msra.mxu1 %v3699_v20 }
  0x4e   :  { %3622 = vmatprep.subr.bf16.mxu1 %v3700_v21 }
  0x51   :  { %3623 = vmatpush3.bf16.msra.mxu1 %v3700_v21 }
  0x52   :  { %3624 = vmatprep.subr.bf16.mxu1 %v3701_v22 }
  0x55   :  { %3625 = vmatpush3.bf16.msra.mxu1 %v3701_v22 }
  0x56   :  { %3626 = vmatprep.subr.bf16.mxu1 %v3702_v23 }
  0x59   :  { %3627 = vmatpush3.bf16.msra.mxu1 %v3702_v23 }
  0xf5   :  { %v3598_v25 = vpop.f32.mrb[0].mxu0 }
  0xf6   :  { %v4331_v26 = vadd.f32 %v3598_v25, %v4328_v24  ;;  %v223_v27 = vpop.f32.mrb[1].mxu0 }
  0xf7   :  { %v4334_v28 = vadd.f32 %v4328_v24, %v223_v27  ;;  %v3599_v29 = vpop.f32.mrb[2].mxu0 }
  0xf8   :  { %v288_v30 = vmul.f32 %v4331_v26, %v4331_v26  ;;  %v4339_v31 = vadd.f32 %v3599_v29, %v4328_v24  ;;  %v226_v32 = vpop.f32.mrb[3].mxu0 }
  0xf9   :  { %v286_v33 = vmul.f32 %v4334_v28, %v4334_v28  ;;  %v4344_v34 = vadd.f32 %v4328_v24, %v226_v32 }
  0xfa   :  { %v304_v35 = vmul.f32 %v288_v30, %v4331_v26  ;;  %v289_v36 = vmul.f32 %v4339_v31, %v4339_v31 }
  0xfb   :  { %v302_v37 = vmul.f32 %v286_v33, %v4334_v28  ;;  %v287_v38 = vmul.f32 %v4344_v34, %v4344_v34 }
  0xfc   :  { %v320_v39 = vmul.f32 0.044715, %v304_v35  ;;  %v305_v40 = vmul.f32 %v289_v36, %v4339_v31 }
  0xfd   :  { %v318_v41 = vmul.f32 0.044715, %v302_v37  ;;  %v303_v42 = vmul.f32 %v287_v38, %v4344_v34  ;;  %v3602_v43 = vpop.f32.mrb[4].mxu0 }
  0xfe   :  { %v336_v44 = vadd.f32 %v320_v39, %v4331_v26  ;;  %v321_v45 = vmul.f32 0.044715, %v305_v40  ;;  %v4356_v46 = vadd.f32 %v3602_v43, %v4328_v24  ;;  %v239_v47 = vpop.f32.mrb[5].mxu0 }
  0xff   :  { %v319_v48 = vmul.f32 0.044715, %v303_v42  ;;  %v4359_v49 = vadd.f32 %v4328_v24, %v239_v47  ;;  %v3603_v50 = vpop.f32.mrb[6].mxu0  ;;  %v334_v51 = vadd.f32 %v318_v41, %v4334_v28 }
 0x100   :  { %v352_v52 = vmul.f32 0.7978846, %v336_v44  ;;  %v337_v53 = vadd.f32 %v321_v45, %v4339_v31  ;;  %v292_v54 = vmul.f32 %v4356_v46, %v4356_v46  ;;  %v4366_v55 = vadd.f32 %v3603_v50, %v4328_v24  ;;  %v242_v56 = vpop.f32.mrb[7].mxu0 }
 0x101   :  { %v290_v57 = vmul.f32 %v4359_v49, %v4359_v49  ;;  %v4371_v58 = vadd.f32 %v4328_v24, %v242_v56  ;;  %v335_v59 = vadd.f32 %v319_v48, %v4344_v34  ;;  %v350_v60 = vmul.f32 0.7978846, %v334_v51 }
 0x102   :  { %3863 = vtanh.f32 %v352_v52  ;;  %v353_v61 = vmul.f32 0.7978846, %v337_v53  ;;  %v308_v62 = vmul.f32 %v292_v54, %v4356_v46  ;;  %v293_v63 = vmul.f32 %v4366_v55, %v4366_v55 }
 0x103   :  { %v306_v0 = vmul.f32 %v290_v57, %v4359_v49  ;;  %v291_v1 = vmul.f32 %v4371_v58, %v4371_v58  ;;  %v351_v2 = vmul.f32 0.7978846, %v335_v59  ;;  %3865 = vtanh.f32 %v350_v60 }
 0x104   :  { %3867 = vtanh.f32 %v353_v61  ;;  %v324_v3 = vmul.f32 0.044715, %v308_v62  ;;  %v309_v4 = vmul.f32 %v293_v63, %v4366_v55 }
 0x105   :  { %v322_v5 = vmul.f32 0.044715, %v306_v0  ;;  %v307_v6 = vmul.f32 %v291_v1, %v4371_v58  ;;  %v3606_v7 = vpop.f32.mrb[8].mxu0  ;;  %3869 = vtanh.f32 %v351_v2 }
 0x106   :  { %v340_v8 = vadd.f32 %v324_v3, %v4356_v46  ;;  %v325_v9 = vmul.f32 0.044715, %v309_v4  ;;  %v4384_v10 = vadd.f32 %v3606_v7, %v4328_v24  ;;  %v255_v11 = vpop.f32.mrb[9].mxu0 }
 0x107   :  { %v338_v12 = vadd.f32 %v322_v5, %v4359_v49  ;;  %v323_v13 = vmul.f32 0.044715, %v307_v6  ;;  %v4388_v14 = vadd.f32 %v4328_v24, %v255_v11  ;;  %v3607_v15 = vpop.f32.mrb[10].mxu0 }
 0x108   :  { %v356_v16 = vmul.f32 0.7978846, %v340_v8  ;;  %v341_v17 = vadd.f32 %v325_v9, %v4366_v55  ;;  %v296_v18 = vmul.f32 %v4384_v10, %v4384_v10  ;;  %v4394_v19 = vadd.f32 %v3607_v15, %v4328_v24  ;;  %v258_v20 = vpop.f32.mrb[11].mxu0 }
 0x109   :  { %v354_v21 = vmul.f32 0.7978846, %v338_v12  ;;  %v339_v22 = vadd.f32 %v323_v13, %v4371_v58  ;;  %v294_v23 = vmul.f32 %v4388_v14, %v4388_v14  ;;  %v4400_v25 = vadd.f32 %v4328_v24, %v258_v20 }
 0x10a   :  { %3871 = vtanh.f32 %v356_v16  ;;  %v357_v27 = vmul.f32 0.7978846, %v341_v17  ;;  %v312_v29 = vmul.f32 %v296_v18, %v4384_v10  ;;  %v297_v30 = vmul.f32 %v4394_v19, %v4394_v19 }
 0x10b   :  { %3873 = vtanh.f32 %v354_v21  ;;  %v355_v32 = vmul.f32 0.7978846, %v339_v22  ;;  %v310_v33 = vmul.f32 %v294_v23, %v4388_v14  ;;  %v295_v35 = vmul.f32 %v4400_v25, %v4400_v25 }
 0x10c   :  { %v3864_v36 = vpop.eup %3863  ;;  %3875 = vtanh.f32 %v357_v27  ;;  %v328_v37 = vmul.f32 0.044715, %v312_v29  ;;  %v313_v38 = vmul.f32 %v297_v30, %v4394_v19 }
 0x10d   :  { %v3866_v39 = vpop.eup %3865  ;;  %3877 = vtanh.f32 %v355_v32  ;;  %v326_v40 = vmul.f32 0.044715, %v310_v33  ;;  %v311_v41 = vmul.f32 %v295_v35, %v4400_v25  ;;  %v3610_v42 = vpop.f32.mrb[12].mxu0  ;;  %v384_v43 = vadd.f32 1.0, %v3864_v36 }
 0x10e   :  { %v3868_v44 = vpop.eup %3867  ;;  %v344_v45 = vadd.f32 %v328_v37, %v4384_v10  ;;  %v329_v47 = vmul.f32 0.044715, %v313_v38  ;;  %v4412_v48 = vadd.f32 %v3610_v42, %v4328_v24  ;;  %v271_v50 = vpop.f32.mrb[13].mxu0  ;;  %v382_v51 = vadd.f32 1.0, %v3866_v39 }
 0x10f   :  { %v342_v52 = vadd.f32 %v326_v40, %v4388_v14  ;;  %v327_v53 = vmul.f32 0.044715, %v311_v41  ;;  %v4416_v54 = vadd.f32 %v4328_v24, %v271_v50  ;;  %v3611_v56 = vpop.f32.mrb[14].mxu0  ;;  %v385_v57 = vadd.f32 1.0, %v3868_v44  ;;  %v3870_v0 = vpop.eup %3869 }
 0x110   :  { %v360_v59 = vmul.f32 0.7978846, %v344_v45  ;;  %v345_v60 = vadd.f32 %v329_v47, %v4394_v19  ;;  %v300_v61 = vmul.f32 %v4412_v48, %v4412_v48  ;;  %v4422_v62 = vadd.f32 %v3611_v56, %v4328_v24  ;;  %v274_v63 = vpop.f32.mrb[15].mxu0 }
 0x111   :  { %v358_v1 = vmul.f32 0.7978846, %v342_v52  ;;  %v343_v2 = vadd.f32 %v327_v53, %v4400_v25  ;;  %v298_v3 = vmul.f32 %v4416_v54, %v4416_v54  ;;  %v4428_v4 = vadd.f32 %v4328_v24, %v274_v63 }
 0x112   :  { %3879 = vtanh.f32 %v360_v59  ;;  %v361_v5 = vmul.f32 0.7978846, %v345_v60  ;;  %v316_v6 = vmul.f32 %v300_v61, %v4412_v48  ;;  %v301_v7 = vmul.f32 %v4422_v62, %v4422_v62 }
 0x113   :  { %3881 = vtanh.f32 %v358_v1  ;;  %v359_v8 = vmul.f32 0.7978846, %v343_v2  ;;  %v314_v9 = vmul.f32 %v298_v3, %v4416_v54  ;;  %v299_v11 = vmul.f32 %v4428_v4, %v4428_v4 }
 0x114   :  { %v3872_v12 = vpop.eup %3871  ;;  %3883 = vtanh.f32 %v361_v5  ;;  %v332_v13 = vmul.f32 0.044715, %v316_v6  ;;  %v317_v24 = vmul.f32 %v301_v7, %v4422_v62  ;;  %v383_v15 = vadd.f32 1.0, %v3870_v0 }
 0x115   :  { %v3874_v16 = vpop.eup %3873  ;;  %3885 = vtanh.f32 %v359_v8  ;;  %v330_v17 = vmul.f32 0.044715, %v314_v9  ;;  %v315_v18 = vmul.f32 %v299_v11, %v4428_v4  ;;  %v398_v20 = vmul.f32 0.5, %v382_v51 }
 0x116   :  { %v3876_v21 = vpop.eup %3875  ;;  %v348_v22 = vadd.f32 %v332_v13, %v4412_v48  ;;  %v333_v23 = vmul.f32 0.044715, %v317_v24  ;;  %v399_v27 = vmul.f32 0.5, %v383_v15  ;;  %v400_v29 = vmul.f32 0.5, %v384_v43 }
 0x117   :  { %v3878_v30 = vpop.eup %3877  ;;  %v346_v32 = vadd.f32 %v330_v17, %v4416_v54  ;;  %v331_v33 = vmul.f32 0.044715, %v315_v18  ;;  %v414_v35 = vmul.f32 %v398_v20, %v4334_v28  ;;  %v401_v36 = vmul.f32 0.5, %v385_v57 }
 0x118   :  { %v364_v37 = vmul.f32 0.7978846, %v348_v22  ;;  %v349_v38 = vadd.f32 %v333_v23, %v4422_v62  ;;  %v415_v39 = vmul.f32 %v399_v27, %v4344_v34  ;;  %v416_v40 = vmul.f32 %v400_v29, %v4331_v26 }
 0x119   :  { %v362_v41 = vmul.f32 0.7978846, %v346_v32  ;;  %v347_v42 = vadd.f32 %v331_v33, %v4428_v4  ;;  %v417_v44 = vmul.f32 %v401_v36, %v4339_v31  ;;  %v386_v43 = vadd.f32 1.0, %v3874_v16 }
 0x11a   :  { %3887 = vtanh.f32 %v364_v37  ;;  %v365_v45 = vmul.f32 0.7978846, %v349_v38  ;;  %v430_v47 = vpack.c.bf16 %v415_v39, %v414_v35  ;;  %v387_v50 = vadd.f32 1.0, %v3878_v30  ;;  %v3703_v38 = vld [vmem:[%s6283_s6] sm:$0xff]   ;;  %v3708_v39 = vld [vmem:[%s6283_s6 + $0x28] sm:$0xff]  }
 0x11b   :  { %3889 = vtanh.f32 %v362_v41  ;;  %v363_v28 = vmul.f32 0.7978846, %v347_v42  ;;  %v431_v51 = vpack.c.bf16 %v417_v44, %v416_v40  ;;  %v402_v52 = vmul.f32 0.5, %v386_v43  ;;  %3644 = vmatprep.subr.bf16.mxu0 %v3703_v38  ;;  %v3709_v40 = vld [vmem:[%s6283_s6 + $0x30] sm:$0xff]   ;;  %v3710_v41 = vld [vmem:[%s6283_s6 + $0x38] sm:$0xff]  }
 0x11c   :  { %v3880_v53 = vpop.eup %3879  ;;  %3891 = vtanh.f32 %v365_v45  ;;  %3628 = vmatprep.mubr.bf16.mxu1 %v430_v47  ;;  %v403_v34 = vmul.f32 0.5, %v387_v50  ;;  %v388_v56 = vadd.f32 1.0, %v3872_v12  ;;  %v389_v26 = vadd.f32 1.0, %v3876_v21  ;;  %3645 = vmatpush3.bf16.msra.mxu0 %v3703_v38  ;;  %v4485_v42 = vld [vmem:[%s6282_s5] ss:$0 sm:$0xff] }
 0x11d   :  { %v3882_v57 = vpop.eup %3881  ;;  %3893 = vtanh.f32 %v363_v28  ;;  %3629 = vmatmul.mubr.bf16.vlgmr.msra.gmra.mrb[0].mxu1 %v431_v51  ;;  %v418_v31 = vmul.f32 %v402_v52, %v4359_v49  ;;  %v392_v59 = vadd.f32 1.0, %v3880_v53 }
 0x11e   :  { %v3884_v60 = vpop.eup %3883  ;;  %v419_v61 = vmul.f32 %v403_v34, %v4371_v58  ;;  %v404_v63 = vmul.f32 0.5, %v388_v56  ;;  %v405_v0 = vmul.f32 0.5, %v389_v26  ;;  %v390_v1 = vadd.f32 1.0, %v3882_v57 }
 0x11f   :  { %v3886_v2 = vpop.eup %3885  ;;  %v393_v3 = vadd.f32 1.0, %v3884_v60  ;;  %v408_v5 = vmul.f32 0.5, %v392_v59 }
 0x120   :  { %v432_v6 = vpack.c.bf16 %v419_v61, %v418_v31  ;;  %v420_v7 = vmul.f32 %v404_v63, %v4356_v46  ;;  %v421_v8 = vmul.f32 %v405_v0, %v4366_v55  ;;  %v391_v9 = vadd.f32 1.0, %v3886_v2 }
 0x121   :  { %v406_v11 = vmul.f32 0.5, %v390_v1  ;;  %v409_v12 = vmul.f32 0.5, %v393_v3  ;;  %v424_v24 = vmul.f32 %v408_v5, %v4384_v10 }
 0x122   :  { %3632 = vmatprep.mubr.bf16.mxu1 %v432_v6  ;;  %v433_v49 = vpack.c.bf16 %v421_v8, %v420_v7  ;;  %v407_v13 = vmul.f32 0.5, %v391_v9 }
 0x123   :  { %v425_v58 = vmul.f32 %v409_v12, %v4394_v19  ;;  %v422_v16 = vmul.f32 %v406_v11, %v4388_v14 }
 0x124   :  { %v3888_v15 = vpop.eup %3887  ;;  %v423_v17 = vmul.f32 %v407_v13, %v4400_v25 }
 0x125   :  { %v3890_v18 = vpop.eup %3889  ;;  %3633 = vmatmul.mubr.bf16.gmra.mrb[4].mxu1 %v433_v49  ;;  %v435_v46 = vpack.c.bf16 %v425_v58, %v424_v24  ;;  %v396_v20 = vadd.f32 1.0, %v3888_v15 }
 0x126   :  { %v3892_v55 = vpop.eup %3891  ;;  %v434_v21 = vpack.c.bf16 %v423_v17, %v422_v16  ;;  %v394_v22 = vadd.f32 1.0, %v3890_v18 }
 0x127   :  { %v3894_v23 = vpop.eup %3893  ;;  %v397_v27 = vadd.f32 1.0, %v3892_v55  ;;  %v412_v29 = vmul.f32 0.5, %v396_v20 }
 0x128   :  { %3636 = vmatprep.mubr.bf16.mxu1 %v434_v21  ;;  %v395_v30 = vadd.f32 1.0, %v3894_v23  ;;  %v410_v10 = vmul.f32 0.5, %v394_v22 }
 0x129   :  { %v413_v32 = vmul.f32 0.5, %v397_v27  ;;  %v428_v33 = vmul.f32 %v412_v29, %v4412_v48  ;;  %v3704_v48 = vld [vmem:[%s6283_s6 + $0x8] sm:$0xff]  }
 0x12a   :  { %v411_v19 = vmul.f32 0.5, %v395_v30  ;;  %v426_v25 = vmul.f32 %v410_v10, %v4416_v54  ;;  %3646 = vmatprep.subr.bf16.mxu0 %v3704_v48  ;;  %v3705_v54 = vld [vmem:[%s6283_s6 + $0x10] sm:$0xff]  }
 0x12b   :  { %v429_v14 = vmul.f32 %v413_v32, %v4422_v62  ;;  %3647 = vmatpush3.bf16.msra.mxu0 %v3704_v48  ;;  %v3706_v62 = vld [vmem:[%s6283_s6 + $0x18] sm:$0xff]  }
 0x12c   :  { %v427_v35 = vmul.f32 %v411_v19, %v4428_v4  ;;  %3648 = vmatprep.subr.bf16.mxu0 %v3705_v54  ;;  %v3707_v4 = vld [vmem:[%s6283_s6 + $0x20] sm:$0xff]  }
 0x12d   :  { %3637 = vmatmul.mubr.bf16.gmra.mrb[8].mxu1 %v435_v46  ;;  %v437_v36 = vpack.c.bf16 %v429_v14, %v428_v33 }
 0x12e   :  { %v436_v37 = vpack.c.bf16 %v427_v35, %v426_v25 }
 0x12f   :  { %3649 = vmatpush3.bf16.msra.mxu0 %v3705_v54 }
 0x130   :  { %3640 = vmatprep.mubr.bf16.mxu1 %v436_v37  ;;  %3650 = vmatprep.subr.bf16.mxu0 %v3706_v62 }
 0x133   :  { %3651 = vmatpush3.bf16.msra.mxu0 %v3706_v62 }
 0x134   :  { %3652 = vmatprep.subr.bf16.mxu0 %v3707_v4 }
 0x135   :  { %3641 = vmatmul.mubr.bf16.gmra.mrb[12].mxu1 %v437_v36 }
 0x137   :  { %3653 = vmatpush3.bf16.msra.mxu0 %v3707_v4 }
 0x138   :  { %3654 = vmatprep.subr.bf16.mxu0 %v3708_v39 }
 0x13b   :  { %3655 = vmatpush3.bf16.msra.mxu0 %v3708_v39 }
 0x13c   :  { %3656 = vmatprep.subr.bf16.mxu0 %v3709_v40 }
 0x13f   :  { %3657 = vmatpush3.bf16.msra.mxu0 %v3709_v40 }
 0x140   :  { %3658 = vmatprep.subr.bf16.mxu0 %v3710_v41 }
 0x143   :  { %3659 = vmatpush3.bf16.msra.mxu0 %v3710_v41 }
 0x1f0   :  { %v3630_v44 = vpop.f32.mrb[0].mxu1 }
 0x1f1   :  { %v4488_v43 = vadd.f32 %v3630_v44, %v4485_v42  ;;  %v543_v45 = vpop.f32.mrb[1].mxu1 }
 0x1f2   :  { %v4491_v47 = vadd.f32 %v4485_v42, %v543_v45  ;;  %v3631_v50 = vpop.f32.mrb[2].mxu1 }
 0x1f3   :  { %v608_v28 = vmul.f32 %v4488_v43, %v4488_v43  ;;  %v4496_v51 = vadd.f32 %v3631_v50, %v4485_v42  ;;  %v546_v52 = vpop.f32.mrb[3].mxu1 }
 0x1f4   :  { %v606_v53 = vmul.f32 %v4491_v47, %v4491_v47  ;;  %v4501_v34 = vadd.f32 %v4485_v42, %v546_v52 }
 0x1f5   :  { %v624_v56 = vmul.f32 %v608_v28, %v4488_v43  ;;  %v609_v26 = vmul.f32 %v4496_v51, %v4496_v51 }
 0x1f6   :  { %v622_v57 = vmul.f32 %v606_v53, %v4491_v47  ;;  %v607_v31 = vmul.f32 %v4501_v34, %v4501_v34 }
 0x1f7   :  { %v640_v59 = vmul.f32 0.044715, %v624_v56  ;;  %v625_v60 = vmul.f32 %v609_v26, %v4496_v51 }
 0x1f8   :  { %v638_v61 = vmul.f32 0.044715, %v622_v57  ;;  %v623_v63 = vmul.f32 %v607_v31, %v4501_v34  ;;  %v3634_v0 = vpop.f32.mrb[4].mxu1 }
 0x1f9   :  { %v656_v1 = vadd.f32 %v640_v59, %v4488_v43  ;;  %v641_v2 = vmul.f32 0.044715, %v625_v60  ;;  %v4513_v3 = vadd.f32 %v3634_v0, %v4485_v42  ;;  %v559_v5 = vpop.f32.mrb[5].mxu1 }
 0x1fa   :  { %v654_v6 = vadd.f32 %v638_v61, %v4491_v47  ;;  %v639_v7 = vmul.f32 0.044715, %v623_v63  ;;  %v4517_v8 = vadd.f32 %v4485_v42, %v559_v5  ;;  %v3635_v9 = vpop.f32.mrb[6].mxu1 }
 0x1fb   :  { %v672_v11 = vmul.f32 0.7978846, %v656_v1  ;;  %v657_v12 = vadd.f32 %v641_v2, %v4496_v51  ;;  %v612_v49 = vmul.f32 %v4513_v3, %v4513_v3  ;;  %v4523_v13 = vadd.f32 %v3635_v9, %v4485_v42  ;;  %v562_v24 = vpop.f32.mrb[7].mxu1 }
 0x1fc   :  { %v670_v58 = vmul.f32 0.7978846, %v654_v6  ;;  %v655_v15 = vadd.f32 %v639_v7, %v4501_v34  ;;  %v610_v16 = vmul.f32 %v4517_v8, %v4517_v8  ;;  %v4529_v17 = vadd.f32 %v4485_v42, %v562_v24 }
 0x1fd   :  { %3895 = vtanh.f32 %v672_v11  ;;  %v673_v18 = vmul.f32 0.7978846, %v657_v12  ;;  %v628_v46 = vmul.f32 %v612_v49, %v4513_v3  ;;  %v613_v20 = vmul.f32 %v4523_v13, %v4523_v13 }
 0x1fe   :  { %3897 = vtanh.f32 %v670_v58  ;;  %v671_v55 = vmul.f32 0.7978846, %v655_v15  ;;  %v626_v21 = vmul.f32 %v610_v16, %v4517_v8  ;;  %v611_v22 = vmul.f32 %v4529_v17, %v4529_v17 }
 0x1ff   :  { %3899 = vtanh.f32 %v673_v18  ;;  %v644_v23 = vmul.f32 0.044715, %v628_v46  ;;  %v629_v27 = vmul.f32 %v613_v20, %v4523_v13 }
 0x200   :  { %v642_v29 = vmul.f32 0.044715, %v626_v21  ;;  %v627_v30 = vmul.f32 %v611_v22, %v4529_v17  ;;  %v3638_v10 = vpop.f32.mrb[8].mxu1  ;;  %3901 = vtanh.f32 %v671_v55 }
 0x201   :  { %v660_v32 = vadd.f32 %v644_v23, %v4513_v3  ;;  %v645_v19 = vmul.f32 0.044715, %v629_v27  ;;  %v4541_v33 = vadd.f32 %v3638_v10, %v4485_v42  ;;  %v575_v14 = vpop.f32.mrb[9].mxu1 }
 0x202   :  { %v658_v25 = vadd.f32 %v642_v29, %v4517_v8  ;;  %v643_v35 = vmul.f32 0.044715, %v627_v30  ;;  %v4545_v36 = vadd.f32 %v4485_v42, %v575_v14  ;;  %v3639_v37 = vpop.f32.mrb[10].mxu1 }
 0x203   :  { %v676_v38 = vmul.f32 0.7978846, %v660_v32  ;;  %v661_v48 = vadd.f32 %v645_v19, %v4523_v13  ;;  %v616_v54 = vmul.f32 %v4541_v33, %v4541_v33  ;;  %v4551_v62 = vadd.f32 %v3639_v37, %v4485_v42  ;;  %v578_v4 = vpop.f32.mrb[11].mxu1 }
 0x204   :  { %v674_v39 = vmul.f32 0.7978846, %v658_v25  ;;  %v659_v40 = vadd.f32 %v643_v35, %v4529_v17  ;;  %v614_v41 = vmul.f32 %v4545_v36, %v4545_v36  ;;  %v4557_v44 = vadd.f32 %v4485_v42, %v578_v4 }
 0x205   :  { %3903 = vtanh.f32 %v676_v38  ;;  %v677_v45 = vmul.f32 0.7978846, %v661_v48  ;;  %v632_v50 = vmul.f32 %v616_v54, %v4541_v33  ;;  %v617_v28 = vmul.f32 %v4551_v62, %v4551_v62 }
 0x206   :  { %3905 = vtanh.f32 %v674_v39  ;;  %v675_v52 = vmul.f32 0.7978846, %v659_v40  ;;  %v630_v53 = vmul.f32 %v614_v41, %v4545_v36  ;;  %v615_v56 = vmul.f32 %v4557_v44, %v4557_v44 }
 0x207   :  { %v3896_v26 = vpop.eup %3895  ;;  %3907 = vtanh.f32 %v677_v45  ;;  %v648_v57 = vmul.f32 0.044715, %v632_v50  ;;  %v633_v31 = vmul.f32 %v617_v28, %v4551_v62 }
 0x208   :  { %v3898_v59 = vpop.eup %3897  ;;  %v704_v60 = vadd.f32 1.0, %v3896_v26  ;;  %3909 = vtanh.f32 %v675_v52  ;;  %v646_v61 = vmul.f32 0.044715, %v630_v53  ;;  %v631_v63 = vmul.f32 %v615_v56, %v4557_v44  ;;  %v3642_v0 = vpop.f32.mrb[12].mxu1 }
 0x209   :  { %v3900_v1 = vpop.eup %3899  ;;  %v664_v2 = vadd.f32 %v648_v57, %v4541_v33  ;;  %v649_v5 = vmul.f32 0.044715, %v633_v31  ;;  %v4569_v6 = vadd.f32 %v3642_v0, %v4485_v42  ;;  %v591_v7 = vpop.f32.mrb[13].mxu1  ;;  %v702_v9 = vadd.f32 1.0, %v3898_v59 }
 0x20a   :  { %v720_v11 = vmul.f32 0.5, %v704_v60  ;;  %v705_v12 = vadd.f32 1.0, %v3900_v1  ;;  %v662_v49 = vadd.f32 %v646_v61, %v4545_v36  ;;  %v647_v24 = vmul.f32 0.044715, %v631_v63  ;;  %v3643_v58 = vpop.f32.mrb[14].mxu1  ;;  %v3902_v55 = vpop.eup %3901 }
 0x20b   :  { %v680_v15 = vmul.f32 0.7978846, %v664_v2  ;;  %v665_v16 = vadd.f32 %v649_v5, %v4551_v62  ;;  %v620_v18 = vmul.f32 %v4569_v6, %v4569_v6  ;;  %v4576_v46 = vadd.f32 %v4485_v42, %v591_v7  ;;  %v594_v20 = vpop.f32.mrb[15].mxu1 }
 0x20c   :  { %v736_v21 = vmul.f32 %v720_v11, %v4488_v43  ;;  %v721_v22 = vmul.f32 0.5, %v705_v12  ;;  %v678_v23 = vmul.f32 0.7978846, %v662_v49  ;;  %v663_v27 = vadd.f32 %v647_v24, %v4557_v44 }
 0x20d   :  { %3911 = vtanh.f32 %v680_v15  ;;  %v681_v29 = vmul.f32 0.7978846, %v665_v16  ;;  %v636_v30 = vmul.f32 %v620_v18, %v4569_v6  ;;  %v618_v10 = vmul.f32 %v4576_v46, %v4576_v46 }
 0x20e   :  { %v737_v32 = vmul.f32 %v721_v22, %v4496_v51  ;;  %3913 = vtanh.f32 %v678_v23  ;;  %v679_v19 = vmul.f32 0.7978846, %v663_v27  ;;  %v4585_v14 = vadd.f32 %v3643_v58, %v4485_v42 }
 0x20f   :  { %v3904_v25 = vpop.eup %3903  ;;  %3915 = vtanh.f32 %v681_v29  ;;  %v652_v43 = vmul.f32 0.044715, %v636_v30  ;;  %v634_v35 = vmul.f32 %v618_v10, %v4576_v46  ;;  %v4589_v37 = vadd.f32 %v4485_v42, %v594_v20 }
 0x210   :  { %v3906_v38 = vpop.eup %3905  ;;  %v751_v48 = vpack.c.bf16 %v737_v32, %v736_v21  ;;  %3917 = vtanh.f32 %v679_v19  ;;  %v621_v54 = vmul.f32 %v4585_v14, %v4585_v14  ;;  %v703_v51 = vadd.f32 1.0, %v3902_v55 }
 0x211   :  { %v3908_v4 = vpop.eup %3907  ;;  %v668_v39 = vadd.f32 %v652_v43, %v4569_v6  ;;  %v650_v40 = vmul.f32 0.044715, %v634_v35  ;;  %v619_v41 = vmul.f32 %v4589_v37, %v4589_v37  ;;  %v718_v45 = vmul.f32 0.5, %v702_v9 }
 0x212   :  { %v3910_v50 = vpop.eup %3909  ;;  %v637_v28 = vmul.f32 %v621_v54, %v4585_v14  ;;  %v719_v42 = vmul.f32 0.5, %v703_v51  ;;  %v706_v52 = vadd.f32 1.0, %v3906_v38  ;;  %v708_v53 = vadd.f32 1.0, %v3904_v25 }
 0x213   :  { %v684_v56 = vmul.f32 0.7978846, %v668_v39  ;;  %v666_v26 = vadd.f32 %v650_v40, %v4576_v46  ;;  %v635_v57 = vmul.f32 %v619_v41, %v4589_v37  ;;  %v734_v31 = vmul.f32 %v718_v45, %v4491_v47 }
 0x214   :  { %v653_v59 = vmul.f32 0.044715, %v637_v28  ;;  %v735_v60 = vmul.f32 %v719_v42, %v4501_v34  ;;  %v707_v61 = vadd.f32 1.0, %v3910_v50  ;;  %v722_v63 = vmul.f32 0.5, %v706_v52 }
 0x215   :  { %3919 = vtanh.f32 %v684_v56  ;;  %v682_v0 = vmul.f32 0.7978846, %v666_v26  ;;  %v651_v1 = vmul.f32 0.044715, %v635_v57  ;;  %v709_v2 = vadd.f32 1.0, %v3908_v4 }
 0x216   :  { %v669_v5 = vadd.f32 %v653_v59, %v4585_v14  ;;  %v750_v7 = vpack.c.bf16 %v735_v60, %v734_v31  ;;  %v723_v9 = vmul.f32 0.5, %v707_v61  ;;  %v724_v49 = vmul.f32 0.5, %v708_v53  ;;  %v3713_v26 = vld [vmem:[%s6285_s8 + $0x4] ss:$8 sps:$4 sm:$0xff]   ;;  %v3711_v57 = vld [vmem:[%s6285_s8] ss:$8 sps:$4 sm:$0xff]  }
 0x217   :  { %v3912_v11 = vpop.eup %3911  ;;  %3921 = vtanh.f32 %v682_v0  ;;  %v667_v12 = vadd.f32 %v651_v1, %v4589_v37  ;;  %v725_v24 = vmul.f32 0.5, %v709_v2  ;;  %v738_v34 = vmul.f32 %v722_v63, %v4517_v8  ;;  %1186 = vmatprep.subr.bf16.mxu1 %v3713_v26  ;;  %v3722_v31 = vld [vmem:[%s6285_s8 + $0x34] ss:$8 sps:$4 sm:$0xff]   ;;  %v3720_v59 = vld [vmem:[%s6285_s8 + $0x30] ss:$8 sps:$4 sm:$0xff]  }
 0x218   :  { %v3914_v47 = vpop.eup %3913  ;;  %v685_v58 = vmul.f32 0.7978846, %v669_v5  ;;  %3660 = vmatprep.mubr.bf16.mxu0 %v750_v7  ;;  %v739_v15 = vmul.f32 %v723_v9, %v4529_v17  ;;  %v712_v16 = vadd.f32 1.0, %v3912_v11  ;;  %v740_v55 = vmul.f32 %v724_v49, %v4513_v3  ;;  %1187 = vmatpush1.bf16.msra.mxu1 %v3711_v57  ;;  %v3725_v60 = vld [vmem:[%s6285_s8 + $0x44] ss:$8 sps:$4 sm:$0xff]  }
 0x219   :  { %v3916_v18 = vpop.eup %3915  ;;  %v683_v20 = vmul.f32 0.7978846, %v667_v12  ;;  %3661 = vmatmul.mubr.bf16.vlgmr.msra.gmra.mrb[16].mxu0 %v751_v48  ;;  %v741_v21 = vmul.f32 %v725_v24, %v4523_v13  ;;  %v710_v22 = vadd.f32 1.0, %v3914_v47  ;;  %v3723_v61 = vld [vmem:[%s6285_s8 + $0x40] ss:$8 sps:$4 sm:$0xff]   ;;  %v4175_v9 = vmov 0  }
 0x21a   :  { %v3918_v23 = vpop.eup %3917  ;;  %3923 = vtanh.f32 %v685_v58  ;;  %v752_v27 = vpack.c.bf16 %v739_v15, %v738_v34  ;;  %v713_v29 = vadd.f32 1.0, %v3916_v18  ;;  %v728_v30 = vmul.f32 0.5, %v712_v16  ;;  %v3728_v63 = vld [vmem:[%s6285_s8 + $0x54] ss:$8 sps:$4 sm:$0xff]   ;;  %v3726_v0 = vld [vmem:[%s6285_s8 + $0x50] ss:$8 sps:$4 sm:$0xff]   ;;  %1218 = vmatprep.mubr.bf16.mxu1 %v4175_v9 }
 0x21b   :  { %3925 = vtanh.f32 %v683_v20  ;;  %v753_v10 = vpack.c.bf16 %v741_v21, %v740_v55  ;;  %v711_v32 = vadd.f32 1.0, %v3918_v23  ;;  %v726_v8 = vmul.f32 0.5, %v710_v22  ;;  %v3731_v1 = vld [vmem:[%s6285_s8 + $0x64] ss:$8 sps:$4 sm:$0xff]   ;;  %v3729_v2 = vld [vmem:[%s6285_s8 + $0x60] ss:$8 sps:$4 sm:$0xff]  }
 0x21c   :  { %3664 = vmatprep.mubr.bf16.mxu0 %v752_v27  ;;  %v729_v17 = vmul.f32 0.5, %v713_v29  ;;  %v744_v25 = vmul.f32 %v728_v30, %v4541_v33  ;;  %v3734_v5 = vld [vmem:[%s6285_s8 + $0x74] ss:$8 sps:$4 sm:$0xff]   ;;  %v3732_v7 = vld [vmem:[%s6285_s8 + $0x70] ss:$8 sps:$4 sm:$0xff]  }
 0x21d   :  { %v727_v19 = vmul.f32 0.5, %v711_v32  ;;  %v742_v13 = vmul.f32 %v726_v8, %v4545_v36  ;;  %v3735_v11 = vld [vmem:[%s6287_s10] ss:$16 sps:$4 sm:$0xff]   ;;  %v3737_v12 = vld [vmem:[%s6287_s10 + $0x4] ss:$16 sps:$4 sm:$0xff]  }
 0x21e   :  { %v745_v43 = vmul.f32 %v729_v17, %v4551_v62  ;;  %v3740_v49 = vld [vmem:[%s6287_s10 + $0xc] ss:$16 sps:$4 sm:$0xff]   ;;  %v3743_v24 = vld [vmem:[%s6287_s10 + $0x24] ss:$16 sps:$4 sm:$0xff]   ;;  %2009 = vmatprep.subr.bf16.mxu0 %v3737_v12  ;;  %v3741_v47 = vld [vmem:[%s6287_s10 + $0x20] ss:$16 sps:$4 sm:$0xff]  }
 0x21f   :  { %v3920_v3 = vpop.eup %3919  ;;  %v743_v35 = vmul.f32 %v727_v19, %v4557_v44  ;;  %2010 = vmatpush1.bf16.msra.mxu0 %v3735_v11  ;;  %v3749_v58 = vld [vmem:[%s6287_s10 + $0x44] ss:$16 sps:$4 sm:$0xff]   ;;  %v3747_v34 = vld [vmem:[%s6287_s10 + $0x40] ss:$16 sps:$4 sm:$0xff]  }
 0x220   :  { %v755_v38 = vpack.c.bf16 %v745_v43, %v744_v25  ;;  %v716_v51 = vadd.f32 1.0, %v3920_v3  ;;  %2011 = vmatprep.subr.bf16.mxu0 %v3743_v24  ;;  %v3755_v15 = vld [vmem:[%s6287_s10 + $0x64] ss:$16 sps:$4 sm:$0xff]   ;;  %v3753_v16 = vld [vmem:[%s6287_s10 + $0x60] ss:$16 sps:$4 sm:$0xff]  }
 0x221   :  { %v3922_v48 = vpop.eup %3921  ;;  %3665 = vmatmul.mubr.bf16.gmra.mrb[20].mxu0 %v753_v10  ;;  %v754_v54 = vpack.c.bf16 %v743_v35, %v742_v13  ;;  %v3761_v18 = vld [vmem:[%s6287_s10 + $0x84] ss:$16 sps:$4 sm:$0xff]   ;;  %v3759_v20 = vld [vmem:[%s6287_s10 + $0x80] ss:$16 sps:$4 sm:$0xff]  }
 0x222   :  { %v714_v4 = vadd.f32 1.0, %v3922_v48  ;;  %v732_v45 = vmul.f32 0.5, %v716_v51  ;;  %v3767_v55 = vld [vmem:[%s6287_s10 + $0xa4] ss:$16 sps:$4 sm:$0xff]   ;;  %v3765_v21 = vld [vmem:[%s6287_s10 + $0xa0] ss:$16 sps:$4 sm:$0xff]  }
 0x223   :  { %3668 = vmatprep.mubr.bf16.mxu0 %v754_v54  ;;  %2012 = vmatpush1.bf16.msra.mxu0 %v3741_v47  ;;  %v3773_v22 = vld [vmem:[%s6287_s10 + $0xc4] ss:$16 sps:$4 sm:$0xff]   ;;  %v3771_v23 = vld [vmem:[%s6287_s10 + $0xc0] ss:$16 sps:$4 sm:$0xff]  }
 0x224   :  { %v3924_v39 = vpop.eup %3923  ;;  %v730_v33 = vmul.f32 0.5, %v714_v4  ;;  %v748_v36 = vmul.f32 %v732_v45, %v4569_v6  ;;  %v3716_v6 = vld [vmem:[%s6285_s8 + $0x14] ss:$8 sps:$4 sm:$0xff]   ;;  %2013 = vmatprep.subr.bf16.mxu0 %v3749_v58  ;;  %v4712_v27 = vld [vmem:[%s6284_s7] ss:$0 sm:$0xff] }
 0x225   :  { %v3926_v40 = vpop.eup %3925  ;;  %v717_v41 = vadd.f32 1.0, %v3924_v39  ;;  %1188 = vmatprep.subr.bf16.mxu1 %v3716_v6 }
 0x226   :  { %v715_v50 = vadd.f32 1.0, %v3926_v40  ;;  %v746_v42 = vmul.f32 %v730_v33, %v4576_v46  ;;  %v3714_v46 = vld [vmem:[%s6285_s8 + $0x10] ss:$8 sps:$4 sm:$0xff]  }
 0x227   :  { %v733_v28 = vmul.f32 0.5, %v717_v41  ;;  %1189 = vmatpush1.bf16.msra.mxu1 %v3714_v46  ;;  %2014 = vmatpush1.bf16.msra.mxu0 %v3747_v34 }
 0x228   :  { %v731_v62 = vmul.f32 0.5, %v715_v50  ;;  %2015 = vmatprep.subr.bf16.mxu0 %v3755_v15 }
 0x229   :  { %3669 = vmatmul.mubr.bf16.gmra.mrb[24].mxu0 %v755_v38  ;;  %v749_v44 = vmul.f32 %v733_v28, %v4585_v14  ;;  %v3719_v14 = vld [vmem:[%s6285_s8 + $0x24] ss:$8 sps:$4 sm:$0xff]  }
 0x22a   :  { %v747_v52 = vmul.f32 %v731_v62, %v4589_v37  ;;  %v3717_v37 = vld [vmem:[%s6285_s8 + $0x20] ss:$8 sps:$4 sm:$0xff]   ;;  %1190 = vmatprep.subr.bf16.mxu1 %v3719_v14 }
 0x22b   :  { %v757_v53 = vpack.c.bf16 %v749_v44, %v748_v36  ;;  %1191 = vmatpush1.bf16.msra.mxu1 %v3717_v37  ;;  %2016 = vmatpush1.bf16.msra.mxu0 %v3753_v16 }
 0x22c   :  { %v756_v56 = vpack.c.bf16 %v747_v52, %v746_v42  ;;  %1192 = vmatprep.subr.bf16.mxu1 %v3722_v31  ;;  %2017 = vmatprep.subr.bf16.mxu0 %v3761_v18 }
 0x22e   :  { %3672 = vmatprep.mubr.bf16.mxu0 %v756_v56 }
 0x22f   :  { %1193 = vmatpush1.bf16.msra.mxu1 %v3720_v59  ;;  %2018 = vmatpush1.bf16.msra.mxu0 %v3759_v20 }
 0x230   :  { %1194 = vmatprep.subr.bf16.mxu1 %v3725_v60  ;;  %2019 = vmatprep.subr.bf16.mxu0 %v3767_v55 }
 0x231   :  { %3673 = vmatmul.mubr.bf16.gmra.mrb[28].mxu0 %v757_v53 }
 0x233   :  { %1195 = vmatpush1.bf16.msra.mxu1 %v3723_v61  ;;  %2020 = vmatpush1.bf16.msra.mxu0 %v3765_v21 }
 0x234   :  { %1196 = vmatprep.subr.bf16.mxu1 %v3728_v63  ;;  %2021 = vmatprep.subr.bf16.mxu0 %v3773_v22 }
 0x237   :  { %1197 = vmatpush1.bf16.msra.mxu1 %v3726_v0  ;;  %2022 = vmatpush1.bf16.msra.mxu0 %v3771_v23 }
 0x238   :  { %1198 = vmatprep.subr.bf16.mxu1 %v3731_v1 }
 0x23b   :  { %1199 = vmatpush1.bf16.msra.mxu1 %v3729_v2 }
 0x23c   :  { %1200 = vmatprep.subr.bf16.mxu1 %v3734_v5 }
 0x23f   :  { %1201 = vmatpush1.bf16.msra.mxu1 %v3732_v7 }
 0x240   :  { %2122 = vmatprep.subr.bf16.mxu1 %v3740_v49 }
 0x2ec   :  { %v3662_v29 = vpop.f32.mrb[16].mxu0 }
 0x2ed   :  { %v4715_v30 = vadd.f32 %v3662_v29, %v4712_v27  ;;  %v863_v10 = vpop.f32.mrb[17].mxu0 }
 0x2ee   :  { %v4718_v32 = vadd.f32 %v4712_v27, %v863_v10  ;;  %v3663_v8 = vpop.f32.mrb[18].mxu0 }
 0x2ef   :  { %v928_v17 = vmul.f32 %v4715_v30, %v4715_v30  ;;  %v4723_v19 = vadd.f32 %v3663_v8, %v4712_v27  ;;  %v866_v25 = vpop.f32.mrb[19].mxu0 }
 0x2f0   :  { %v926_v43 = vmul.f32 %v4718_v32, %v4718_v32  ;;  %v4728_v3 = vadd.f32 %v4712_v27, %v866_v25 }
 0x2f1   :  { %v944_v13 = vmul.f32 %v928_v17, %v4715_v30  ;;  %v929_v35 = vmul.f32 %v4723_v19, %v4723_v19 }
 0x2f2   :  { %v942_v38 = vmul.f32 %v926_v43, %v4718_v32  ;;  %v927_v48 = vmul.f32 %v4728_v3, %v4728_v3 }
 0x2f3   :  { %v960_v54 = vmul.f32 0.044715, %v944_v13  ;;  %v945_v51 = vmul.f32 %v929_v35, %v4723_v19 }
 0x2f4   :  { %v958_v4 = vmul.f32 0.044715, %v942_v38  ;;  %v943_v39 = vmul.f32 %v927_v48, %v4728_v3  ;;  %v3666_v40 = vpop.f32.mrb[20].mxu0 }
 0x2f5   :  { %v976_v41 = vadd.f32 %v960_v54, %v4715_v30  ;;  %v961_v45 = vmul.f32 0.044715, %v945_v51  ;;  %v4740_v50 = vadd.f32 %v3666_v40, %v4712_v27  ;;  %v879_v33 = vpop.f32.mrb[21].mxu0 }
 0x2f6   :  { %v974_v28 = vadd.f32 %v958_v4, %v4718_v32  ;;  %v959_v62 = vmul.f32 0.044715, %v943_v39  ;;  %v4744_v36 = vadd.f32 %v4712_v27, %v879_v33  ;;  %v3667_v44 = vpop.f32.mrb[22].mxu0 }
 0x2f7   :  { %v992_v42 = vmul.f32 0.7978846, %v976_v41  ;;  %v977_v52 = vadd.f32 %v961_v45, %v4723_v19  ;;  %v932_v53 = vmul.f32 %v4740_v50, %v4740_v50  ;;  %v4750_v56 = vadd.f32 %v3667_v44, %v4712_v27  ;;  %v882_v26 = vpop.f32.mrb[23].mxu0 }
 0x2f8   :  { %v990_v57 = vmul.f32 0.7978846, %v974_v28  ;;  %v975_v6 = vadd.f32 %v959_v62, %v4728_v3  ;;  %v930_v46 = vmul.f32 %v4744_v36, %v4744_v36  ;;  %v4756_v14 = vadd.f32 %v4712_v27, %v882_v26 }
 0x2f9   :  { %3927 = vtanh.f32 %v992_v42  ;;  %v993_v37 = vmul.f32 0.7978846, %v977_v52  ;;  %v948_v31 = vmul.f32 %v932_v53, %v4740_v50  ;;  %v933_v59 = vmul.f32 %v4750_v56, %v4750_v56 }
 0x2fa   :  { %3929 = vtanh.f32 %v990_v57  ;;  %v991_v60 = vmul.f32 0.7978846, %v975_v6  ;;  %v946_v61 = vmul.f32 %v930_v46, %v4744_v36  ;;  %v931_v63 = vmul.f32 %v4756_v14, %v4756_v14 }
 0x2fb   :  { %3931 = vtanh.f32 %v993_v37  ;;  %v964_v0 = vmul.f32 0.044715, %v948_v31  ;;  %v949_v1 = vmul.f32 %v933_v59, %v4750_v56 }
 0x2fc   :  { %3933 = vtanh.f32 %v991_v60  ;;  %v962_v2 = vmul.f32 0.044715, %v946_v61  ;;  %v947_v5 = vmul.f32 %v931_v63, %v4756_v14  ;;  %v3670_v7 = vpop.f32.mrb[24].mxu0 }
 0x2fd   :  { %v980_v11 = vadd.f32 %v964_v0, %v4740_v50  ;;  %v965_v12 = vmul.f32 0.044715, %v949_v1  ;;  %v4768_v49 = vadd.f32 %v3670_v7, %v4712_v27  ;;  %v895_v24 = vpop.f32.mrb[25].mxu0 }
 0x2fe   :  { %v978_v47 = vadd.f32 %v962_v2, %v4744_v36  ;;  %v963_v58 = vmul.f32 0.044715, %v947_v5  ;;  %v4772_v34 = vadd.f32 %v4712_v27, %v895_v24  ;;  %v3671_v15 = vpop.f32.mrb[26].mxu0 }
 0x2ff   :  { %v996_v16 = vmul.f32 0.7978846, %v980_v11  ;;  %v981_v18 = vadd.f32 %v965_v12, %v4750_v56  ;;  %v936_v20 = vmul.f32 %v4768_v49, %v4768_v49  ;;  %v4778_v55 = vadd.f32 %v3671_v15, %v4712_v27  ;;  %v898_v21 = vpop.f32.mrb[27].mxu0 }
 0x300   :  { %v994_v22 = vmul.f32 0.7978846, %v978_v47  ;;  %v979_v23 = vadd.f32 %v963_v58, %v4756_v14  ;;  %v934_v29 = vmul.f32 %v4772_v34, %v4772_v34  ;;  %v4784_v10 = vadd.f32 %v4712_v27, %v898_v21 }
 0x301   :  { %3935 = vtanh.f32 %v996_v16  ;;  %v997_v8 = vmul.f32 0.7978846, %v981_v18  ;;  %v952_v17 = vmul.f32 %v936_v20, %v4768_v49  ;;  %v937_v25 = vmul.f32 %v4778_v55, %v4778_v55 }
 0x302   :  { %3937 = vtanh.f32 %v994_v22  ;;  %v995_v43 = vmul.f32 0.7978846, %v979_v23  ;;  %v950_v13 = vmul.f32 %v934_v29, %v4772_v34  ;;  %v935_v35 = vmul.f32 %v4784_v10, %v4784_v10 }
 0x303   :  { %v3928_v38 = vpop.eup %3927  ;;  %3939 = vtanh.f32 %v997_v8  ;;  %v968_v48 = vmul.f32 0.044715, %v952_v17  ;;  %v953_v54 = vmul.f32 %v937_v25, %v4778_v55 }
 0x304   :  { %v3930_v51 = vpop.eup %3929  ;;  %3941 = vtanh.f32 %v995_v43  ;;  %v966_v4 = vmul.f32 0.044715, %v950_v13  ;;  %v951_v39 = vmul.f32 %v935_v35, %v4784_v10  ;;  %v3674_v40 = vpop.f32.mrb[28].mxu0  ;;  %v1024_v41 = vadd.f32 1.0, %v3928_v38 }
 0x305   :  { %v3932_v45 = vpop.eup %3931  ;;  %v1022_v33 = vadd.f32 1.0, %v3930_v51  ;;  %v984_v28 = vadd.f32 %v968_v48, %v4768_v49  ;;  %v969_v62 = vmul.f32 0.044715, %v953_v54  ;;  %v4796_v44 = vadd.f32 %v3674_v40, %v4712_v27  ;;  %v911_v42 = vpop.f32.mrb[29].mxu0  ;;  %v3744_v40 = vld [vmem:[%s6287_s10 + $0x28] ss:$16 sps:$4 sm:$0xff]  }
 0x306   :  { %v3934_v52 = vpop.eup %3933  ;;  %v982_v53 = vadd.f32 %v966_v4, %v4772_v34  ;;  %v967_v26 = vmul.f32 0.044715, %v951_v39  ;;  %v4800_v57 = vadd.f32 %v4712_v27, %v911_v42  ;;  %v3675_v6 = vpop.f32.mrb[30].mxu0  ;;  %v1025_v46 = vadd.f32 1.0, %v3932_v45 }
 0x307   :  { %v1038_v37 = vmul.f32 0.5, %v1022_v33  ;;  %v1023_v31 = vadd.f32 1.0, %v3934_v52  ;;  %v1000_v59 = vmul.f32 0.7978846, %v984_v28  ;;  %v985_v60 = vadd.f32 %v969_v62, %v4778_v55  ;;  %v914_v61 = vpop.f32.mrb[31].mxu0 }
 0x308   :  { %v998_v63 = vmul.f32 0.7978846, %v982_v53  ;;  %v983_v0 = vadd.f32 %v967_v26, %v4784_v10  ;;  %v940_v1 = vmul.f32 %v4796_v44, %v4796_v44  ;;  %v938_v2 = vmul.f32 %v4800_v57, %v4800_v57 }
 0x309   :  { %v1054_v5 = vmul.f32 %v1038_v37, %v4718_v32  ;;  %v1039_v7 = vmul.f32 0.5, %v1023_v31  ;;  %3943 = vtanh.f32 %v1000_v59  ;;  %v1001_v11 = vmul.f32 0.7978846, %v985_v60  ;;  %v3738_v32 = vld [vmem:[%s6287_s10 + $0x8] ss:$16 sps:$4 sm:$0xff]  }
 0x30a   :  { %3945 = vtanh.f32 %v998_v63  ;;  %v999_v12 = vmul.f32 0.7978846, %v983_v0  ;;  %v956_v24 = vmul.f32 %v940_v1, %v4796_v44  ;;  %v954_v47 = vmul.f32 %v938_v2, %v4800_v57  ;;  %v3750_v0 = vld [vmem:[%s6287_s10 + $0x48] ss:$16 sps:$4 sm:$0xff]  }
 0x30b   :  { %v3936_v58 = vpop.eup %3935  ;;  %v1055_v15 = vmul.f32 %v1039_v7, %v4728_v3  ;;  %3947 = vtanh.f32 %v1001_v11  ;;  %v4813_v16 = vadd.f32 %v3675_v6, %v4712_v27  ;;  %v4816_v18 = vadd.f32 %v4712_v27, %v914_v61  ;;  %v3746_v27 = vld [vmem:[%s6287_s10 + $0x2c] ss:$16 sps:$4 sm:$0xff]  }
 0x30c   :  { %v3938_v20 = vpop.eup %3937  ;;  %3949 = vtanh.f32 %v999_v12  ;;  %v972_v21 = vmul.f32 0.044715, %v956_v24  ;;  %v970_v22 = vmul.f32 0.044715, %v954_v47  ;;  %v1040_v23 = vmul.f32 0.5, %v1024_v41 }
 0x30d   :  { %v3940_v29 = vpop.eup %3939  ;;  %v1070_v8 = vpack.c.bf16 %v1055_v15, %v1054_v5  ;;  %v941_v3 = vmul.f32 %v4813_v16, %v4813_v16  ;;  %v939_v17 = vmul.f32 %v4816_v18, %v4816_v18  ;;  %v1041_v25 = vmul.f32 0.5, %v1025_v46  ;;  %v3752_v41 = vld [vmem:[%s6287_s10 + $0x4c] ss:$16 sps:$4 sm:$0xff]  }
 0x30e   :  { %v3942_v43 = vpop.eup %3941  ;;  %v988_v13 = vadd.f32 %v972_v21, %v4796_v44  ;;  %v986_v35 = vadd.f32 %v970_v22, %v4800_v57  ;;  %v1056_v38 = vmul.f32 %v1040_v23, %v4715_v30  ;;  %v1026_v48 = vadd.f32 1.0, %v3938_v20  ;;  %v3756_v22 = vld [vmem:[%s6287_s10 + $0x68] ss:$16 sps:$4 sm:$0xff]  }
 0x30f   :  { %v957_v54 = vmul.f32 %v941_v3, %v4813_v16  ;;  %v955_v51 = vmul.f32 %v939_v17, %v4816_v18  ;;  %1219 = vmatmul.mubr.bf16.vlgmr.msra.gmra.mrb[16].mxu1 %v1070_v8  ;;  %v1057_v4 = vmul.f32 %v1041_v25, %v4723_v19  ;;  %v1027_v39 = vadd.f32 1.0, %v3942_v43 }
 0x310   :  { %v1004_v45 = vmul.f32 0.7978846, %v988_v13  ;;  %v1002_v33 = vmul.f32 0.7978846, %v986_v35  ;;  %1228 = vmatprep.mubr.bf16.mxu1 %v4175_v9  ;;  %v1042_v30 = vmul.f32 0.5, %v1026_v48  ;;  %v1028_v28 = vadd.f32 1.0, %v3936_v58  ;;  %2123 = vmatpush1.bf16.msra.mxu1 %v3738_v32 }
 0x311   :  { %v973_v62 = vmul.f32 0.044715, %v957_v54  ;;  %v971_v42 = vmul.f32 0.044715, %v955_v51  ;;  %v1071_v52 = vpack.c.bf16 %v1057_v4, %v1056_v38  ;;  %v1043_v19 = vmul.f32 0.5, %v1027_v39  ;;  %2124 = vmatprep.subr.bf16.mxu1 %v3746_v27 }
 0x312   :  { %3951 = vtanh.f32 %v1004_v45  ;;  %v1058_v53 = vmul.f32 %v1042_v30, %v4744_v36  ;;  %v1029_v26 = vadd.f32 1.0, %v3940_v29  ;;  %v1044_v6 = vmul.f32 0.5, %v1028_v28  ;;  %v3758_v36 = vld [vmem:[%s6287_s10 + $0x6c] ss:$16 sps:$4 sm:$0xff]   ;;  %v3762_v27 = vld [vmem:[%s6287_s10 + $0x88] ss:$16 sps:$4 sm:$0xff]  }
 0x313   :  { %v3944_v46 = vpop.eup %3943  ;;  %3953 = vtanh.f32 %v1002_v33  ;;  %v989_v37 = vadd.f32 %v973_v62, %v4813_v16  ;;  %v987_v31 = vadd.f32 %v971_v42, %v4816_v18  ;;  %v1059_v59 = vmul.f32 %v1043_v19, %v4756_v14  ;;  %v3776_v38 = vld [vmem:[%s6287_s10 + $0xcc] ss:$16 sps:$4 sm:$0xff]   ;;  %v3785_v19 = vld [vmem:[%s6287_s10 + $0x104] ss:$16 sps:$4 sm:$0xff]  }
 0x314   :  { %v3946_v60 = vpop.eup %3945  ;;  %v1045_v61 = vmul.f32 0.5, %v1029_v26  ;;  %v1032_v63 = vadd.f32 1.0, %v3944_v46  ;;  %2125 = vmatpush1.bf16.msra.mxu1 %v3744_v40  ;;  %v1060_v14 = vmul.f32 %v1044_v6, %v4740_v50  ;;  %v3764_v50 = vld [vmem:[%s6287_s10 + $0x8c] ss:$16 sps:$4 sm:$0xff]   ;;  %v3783_v26 = vld [vmem:[%s6287_s10 + $0x100] ss:$16 sps:$4 sm:$0xff]  }
 0x315   :  { %v3948_v1 = vpop.eup %3947  ;;  %v1005_v2 = vmul.f32 0.7978846, %v989_v37  ;;  %v1003_v5 = vmul.f32 0.7978846, %v987_v31  ;;  %v1072_v7 = vpack.c.bf16 %v1059_v59, %v1058_v53  ;;  %v1030_v11 = vadd.f32 1.0, %v3946_v60  ;;  %2126 = vmatprep.subr.bf16.mxu1 %v3752_v41 }
 0x316   :  { %v3950_v12 = vpop.eup %3949  ;;  %v1061_v24 = vmul.f32 %v1045_v61, %v4750_v56  ;;  %v1033_v47 = vadd.f32 1.0, %v3948_v1  ;;  %v1048_v58 = vmul.f32 0.5, %v1032_v63  ;;  %v3774_v41 = vld [vmem:[%s6287_s10 + $0xc8] ss:$16 sps:$4 sm:$0xff]   ;;  %v3788_v53 = vld [vmem:[%s6287_s10 + $0x10c] ss:$16 sps:$4 sm:$0xff]  }
 0x317   :  { %3955 = vtanh.f32 %v1005_v2  ;;  %1229 = vmatmul.mubr.bf16.gmra.mrb[20].mxu1 %v1071_v52  ;;  %v1031_v15 = vadd.f32 1.0, %v3950_v12  ;;  %v1046_v32 = vmul.f32 0.5, %v1030_v11  ;;  %v3786_v6 = vld [vmem:[%s6287_s10 + $0x108] ss:$16 sps:$4 sm:$0xff]   ;;  %v3791_v46 = vld [vmem:[%s6287_s10 + $0x124] ss:$16 sps:$4 sm:$0xff]  }
 0x318   :  { %3957 = vtanh.f32 %v1003_v5  ;;  %1238 = vmatprep.mubr.bf16.mxu1 %v4175_v9  ;;  %v1073_v20 = vpack.c.bf16 %v1061_v24, %v1060_v14  ;;  %v1049_v21 = vmul.f32 0.5, %v1033_v47  ;;  %2127 = vmatpush1.bf16.msra.mxu1 %v3750_v0  ;;  %v1064_v56 = vmul.f32 %v1048_v58, %v4768_v49  ;;  %v3770_v49 = vld [vmem:[%s6287_s10 + $0xac] ss:$16 sps:$4 sm:$0xff]   ;;  %v3789_v31 = vld [vmem:[%s6287_s10 + $0x120] ss:$16 sps:$4 sm:$0xff]  }
 0x319   :  { %v1047_v23 = vmul.f32 0.5, %v1031_v15  ;;  %2128 = vmatprep.subr.bf16.mxu1 %v3758_v36  ;;  %v1062_v8 = vmul.f32 %v1046_v32, %v4772_v34  ;;  %v3768_v34 = vld [vmem:[%s6287_s10 + $0xa8] ss:$16 sps:$4 sm:$0xff]   ;;  %v3794_v37 = vld [vmem:[%s6287_s10 + $0x12c] ss:$16 sps:$4 sm:$0xff]  }
 0x31a   :  { %v1065_v29 = vmul.f32 %v1049_v21, %v4778_v55  ;;  %v3792_v59 = vld [vmem:[%s6287_s10 + $0x128] ss:$16 sps:$4 sm:$0xff]   ;;  %v3797_v60 = vld [vmem:[%s6287_s10 + $0x144] ss:$16 sps:$4 sm:$0xff]   ;;  %v3800_v61 = vld [vmem:[%s6287_s10 + $0x14c] ss:$16 sps:$4 sm:$0xff]  }
 0x31b   :  { %v1063_v3 = vmul.f32 %v1047_v23, %v4784_v10  ;;  %v3795_v63 = vld [vmem:[%s6287_s10 + $0x140] ss:$16 sps:$4 sm:$0xff]   ;;  %v3798_v0 = vld [vmem:[%s6287_s10 + $0x148] ss:$16 sps:$4 sm:$0xff]   ;;  %v3803_v36 = vld [vmem:[%s6287_s10 + $0x164] ss:$16 sps:$4 sm:$0xff]  }
 0x31c   :  { %v3952_v17 = vpop.eup %3951  ;;  %v1075_v25 = vpack.c.bf16 %v1065_v29, %v1064_v56  ;;  %2129 = vmatpush1.bf16.msra.mxu1 %v3756_v22  ;;  %v3806_v1 = vld [vmem:[%s6287_s10 + $0x16c] ss:$16 sps:$4 sm:$0xff]   ;;  %v3801_v2 = vld [vmem:[%s6287_s10 + $0x160] ss:$16 sps:$4 sm:$0xff]   ;;  %v3804_v5 = vld [vmem:[%s6287_s10 + $0x168] ss:$16 sps:$4 sm:$0xff]  }
 0x31d   :  { %v3954_v43 = vpop.eup %3953  ;;  %v1074_v13 = vpack.c.bf16 %v1063_v3, %v1062_v8  ;;  %2130 = vmatprep.subr.bf16.mxu1 %v3764_v50  ;;  %v1036_v35 = vadd.f32 1.0, %v3952_v17  ;;  %v3812_v11 = vld [vmem:[%s6287_s10 + $0x18c] ss:$16 sps:$4 sm:$0xff]   ;;  %v3807_v12 = vld [vmem:[%s6287_s10 + $0x180] ss:$16 sps:$4 sm:$0xff]   ;;  %v1096_v8 = vlaneseq }
 0x31e   :  { %v1034_v55 = vadd.f32 1.0, %v3954_v43  ;;  %v3810_v14 = vld [vmem:[%s6287_s10 + $0x188] ss:$16 sps:$4 sm:$0xff]   ;;  %v3815_v24 = vld [vmem:[%s6287_s10 + $0x1a4] ss:$16 sps:$4 sm:$0xff]  }
 0x31f   :  { %1239 = vmatmul.mubr.bf16.gmra.mrb[24].mxu1 %v1072_v7  ;;  %v1052_v51 = vmul.f32 0.5, %v1036_v35  ;;  %v3809_v7 = vld [vmem:[%s6287_s10 + $0x184] ss:$16 sps:$4 sm:$0xff]   ;;  %v3818_v47 = vld [vmem:[%s6287_s10 + $0x1ac] ss:$16 sps:$4 sm:$0xff]   ;;  %v4996_v3 = vshrl.u32 %v1096_v8, 7 }
 0x320   :  { %1248 = vmatprep.mubr.bf16.mxu1 %v4175_v9  ;;  %2131 = vmatpush1.bf16.msra.mxu1 %v3762_v27  ;;  %v1050_v39 = vmul.f32 0.5, %v1034_v55  ;;  %v3813_v58 = vld [vmem:[%s6287_s10 + $0x1a0] ss:$16 sps:$4 sm:$0xff]   ;;  %v3816_v15 = vld [vmem:[%s6287_s10 + $0x1a8] ss:$16 sps:$4 sm:$0xff]  }
 0x321   :  { %v3956_v10 = vpop.eup %3955  ;;  %2132 = vmatprep.subr.bf16.mxu1 %v3770_v49  ;;  %v1068_v33 = vmul.f32 %v1052_v51, %v4796_v44  ;;  %v3779_v44 = vld [vmem:[%s6287_s10 + $0xe4] ss:$16 sps:$4 sm:$0xff]   ;;  %v3819_v21 = vld [vmem:[%s6287_s10 + $0x1c0] ss:$16 sps:$4 sm:$0xff]   ;;  %v3822_v22 = vld [vmem:[%s6287_s10 + $0x1c8] ss:$16 sps:$4 sm:$0xff]  }
 0x322   :  { %v3958_v48 = vpop.eup %3957  ;;  %v1037_v54 = vadd.f32 1.0, %v3956_v10  ;;  %v1066_v28 = vmul.f32 %v1050_v39, %v4800_v57  ;;  %v3782_v57 = vld [vmem:[%s6287_s10 + $0xec] ss:$16 sps:$4 sm:$0xff]   ;;  %2023 = vmatprep.subr.bf16.mxu0 %v3779_v44  ;;  %v3821_v32 = vld [vmem:[%s6287_s10 + $0x1c4] ss:$16 sps:$4 sm:$0xff]   ;;  %6312 = vst [vmem:[#allocation6_spill] sm:$0xff] %v4996_v3 }
 0x323   :  { %v1035_v4 = vadd.f32 1.0, %v3958_v48  ;;  %v3827_v23 = vld [vmem:[%s6287_s10 + $0x1e4] ss:$16 sps:$4 sm:$0xff]   ;;  %v3830_v50 = vld [vmem:[%s6287_s10 + $0x1ec] ss:$16 sps:$4 sm:$0xff]   ;;  %v1098_v17 = vsub.s32 0, %v4996_v3 }
 0x324   :  { %v1053_v40 = vmul.f32 0.5, %v1037_v54  ;;  %2133 = vmatpush1.bf16.msra.mxu1 %v3768_v34  ;;  %v3825_v56 = vld [vmem:[%s6287_s10 + $0x1e0] ss:$16 sps:$4 sm:$0xff]   ;;  %v3828_v29 = vld [vmem:[%s6287_s10 + $0x1e8] ss:$16 sps:$4 sm:$0xff]   ;;  %v1102_v27 = vsub.s32 1, %v4996_v3 }
 0x325   :  { %v1051_v45 = vmul.f32 0.5, %v1035_v4  ;;  %2134 = vmatprep.subr.bf16.mxu1 %v3776_v38 }
 0x326   :  { %v1069_v30 = vmul.f32 %v1053_v40, %v4813_v16  ;;  %v3777_v16 = vld [vmem:[%s6287_s10 + $0xe0] ss:$16 sps:$4 sm:$0xff]  }
 0x327   :  { %1249 = vmatmul.mubr.bf16.gmra.mrb[28].mxu1 %v1073_v20  ;;  %v1067_v62 = vmul.f32 %v1051_v45, %v4816_v18  ;;  %v3780_v18 = vld [vmem:[%s6287_s10 + $0xe8] ss:$16 sps:$4 sm:$0xff]   ;;  %2024 = vmatpush1.bf16.msra.mxu0 %v3777_v16  ;;  %v3824_v20 = vld [vmem:[%s6287_s10 + $0x1cc] ss:$16 sps:$4 sm:$0xff]  }
 0x328   :  { %1258 = vmatprep.mubr.bf16.mxu1 %v4175_v9  ;;  %v1077_v42 = vpack.c.bf16 %v1069_v30, %v1068_v33  ;;  %2135 = vmatpush1.bf16.msra.mxu1 %v3774_v41 }
 0x329   :  { %v1076_v52 = vpack.c.bf16 %v1067_v62, %v1066_v28  ;;  %2136 = vmatprep.subr.bf16.mxu1 %v3782_v57  ;;  %2025 = vmatprep.subr.bf16.mxu0 %v3785_v19 }
 0x32b   :  { %2026 = vmatpush1.bf16.msra.mxu0 %v3783_v26 }
 0x32c   :  { %2137 = vmatpush1.bf16.msra.mxu1 %v3780_v18  ;;  %2027 = vmatprep.subr.bf16.mxu0 %v3791_v46 }
 0x32d   :  { %2138 = vmatprep.subr.bf16.mxu1 %v3788_v53 }
 0x32f   :  { %1259 = vmatmul.mubr.bf16.gmra.mrb[32].mxu1 %v1074_v13  ;;  %2028 = vmatpush1.bf16.msra.mxu0 %v3789_v31 }
 0x330   :  { %1268 = vmatprep.mubr.bf16.mxu1 %v4175_v9  ;;  %2139 = vmatpush1.bf16.msra.mxu1 %v3786_v6 }
 0x331   :  { %2140 = vmatprep.subr.bf16.mxu1 %v3794_v37  ;;  %2029 = vmatprep.subr.bf16.mxu0 %v3797_v60 }
 0x333   :  { %2030 = vmatpush1.bf16.msra.mxu0 %v3795_v63 }
 0x334   :  { %2141 = vmatpush1.bf16.msra.mxu1 %v3792_v59  ;;  %2031 = vmatprep.subr.bf16.mxu0 %v3803_v36 }
 0x335   :  { %2142 = vmatprep.subr.bf16.mxu1 %v3800_v61 }
 0x337   :  { %1269 = vmatmul.mubr.bf16.gmra.mrb[36].mxu1 %v1075_v25  ;;  %2032 = vmatpush1.bf16.msra.mxu0 %v3801_v2  ;;  %v1094_v25 = vld [vmem:[%s6286_s9] sm:$0x3] }
 0x338   :  { %1278 = vmatprep.mubr.bf16.mxu1 %v4175_v9  ;;  %2143 = vmatpush1.bf16.msra.mxu1 %v3798_v0  ;;  %v5005_v43 = vrot.slane %v1094_v25, %v1098_v17  ;;  %v5009_v13 = vrot.slane %v1094_v25, %v1102_v27 }
 0x339   :  { %2144 = vmatprep.subr.bf16.mxu1 %v3806_v1  ;;  %2033 = vmatprep.subr.bf16.mxu0 %v3809_v7 }
 0x33b   :  { %2034 = vmatpush1.bf16.msra.mxu0 %v3807_v12 }
 0x33c   :  { %2145 = vmatpush1.bf16.msra.mxu1 %v3804_v5  ;;  %2035 = vmatprep.subr.bf16.mxu0 %v3815_v24 }
 0x33d   :  { %2146 = vmatprep.subr.bf16.mxu1 %v3812_v11 }
 0x33f   :  { %1279 = vmatmul.mubr.bf16.gmra.mrb[40].mxu1 %v1076_v52  ;;  %2036 = vmatpush1.bf16.msra.mxu0 %v3813_v58 }
 0x340   :  { %1288 = vmatprep.mubr.bf16.mxu1 %v4175_v9  ;;  %2147 = vmatpush1.bf16.msra.mxu1 %v3810_v14 }
 0x341   :  { %2148 = vmatprep.subr.bf16.mxu1 %v3818_v47  ;;  %2037 = vmatprep.subr.bf16.mxu0 %v3821_v32 }
 0x343   :  { %2038 = vmatpush1.bf16.msra.mxu0 %v3819_v21 }
 0x344   :  { %2149 = vmatpush1.bf16.msra.mxu1 %v3816_v15  ;;  %2039 = vmatprep.subr.bf16.mxu0 %v3827_v23 }
 0x345   :  { %2150 = vmatprep.subr.bf16.mxu1 %v3824_v20 }
 0x347   :  { %1289 = vmatmul.mubr.bf16.gmra.mrb[44].mxu1 %v1077_v42  ;;  %2040 = vmatpush1.bf16.msra.mxu0 %v3825_v56 }
 0x348   :  { %2151 = vmatpush1.bf16.msra.mxu1 %v3822_v22 }
 0x349   :  { %2152 = vmatprep.subr.bf16.mxu1 %v3830_v50 }
 0x34c   :  { %2153 = vmatpush1.bf16.msra.mxu1 %v3828_v29 }
 0x3e2   :  { %v1220_v49 = vpop.f32.mrb[16].mxu1 }
 0x3e3   :  { %v5012_v35 = vadd.f32 %v1220_v49, %v5005_v43  ;;  %v1222_v55 = vpop.f32.mrb[17].mxu1 }
 0x3e4   :  { %v5015_v34 = vadd.f32 %v1222_v55, %v5009_v13  ;;  %v1224_v10 = vpop.f32.mrb[18].mxu1 }
 0x3e5   :  { %v1299_v38 = vmul.f32 %v5012_v35, %v5012_v35  ;;  %v5020_v48 = vadd.f32 %v1224_v10, %v5005_v43  ;;  %v1226_v54 = vpop.f32.mrb[19].mxu1 }
 0x3e6   :  { %v1300_v51 = vmul.f32 %v5015_v34, %v5015_v34  ;;  %v5025_v4 = vadd.f32 %v1226_v54, %v5009_v13 }
 0x3e7   :  { %v1331_v39 = vmul.f32 %v1299_v38, %v5012_v35  ;;  %v1301_v40 = vmul.f32 %v5020_v48, %v5020_v48 }
 0x3e8   :  { %v1332_v41 = vmul.f32 %v1300_v51, %v5015_v34  ;;  %v1302_v45 = vmul.f32 %v5025_v4, %v5025_v4 }
 0x3e9   :  { %v1363_v33 = vmul.f32 0.044715, %v1331_v39  ;;  %v1333_v30 = vmul.f32 %v1301_v40, %v5020_v48 }
 0x3ea   :  { %v1364_v28 = vmul.f32 0.044715, %v1332_v41  ;;  %v1334_v62 = vmul.f32 %v1302_v45, %v5025_v4  ;;  %v1230_v42 = vpop.f32.mrb[20].mxu1 }
 0x3eb   :  { %v1395_v52 = vadd.f32 %v1363_v33, %v5012_v35  ;;  %v1365_v44 = vmul.f32 0.044715, %v1333_v30  ;;  %v5037_v57 = vadd.f32 %v1230_v42, %v5005_v43  ;;  %v1232_v16 = vpop.f32.mrb[21].mxu1 }
 0x3ec   :  { %v1396_v18 = vadd.f32 %v1364_v28, %v5015_v34  ;;  %v1366_v19 = vmul.f32 0.044715, %v1334_v62  ;;  %v5041_v53 = vadd.f32 %v1232_v16, %v5009_v13  ;;  %v1234_v26 = vpop.f32.mrb[22].mxu1 }
 0x3ed   :  { %v1427_v6 = vmul.f32 0.7978846, %v1395_v52  ;;  %v1397_v46 = vadd.f32 %v1365_v44, %v5020_v48  ;;  %v1303_v37 = vmul.f32 %v5037_v57, %v5037_v57  ;;  %v5047_v31 = vadd.f32 %v1234_v26, %v5005_v43  ;;  %v1236_v59 = vpop.f32.mrb[23].mxu1 }
 0x3ee   :  { %v1428_v60 = vmul.f32 0.7978846, %v1396_v18  ;;  %v1398_v61 = vadd.f32 %v1366_v19, %v5025_v4  ;;  %v1304_v63 = vmul.f32 %v5041_v53, %v5041_v53  ;;  %v5053_v0 = vadd.f32 %v1236_v59, %v5009_v13 }
 0x3ef   :  { %3959 = vtanh.f32 %v1427_v6  ;;  %v1429_v36 = vmul.f32 0.7978846, %v1397_v46  ;;  %v1335_v1 = vmul.f32 %v1303_v37, %v5037_v57  ;;  %v1305_v2 = vmul.f32 %v5047_v31, %v5047_v31 }
 0x3f0   :  { %3961 = vtanh.f32 %v1428_v60  ;;  %v1430_v5 = vmul.f32 0.7978846, %v1398_v61  ;;  %v1336_v7 = vmul.f32 %v1304_v63, %v5041_v53  ;;  %v1306_v11 = vmul.f32 %v5053_v0, %v5053_v0 }
 0x3f1   :  { %3963 = vtanh.f32 %v1429_v36  ;;  %v1367_v12 = vmul.f32 0.044715, %v1335_v1  ;;  %v1337_v14 = vmul.f32 %v1305_v2, %v5047_v31 }
 0x3f2   :  { %v1368_v24 = vmul.f32 0.044715, %v1336_v7  ;;  %v1338_v47 = vmul.f32 %v1306_v11, %v5053_v0  ;;  %v1240_v58 = vpop.f32.mrb[24].mxu1  ;;  %3965 = vtanh.f32 %v1430_v5 }
 0x3f3   :  { %v1399_v15 = vadd.f32 %v1367_v12, %v5037_v57  ;;  %v1369_v32 = vmul.f32 0.044715, %v1337_v14  ;;  %v5065_v20 = vadd.f32 %v1240_v58, %v5005_v43  ;;  %v1242_v21 = vpop.f32.mrb[25].mxu1 }
 0x3f4   :  { %v1400_v22 = vadd.f32 %v1368_v24, %v5041_v53  ;;  %v1370_v23 = vmul.f32 0.044715, %v1338_v47  ;;  %v5069_v50 = vadd.f32 %v1242_v21, %v5009_v13  ;;  %v1244_v56 = vpop.f32.mrb[26].mxu1 }
 0x3f5   :  { %v1431_v29 = vmul.f32 0.7978846, %v1399_v15  ;;  %v1401_v8 = vadd.f32 %v1369_v32, %v5047_v31  ;;  %v1307_v25 = vmul.f32 %v5065_v20, %v5065_v20  ;;  %v5075_v49 = vadd.f32 %v1244_v56, %v5005_v43  ;;  %v1246_v55 = vpop.f32.mrb[27].mxu1 }
 0x3f6   :  { %v1432_v10 = vmul.f32 0.7978846, %v1400_v22  ;;  %v1402_v38 = vadd.f32 %v1370_v23, %v5053_v0  ;;  %v1308_v54 = vmul.f32 %v5069_v50, %v5069_v50  ;;  %v5081_v51 = vadd.f32 %v1246_v55, %v5009_v13 }
 0x3f7   :  { %3967 = vtanh.f32 %v1431_v29  ;;  %v1433_v39 = vmul.f32 0.7978846, %v1401_v8  ;;  %v1339_v40 = vmul.f32 %v1307_v25, %v5065_v20  ;;  %v1309_v41 = vmul.f32 %v5075_v49, %v5075_v49 }
 0x3f8   :  { %3969 = vtanh.f32 %v1432_v10  ;;  %v1434_v45 = vmul.f32 0.7978846, %v1402_v38  ;;  %v1340_v33 = vmul.f32 %v1308_v54, %v5069_v50  ;;  %v1310_v30 = vmul.f32 %v5081_v51, %v5081_v51 }
 0x3f9   :  { %v3960_v28 = vpop.eup %3959  ;;  %3971 = vtanh.f32 %v1433_v39  ;;  %v1371_v62 = vmul.f32 0.044715, %v1339_v40  ;;  %v1341_v42 = vmul.f32 %v1309_v41, %v5075_v49 }
 0x3fa   :  { %v3962_v52 = vpop.eup %3961  ;;  %v1491_v44 = vadd.f32 1.0, %v3960_v28  ;;  %3973 = vtanh.f32 %v1434_v45  ;;  %v1372_v16 = vmul.f32 0.044715, %v1340_v33  ;;  %v1342_v18 = vmul.f32 %v1310_v30, %v5081_v51  ;;  %v1250_v19 = vpop.f32.mrb[28].mxu1 }
 0x3fb   :  { %v3964_v26 = vpop.eup %3963  ;;  %v1403_v6 = vadd.f32 %v1371_v62, %v5065_v20  ;;  %v1373_v46 = vmul.f32 0.044715, %v1341_v42  ;;  %v5093_v37 = vadd.f32 %v1250_v19, %v5005_v43  ;;  %v1252_v59 = vpop.f32.mrb[29].mxu1  ;;  %v1492_v60 = vadd.f32 1.0, %v3962_v52 }
 0x3fc   :  { %v1523_v61 = vmul.f32 0.5, %v1491_v44  ;;  %v1493_v63 = vadd.f32 1.0, %v3964_v26  ;;  %v1404_v36 = vadd.f32 %v1372_v16, %v5069_v50  ;;  %v1374_v1 = vmul.f32 0.044715, %v1342_v18  ;;  %v1254_v2 = vpop.f32.mrb[30].mxu1  ;;  %v3966_v24 = vpop.eup %3965 }
 0x3fd   :  { %v1435_v5 = vmul.f32 0.7978846, %v1403_v6  ;;  %v1405_v7 = vadd.f32 %v1373_v46, %v5075_v49  ;;  %v1311_v11 = vmul.f32 %v5093_v37, %v5093_v37  ;;  %v5100_v12 = vadd.f32 %v1252_v59, %v5009_v13  ;;  %v1256_v14 = vpop.f32.mrb[31].mxu1 }
 0x3fe   :  { %v1555_v47 = vmul.f32 %v1523_v61, %v5012_v35  ;;  %v1525_v58 = vmul.f32 0.5, %v1493_v63  ;;  %v1436_v15 = vmul.f32 0.7978846, %v1404_v36  ;;  %v1406_v32 = vadd.f32 %v1374_v1, %v5081_v51 }
 0x3ff   :  { %3975 = vtanh.f32 %v1435_v5  ;;  %v1437_v21 = vmul.f32 0.7978846, %v1405_v7  ;;  %v1343_v22 = vmul.f32 %v1311_v11, %v5093_v37  ;;  %v1312_v23 = vmul.f32 %v5100_v12, %v5100_v12 }
 0x400   :  { %v1557_v56 = vmul.f32 %v1525_v58, %v5020_v48  ;;  %3977 = vtanh.f32 %v1436_v15  ;;  %v1438_v29 = vmul.f32 0.7978846, %v1406_v32  ;;  %v5109_v8 = vadd.f32 %v1254_v2, %v5005_v43 }
 0x401   :  { %v5111_v25 = vpop.eup %3967  ;;  %3979 = vtanh.f32 %v1437_v21  ;;  %v1375_v35 = vmul.f32 0.044715, %v1343_v22  ;;  %v1344_v55 = vmul.f32 %v1312_v23, %v5100_v12  ;;  %v5115_v10 = vadd.f32 %v1256_v14, %v5009_v13 }
 0x402   :  { %v5117_v38 = vpop.eup %3969  ;;  %v5119_v54 = vpack.c.bf16 %v1557_v56, %v1555_v47  ;;  %3981 = vtanh.f32 %v1438_v29  ;;  %v1313_v48 = vmul.f32 %v5109_v8, %v5109_v8  ;;  %v1260_v39 = vpop.f32.mrb[32].mxu1  ;;  %v1494_v40 = vadd.f32 1.0, %v3966_v24 }
 0x403   :  { %v5123_v41 = vpop.eup %3971  ;;  %v1407_v45 = vadd.f32 %v1375_v35, %v5093_v37  ;;  %v1376_v33 = vmul.f32 0.044715, %v1344_v55  ;;  %v1314_v30 = vmul.f32 %v5115_v10, %v5115_v10  ;;  %v5129_v28 = vadd.f32 %v1260_v39, %v5005_v43  ;;  %v1262_v62 = vpop.f32.mrb[33].mxu1 }
 0x404   :  { %v5131_v42 = vpop.eup %3973  ;;  %v1345_v52 = vmul.f32 %v1313_v48, %v5109_v8  ;;  %v5135_v44 = vadd.f32 %v1262_v62, %v5009_v13  ;;  %v1264_v16 = vpop.f32.mrb[34].mxu1  ;;  %v1524_v18 = vmul.f32 0.5, %v1492_v60  ;;  %v1526_v19 = vmul.f32 0.5, %v1494_v40 }
 0x405   :  { %v1439_v26 = vmul.f32 0.7978846, %v1407_v45  ;;  %v1408_v6 = vadd.f32 %v1376_v33, %v5100_v12  ;;  %v1346_v46 = vmul.f32 %v1314_v30, %v5115_v10  ;;  %v1315_v59 = vmul.f32 %v5129_v28, %v5129_v28  ;;  %v1266_v61 = vpop.f32.mrb[35].mxu1 }
 0x406   :  { %v1377_v63 = vmul.f32 0.044715, %v1345_v52  ;;  %v1316_v36 = vmul.f32 %v5135_v44, %v5135_v44  ;;  %v5144_v1 = vadd.f32 %v1264_v16, %v5005_v43  ;;  %v5147_v2 = vadd.f32 %v1266_v61, %v5009_v13 }
 0x407   :  { %3983 = vtanh.f32 %v1439_v26  ;;  %v1440_v60 = vmul.f32 0.7978846, %v1408_v6  ;;  %v1378_v5 = vmul.f32 0.044715, %v1346_v46  ;;  %v1347_v7 = vmul.f32 %v1315_v59, %v5129_v28 }
 0x408   :  { %v1409_v11 = vadd.f32 %v1377_v63, %v5109_v8  ;;  %v1348_v14 = vmul.f32 %v1316_v36, %v5135_v44  ;;  %v1317_v24 = vmul.f32 %v5144_v1, %v5144_v1  ;;  %v1318_v47 = vmul.f32 %v5147_v2, %v5147_v2 }
 0x409   :  { %v5156_v58 = vpop.eup %3975  ;;  %3985 = vtanh.f32 %v1440_v60  ;;  %v1410_v15 = vadd.f32 %v1378_v5, %v5115_v10  ;;  %v1379_v32 = vmul.f32 0.044715, %v1347_v7  ;;  %v1556_v21 = vmul.f32 %v1524_v18, %v5015_v34 }
 0x40a   :  { %v5160_v22 = vpop.eup %3977  ;;  %v1441_v23 = vmul.f32 0.7978846, %v1409_v11  ;;  %v1380_v56 = vmul.f32 0.044715, %v1348_v14  ;;  %v1349_v29 = vmul.f32 %v1317_v24, %v5144_v1  ;;  %v1350_v35 = vmul.f32 %v1318_v47, %v5147_v2  ;;  %v1270_v55 = vpop.f32.mrb[36].mxu1 }
 0x40b   :  { %v5164_v48 = vpop.eup %3979  ;;  %v1442_v39 = vmul.f32 0.7978846, %v1410_v15  ;;  %v1411_v40 = vadd.f32 %v1379_v32, %v5129_v28  ;;  %v1558_v45 = vmul.f32 %v1526_v19, %v5025_v4  ;;  %v5169_v33 = vadd.f32 %v1270_v55, %v5005_v43  ;;  %v1272_v34 = vpop.f32.mrb[37].mxu1 }
 0x40c   :  { %v5171_v30 = vpop.eup %3981  ;;  %3987 = vtanh.f32 %v1441_v23  ;;  %v1412_v62 = vadd.f32 %v1380_v56, %v5135_v44  ;;  %v1381_v52 = vmul.f32 0.044715, %v1349_v29  ;;  %v1382_v16 = vmul.f32 0.044715, %v1350_v35  ;;  %v1274_v18 = vpop.f32.mrb[38].mxu1 }
 0x40d   :  { %3989 = vtanh.f32 %v1442_v39  ;;  %v1443_v26 = vmul.f32 0.7978846, %v1411_v40  ;;  %v1588_v6 = vpack.c.bf16 %v1558_v45, %v1556_v21  ;;  %v1319_v46 = vmul.f32 %v5169_v33, %v5169_v33  ;;  %v1276_v59 = vpop.f32.mrb[39].mxu1 }
 0x40e   :  { %v1444_v4 = vmul.f32 0.7978846, %v1412_v62  ;;  %v1413_v19 = vadd.f32 %v1381_v52, %v5144_v1  ;;  %v1414_v61 = vadd.f32 %v1382_v16, %v5147_v2  ;;  %v5179_v63 = vadd.f32 %v1272_v34, %v5009_v13 }
 0x40f   :  { %3991 = vtanh.f32 %v1443_v26  ;;  %2041 = vmatprep.mubr.bf16.mxu0 %v1588_v6  ;;  %2154 = vmatprep.mubr.bf16.mxu1 %v1588_v6  ;;  %v1351_v36 = vmul.f32 %v1319_v46, %v5169_v33  ;;  %v5183_v60 = vadd.f32 %v1274_v18, %v5005_v43  ;;  %v5186_v5 = vadd.f32 %v1276_v59, %v5009_v13 }
 0x410   :  { %3993 = vtanh.f32 %v1444_v4  ;;  %v1445_v7 = vmul.f32 0.7978846, %v1413_v19  ;;  %v1446_v11 = vmul.f32 0.7978846, %v1414_v61  ;;  %2042 = vmatmul.mubr.bf16.vlgmr.msra.gmra.mrb[32].mxu0 %v5119_v54  ;;  %2155 = vmatmul.mubr.bf16.vlgmr.msra.gmra.mrb[48].mxu1 %v5119_v54  ;;  %v1320_v14 = vmul.f32 %v5179_v63, %v5179_v63 }
 0x411   :  { %v5192_v24 = vpop.eup %3983  ;;  %v1383_v47 = vmul.f32 0.044715, %v1351_v36  ;;  %v1321_v15 = vmul.f32 %v5183_v60, %v5183_v60  ;;  %v1322_v32 = vmul.f32 %v5186_v5, %v5186_v5  ;;  %v1496_v21 = vadd.f32 1.0, %v5117_v38 }
 0x412   :  { %3995 = vtanh.f32 %v1445_v7  ;;  %v1352_v23 = vmul.f32 %v1320_v14, %v5179_v63  ;;  %v1498_v56 = vadd.f32 1.0, %v5131_v42  ;;  %v1495_v54 = vadd.f32 1.0, %v5111_v25  ;;  %v1280_v29 = vpop.f32.mrb[40].mxu1 }
 0x413   :  { %v5202_v35 = vpop.eup %3985  ;;  %3997 = vtanh.f32 %v1446_v11  ;;  %v1415_v55 = vadd.f32 %v1383_v47, %v5169_v33  ;;  %v1353_v39 = vmul.f32 %v1321_v15, %v5183_v60  ;;  %v1354_v40 = vmul.f32 %v1322_v32, %v5186_v5  ;;  %v1282_v45 = vpop.f32.mrb[41].mxu1 }
 0x414   :  { %v1384_v34 = vmul.f32 0.044715, %v1352_v23  ;;  %v1528_v38 = vmul.f32 0.5, %v1496_v21  ;;  %v1530_v62 = vmul.f32 0.5, %v1498_v56  ;;  %v1497_v52 = vadd.f32 1.0, %v5123_v41  ;;  %v1284_v16 = vpop.f32.mrb[42].mxu1 }
 0x415   :  { %v1447_v42 = vmul.f32 0.7978846, %v1415_v55  ;;  %v1385_v18 = vmul.f32 0.044715, %v1353_v39  ;;  %v1386_v25 = vmul.f32 0.044715, %v1354_v40  ;;  %v5209_v26 = vadd.f32 %v1280_v29, %v5005_v43 }
 0x416   :  { %v5211_v6 = vpop.eup %3987  ;;  %v1416_v46 = vadd.f32 %v1384_v34, %v5179_v63  ;;  %v1560_v59 = vmul.f32 %v1528_v38, %v5041_v53  ;;  %v1562_v4 = vmul.f32 %v1530_v62, %v5053_v0  ;;  %v1527_v19 = vmul.f32 0.5, %v1495_v54  ;;  %v1286_v61 = vpop.f32.mrb[43].mxu1 }
 0x417   :  { %v5216_v36 = vpop.eup %3989  ;;  %3999 = vtanh.f32 %v1447_v42  ;;  %v1417_v41 = vadd.f32 %v1385_v18, %v5183_v60  ;;  %v1418_v7 = vadd.f32 %v1386_v25, %v5186_v5  ;;  %v1529_v11 = vmul.f32 0.5, %v1497_v52 }
 0x418   :  { %v1448_v14 = vmul.f32 0.7978846, %v1416_v46  ;;  %v1590_v47 = vpack.c.bf16 %v1562_v4, %v1560_v59  ;;  %v1559_v15 = vmul.f32 %v1527_v19, %v5037_v57  ;;  %v1323_v32 = vmul.f32 %v5209_v26, %v5209_v26 }
 0x419   :  { %v5223_v53 = vpop.eup %3991  ;;  %v1449_v0 = vmul.f32 0.7978846, %v1417_v41  ;;  %v1450_v21 = vmul.f32 0.7978846, %v1418_v7  ;;  %v1561_v23 = vmul.f32 %v1529_v11, %v5047_v31  ;;  %v5227_v56 = vadd.f32 %v1282_v45, %v5009_v13 }
 0x41a   :  { %v5229_v54 = vpop.eup %3993  ;;  %4001 = vtanh.f32 %v1448_v14  ;;  %2051 = vmatprep.mubr.bf16.mxu0 %v1590_v47  ;;  %2164 = vmatprep.mubr.bf16.mxu1 %v1590_v47  ;;  %v1355_v29 = vmul.f32 %v1323_v32, %v5209_v26  ;;  %v5233_v57 = vadd.f32 %v1284_v16, %v5005_v43  ;;  %v5236_v55 = vadd.f32 %v1286_v61, %v5009_v13  ;;  %v1290_v39 = vpop.f32.mrb[44].mxu1 }
 0x41b   :  { %4003 = vtanh.f32 %v1449_v0  ;;  %v1589_v40 = vpack.c.bf16 %v1561_v23, %v1559_v15  ;;  %v1324_v31 = vmul.f32 %v5227_v56, %v5227_v56  ;;  %v1500_v45 = vadd.f32 1.0, %v5160_v22  ;;  %v1292_v34 = vpop.f32.mrb[45].mxu1 }
 0x41c   :  { %v5241_v38 = vpop.eup %3995  ;;  %4005 = vtanh.f32 %v1450_v21  ;;  %v1387_v62 = vmul.f32 0.044715, %v1355_v29  ;;  %v1325_v52 = vmul.f32 %v5233_v57, %v5233_v57  ;;  %v1326_v16 = vmul.f32 %v5236_v55, %v5236_v55  ;;  %v1294_v42 = vpop.f32.mrb[46].mxu1 }
 0x41d   :  { %v5247_v18 = vpop.eup %3997  ;;  %2052 = vmatmul.mubr.bf16.gmra.mrb[36].mxu0 %v1589_v40  ;;  %2165 = vmatmul.mubr.bf16.gmra.mrb[52].mxu1 %v1589_v40  ;;  %v1356_v25 = vmul.f32 %v1324_v31, %v5227_v56  ;;  %v1502_v22 = vadd.f32 1.0, %v5171_v30  ;;  %v1532_v46 = vmul.f32 0.5, %v1500_v45  ;;  %v1499_v59 = vadd.f32 1.0, %v5156_v58  ;;  %v1296_v4 = vpop.f32.mrb[47].mxu1 }
 0x41e   :  { %v1419_v19 = vadd.f32 %v1387_v62, %v5209_v26  ;;  %v1357_v61 = vmul.f32 %v1325_v52, %v5233_v57  ;;  %v1358_v41 = vmul.f32 %v1326_v16, %v5236_v55  ;;  %v1501_v7 = vadd.f32 1.0, %v5164_v48 }
 0x41f   :  { %v1388_v11 = vmul.f32 0.044715, %v1356_v25  ;;  %v1534_v14 = vmul.f32 0.5, %v1502_v22  ;;  %v1564_v47 = vmul.f32 %v1532_v46, %v5069_v50  ;;  %v1531_v15 = vmul.f32 0.5, %v1499_v59 }
 0x420   :  { %v1451_v32 = vmul.f32 0.7978846, %v1419_v19  ;;  %v1389_v0 = vmul.f32 0.044715, %v1357_v61  ;;  %v1390_v30 = vmul.f32 0.044715, %v1358_v41  ;;  %v5258_v21 = vadd.f32 %v1290_v39, %v5005_v43 }
 0x421   :  { %v5260_v58 = vpop.eup %3999  ;;  %v1420_v23 = vadd.f32 %v1388_v11, %v5227_v56  ;;  %v1566_v29 = vmul.f32 %v1534_v14, %v5081_v51  ;;  %v1533_v40 = vmul.f32 0.5, %v1501_v7  ;;  %v1563_v48 = vmul.f32 %v1531_v15, %v5065_v20 }
 0x422   :  { %4007 = vtanh.f32 %v1451_v32  ;;  %v1421_v31 = vadd.f32 %v1389_v0, %v5233_v57  ;;  %v1422_v50 = vadd.f32 %v1390_v30, %v5236_v55  ;;  %v1327_v45 = vmul.f32 %v5258_v21, %v5258_v21 }
 0x423   :  { %v1452_v62 = vmul.f32 0.7978846, %v1420_v23  ;;  %v1592_v39 = vpack.c.bf16 %v1566_v29, %v1564_v47  ;;  %v1565_v52 = vmul.f32 %v1533_v40, %v5075_v49  ;;  %v5271_v16 = vadd.f32 %v1292_v34, %v5009_v13 }
 0x424   :  { %v5273_v25 = vpop.eup %4001  ;;  %v1453_v51 = vmul.f32 0.7978846, %v1421_v31  ;;  %v1454_v22 = vmul.f32 0.7978846, %v1422_v50  ;;  %v1359_v20 = vmul.f32 %v1327_v45, %v5258_v21  ;;  %v5277_v46 = vadd.f32 %v1294_v42, %v5005_v43 }
 0x425   :  { %v5279_v59 = vpop.eup %4003  ;;  %4009 = vtanh.f32 %v1452_v62  ;;  %2061 = vmatprep.mubr.bf16.mxu0 %v1592_v39  ;;  %2174 = vmatprep.mubr.bf16.mxu1 %v1592_v39  ;;  %v1591_v19 = vpack.c.bf16 %v1565_v52, %v1563_v48  ;;  %v1328_v49 = vmul.f32 %v5271_v16, %v5271_v16  ;;  %v5284_v34 = vadd.f32 %v1296_v4, %v5009_v13 }
 0x426   :  { %v4006_v61 = vpop.eup %4005  ;;  %4011 = vtanh.f32 %v1453_v51  ;;  %v1391_v41 = vmul.f32 0.044715, %v1359_v20  ;;  %v1329_v7 = vmul.f32 %v5277_v46, %v5277_v46  ;;  %v1504_v43 = vadd.f32 1.0, %v5202_v35 }
 0x427   :  { %4013 = vtanh.f32 %v1454_v22  ;;  %2062 = vmatmul.mubr.bf16.gmra.mrb[40].mxu0 %v1591_v19  ;;  %2175 = vmatmul.mubr.bf16.gmra.mrb[56].mxu1 %v1591_v19  ;;  %v1360_v42 = vmul.f32 %v1328_v49, %v5271_v16  ;;  %v1330_v11 = vmul.f32 %v5284_v34, %v5284_v34  ;;  %v1506_v14 = vadd.f32 1.0, %v5216_v36 }
 0x428   :  { %v1423_v13 = vadd.f32 %v1391_v41, %v5258_v21  ;;  %v1361_v4 = vmul.f32 %v1329_v7, %v5277_v46  ;;  %v1536_v47 = vmul.f32 0.5, %v1504_v43  ;;  %v1503_v15 = vadd.f32 1.0, %v5192_v24 }
 0x429   :  { %v1392_v32 = vmul.f32 0.044715, %v1360_v42  ;;  %v1362_v35 = vmul.f32 %v1330_v11, %v5284_v34  ;;  %v1538_v0 = vmul.f32 0.5, %v1506_v14  ;;  %v1505_v30 = vadd.f32 1.0, %v5211_v6 }
 0x42a   :  { %v1455_v23 = vmul.f32 0.7978846, %v1423_v13  ;;  %v1393_v29 = vmul.f32 0.044715, %v1361_v4  ;;  %v1568_v40 = vmul.f32 %v1536_v47, %v5100_v12  ;;  %v1535_v48 = vmul.f32 0.5, %v1503_v15 }
 0x42b   :  { %v1424_v36 = vadd.f32 %v1392_v32, %v5271_v16  ;;  %v1394_v31 = vmul.f32 0.044715, %v1362_v35  ;;  %v1570_v50 = vmul.f32 %v1538_v0, %v5115_v10  ;;  %v1537_v45 = vmul.f32 0.5, %v1505_v30 }
 0x42c   :  { %v4008_v62 = vpop.eup %4007  ;;  %4015 = vtanh.f32 %v1455_v23  ;;  %v1425_v24 = vadd.f32 %v1393_v29, %v5277_v46  ;;  %v1567_v39 = vmul.f32 %v1535_v48, %v5093_v37  ;;  %v1508_v52 = vadd.f32 1.0, %v5229_v54 }
 0x42d   :  { %v1456_v6 = vmul.f32 0.7978846, %v1424_v36  ;;  %v1426_v51 = vadd.f32 %v1394_v31, %v5284_v34  ;;  %v1594_v22 = vpack.c.bf16 %v1570_v50, %v1568_v40  ;;  %v1569_v12 = vmul.f32 %v1537_v45, %v5109_v8 }
 0x42e   :  { %v1457_v20 = vmul.f32 0.7978846, %v1425_v24  ;;  %v1510_v19 = vadd.f32 1.0, %v5247_v18  ;;  %v1540_v49 = vmul.f32 0.5, %v1508_v52  ;;  %v1507_v10 = vadd.f32 1.0, %v5223_v53 }
 0x42f   :  { %v4010_v41 = vpop.eup %4009  ;;  %4017 = vtanh.f32 %v1456_v6  ;;  %v1458_v7 = vmul.f32 0.7978846, %v1426_v51  ;;  %2071 = vmatprep.mubr.bf16.mxu0 %v1594_v22  ;;  %2184 = vmatprep.mubr.bf16.mxu1 %v1594_v22  ;;  %v1593_v37 = vpack.c.bf16 %v1569_v12, %v1567_v39  ;;  %v1509_v54 = vadd.f32 1.0, %v5241_v38 }
 0x430   :  { %v4012_v43 = vpop.eup %4011  ;;  %4019 = vtanh.f32 %v1457_v20  ;;  %v1542_v42 = vmul.f32 0.5, %v1510_v19  ;;  %v1572_v11 = vmul.f32 %v1540_v49, %v5135_v44  ;;  %v1539_v8 = vmul.f32 0.5, %v1507_v10 }
 0x431   :  { %v4014_v14 = vpop.eup %4013  ;;  %4021 = vtanh.f32 %v1458_v7  ;;  %2072 = vmatmul.mubr.bf16.gmra.mrb[44].mxu0 %v1593_v37  ;;  %2185 = vmatmul.mubr.bf16.gmra.mrb[60].mxu1 %v1593_v37  ;;  %v1541_v18 = vmul.f32 0.5, %v1509_v54  ;;  %v1512_v53 = vadd.f32 1.0, %v5273_v25  ;;  %v1514_v13 = vadd.f32 1.0, %v4006_v61 }
 0x432   :  { %v1574_v4 = vmul.f32 %v1542_v42, %v5147_v2  ;;  %v1571_v47 = vmul.f32 %v1539_v8, %v5129_v28  ;;  %v1511_v38 = vadd.f32 1.0, %v5260_v58  ;;  %v1513_v15 = vadd.f32 1.0, %v5279_v59 }
 0x433   :  { %v1573_v32 = vmul.f32 %v1541_v18, %v5144_v1  ;;  %v1544_v44 = vmul.f32 0.5, %v1512_v53  ;;  %v1546_v35 = vmul.f32 0.5, %v1514_v13  ;;  %v1516_v0 = vadd.f32 1.0, %v4010_v41 }
 0x434   :  { %v1596_v30 = vpack.c.bf16 %v1574_v4, %v1572_v11  ;;  %v1543_v23 = vmul.f32 0.5, %v1511_v38  ;;  %v1545_v29 = vmul.f32 0.5, %v1513_v15  ;;  %v1518_v40 = vadd.f32 1.0, %v4014_v14 }
 0x435   :  { %v1595_v48 = vpack.c.bf16 %v1573_v32, %v1571_v47  ;;  %v1576_v25 = vmul.f32 %v1544_v44, %v5179_v63  ;;  %v1578_v2 = vmul.f32 %v1546_v35, %v5186_v5  ;;  %v1548_v61 = vmul.f32 0.5, %v1516_v0 }
 0x436   :  { %v4016_v28 = vpop.eup %4015  ;;  %2081 = vmatprep.mubr.bf16.mxu0 %v1596_v30  ;;  %2194 = vmatprep.mubr.bf16.mxu1 %v1596_v30  ;;  %v1575_v58 = vmul.f32 %v1543_v23, %v5169_v33  ;;  %v1577_v1 = vmul.f32 %v1545_v29, %v5183_v60  ;;  %v1550_v59 = vmul.f32 0.5, %v1518_v40  ;;  %v1515_v36 = vadd.f32 1.0, %v4008_v62 }
 0x437   :  { %v1598_v31 = vpack.c.bf16 %v1578_v2, %v1576_v25  ;;  %v1517_v50 = vadd.f32 1.0, %v4012_v43  ;;  %v1519_v45 = vadd.f32 1.0, %v4016_v28  ;;  %v1580_v39 = vmul.f32 %v1548_v61, %v5227_v56 }
 0x438   :  { %v1597_v24 = vpack.c.bf16 %v1577_v1, %v1575_v58  ;;  %v1582_v63 = vmul.f32 %v1550_v59, %v5236_v55  ;;  %v1547_v52 = vmul.f32 0.5, %v1515_v36 }
 0x439   :  { %v4018_v5 = vpop.eup %4017  ;;  %2082 = vmatmul.mubr.bf16.gmra.mrb[48].mxu0 %v1595_v48  ;;  %2195 = vmatmul.mubr.bf16.gmra.mrb[64].mxu1 %v1595_v48  ;;  %v1549_v6 = vmul.f32 0.5, %v1517_v50  ;;  %v1551_v19 = vmul.f32 0.5, %v1519_v45 }
 0x43a   :  { %v4020_v51 = vpop.eup %4019  ;;  %2091 = vmatprep.mubr.bf16.mxu0 %v1598_v31  ;;  %2204 = vmatprep.mubr.bf16.mxu1 %v1598_v31  ;;  %v1600_v33 = vpack.c.bf16 %v1582_v63, %v1580_v39  ;;  %v1520_v60 = vadd.f32 1.0, %v4018_v5  ;;  %v1579_v62 = vmul.f32 %v1547_v52, %v5209_v26 }
 0x43b   :  { %v4022_v22 = vpop.eup %4021  ;;  %v1581_v12 = vmul.f32 %v1549_v6, %v5233_v57  ;;  %v1521_v20 = vadd.f32 1.0, %v4020_v51  ;;  %v1583_v7 = vmul.f32 %v1551_v19, %v5258_v21  ;;  %v1679_v21 = vsub.s32 2, %v4996_v3 }
 0x43c   :  { %v1522_v56 = vadd.f32 1.0, %v4022_v22  ;;  %v1552_v49 = vmul.f32 0.5, %v1520_v60 }
 0x43d   :  { %v1599_v55 = vpack.c.bf16 %v1581_v12, %v1579_v62  ;;  %v1553_v10 = vmul.f32 0.5, %v1521_v20 }
 0x43e   :  { %v1554_v41 = vmul.f32 0.5, %v1522_v56  ;;  %v1584_v54 = vmul.f32 %v1552_v49, %v5271_v16  ;;  %v1667_v16 = vld [vmem:[%s6288_s11] sm:$0xf] }
 0x43f   :  { %v1585_v37 = vmul.f32 %v1553_v10, %v5277_v46  ;;  %v1683_v46 = vsub.s32 3, %v4996_v3  ;;  %v5339_v42 = vrot.slane %v1667_v16, %v1679_v21  ;;  %v5343_v11 = vrot.slane %v1667_v16, %v1102_v27 }
 0x440   :  { %v1586_v43 = vmul.f32 %v1554_v41, %v5284_v34  ;;  %v5337_v34 = vrot.slane %v1667_v16, %v1098_v17 }
 0x441   :  { %2092 = vmatmul.mubr.bf16.gmra.mrb[52].mxu0 %v1597_v24  ;;  %2205 = vmatmul.mubr.bf16.gmra.mrb[68].mxu1 %v1597_v24  ;;  %v1601_v26 = vpack.c.bf16 %v1585_v37, %v1583_v7  ;;  %v5345_v8 = vrot.slane %v1667_v16, %v1683_v46 }
 0x442   :  { %2101 = vmatprep.mubr.bf16.mxu0 %v1600_v33  ;;  %2214 = vmatprep.mubr.bf16.mxu1 %v1600_v33  ;;  %v1602_v57 = vpack.c.bf16 %v1586_v43, %v1584_v54 }
 0x449   :  { %2102 = vmatmul.mubr.bf16.gmra.mrb[56].mxu0 %v1599_v55  ;;  %2215 = vmatmul.mubr.bf16.gmra.mrb[72].mxu1 %v1599_v55 }
 0x44a   :  { %2111 = vmatprep.mubr.bf16.mxu0 %v1602_v57  ;;  %2224 = vmatprep.mubr.bf16.mxu1 %v1602_v57 }
 0x451   :  { %2112 = vmatmul.mubr.bf16.gmra.mrb[60].mxu0 %v1601_v26  ;;  %2225 = vmatmul.mubr.bf16.gmra.mrb[76].mxu1 %v1601_v26 }
 0x452   :  { %2877 = vmatprep.mubr.bf16.mxu0 %v4175_v9  ;;  %2918 = vmatprep.mubr.bf16.mxu1 %v4175_v9 }
 0x4e3   :  { %v2043_v9 = vpop.f32.mrb[32].mxu0  ;;  %v2156_v14 = vpop.f32.mrb[48].mxu1 }
 0x4e4   :  { %v5348_v18 = vadd.f32 %v2043_v9, %v5337_v34  ;;  %v5351_v53 = vadd.f32 %v2156_v14, %v5339_v42  ;;  %v2045_v13 = vpop.f32.mrb[33].mxu0  ;;  %v2158_v4 = vpop.f32.mrb[49].mxu1 }
 0x4e5   :  { %v5354_v17 = vadd.f32 %v2045_v13, %v5343_v11  ;;  %v5357_v47 = vadd.f32 %v2158_v4, %v5345_v8  ;;  %v2047_v27 = vpop.f32.mrb[34].mxu0  ;;  %v2160_v38 = vpop.f32.mrb[50].mxu1 }
 0x4e6   :  { %v2235_v15 = vmul.f32 %v5348_v18, %v5348_v18  ;;  %v2237_v32 = vmul.f32 %v5351_v53, %v5351_v53  ;;  %v5364_v44 = vadd.f32 %v2047_v27, %v5337_v34  ;;  %v5367_v35 = vadd.f32 %v2160_v38, %v5339_v42  ;;  %v2049_v0 = vpop.f32.mrb[35].mxu0  ;;  %v2162_v30 = vpop.f32.mrb[51].mxu1 }
 0x4e7   :  { %v2236_v23 = vmul.f32 %v5354_v17, %v5354_v17  ;;  %v2238_v29 = vmul.f32 %v5357_v47, %v5357_v47  ;;  %v5374_v40 = vadd.f32 %v2049_v0, %v5343_v11  ;;  %v5377_v48 = vadd.f32 %v2162_v30, %v5345_v8 }
 0x4e8   :  { %v2299_v25 = vmul.f32 %v2235_v15, %v5348_v18  ;;  %v2301_v2 = vmul.f32 %v2237_v32, %v5351_v53  ;;  %v2239_v61 = vmul.f32 %v5364_v44, %v5364_v44  ;;  %v2241_v28 = vmul.f32 %v5367_v35, %v5367_v35 }
 0x4e9   :  { %v2300_v58 = vmul.f32 %v2236_v23, %v5354_v17  ;;  %v2302_v1 = vmul.f32 %v2238_v29, %v5357_v47  ;;  %v2240_v59 = vmul.f32 %v5374_v40, %v5374_v40  ;;  %v2242_v36 = vmul.f32 %v5377_v48, %v5377_v48 }
 0x4ea   :  { %v2363_v31 = vmul.f32 0.044715, %v2299_v25  ;;  %v2365_v50 = vmul.f32 0.044715, %v2301_v2  ;;  %v2303_v45 = vmul.f32 %v2239_v61, %v5364_v44  ;;  %v2305_v24 = vmul.f32 %v2241_v28, %v5367_v35 }
 0x4eb   :  { %v2364_v39 = vmul.f32 0.044715, %v2300_v58  ;;  %v2366_v63 = vmul.f32 0.044715, %v2302_v1  ;;  %v2304_v52 = vmul.f32 %v2240_v59, %v5374_v40  ;;  %v2306_v5 = vmul.f32 %v2242_v36, %v5377_v48 }
 0x4ec   :  { %v2427_v6 = vadd.f32 %v2363_v31, %v5348_v18  ;;  %v2429_v51 = vadd.f32 %v2365_v50, %v5351_v53  ;;  %v2367_v33 = vmul.f32 0.044715, %v2303_v45  ;;  %v2369_v60 = vmul.f32 0.044715, %v2305_v24 }
 0x4ed   :  { %v2428_v22 = vadd.f32 %v2364_v39, %v5354_v17  ;;  %v2430_v62 = vadd.f32 %v2366_v63, %v5357_v47  ;;  %v2368_v12 = vmul.f32 0.044715, %v2304_v52  ;;  %v2370_v20 = vmul.f32 0.044715, %v2306_v5 }
 0x4ee   :  { %v2491_v19 = vmul.f32 0.7978846, %v2427_v6  ;;  %v2493_v56 = vmul.f32 0.7978846, %v2429_v51  ;;  %v2431_v49 = vadd.f32 %v2367_v33, %v5364_v44  ;;  %v2433_v55 = vadd.f32 %v2369_v60, %v5367_v35 }
 0x4ef   :  { %v2492_v10 = vmul.f32 0.7978846, %v2428_v22  ;;  %v2494_v41 = vmul.f32 0.7978846, %v2430_v62  ;;  %v2432_v7 = vadd.f32 %v2368_v12, %v5374_v40  ;;  %v2434_v37 = vadd.f32 %v2370_v20, %v5377_v48 }
 0x4f0   :  { %4023 = vtanh.f32 %v2491_v19  ;;  %v2495_v54 = vmul.f32 0.7978846, %v2431_v49  ;;  %v2497_v43 = vmul.f32 0.7978846, %v2433_v55  ;;  %v2053_v26 = vpop.f32.mrb[36].mxu0  ;;  %v2166_v57 = vpop.f32.mrb[52].mxu1 }
 0x4f1   :  { %4025 = vtanh.f32 %v2493_v56  ;;  %v2496_v21 = vmul.f32 0.7978846, %v2432_v7  ;;  %v2498_v16 = vmul.f32 0.7978846, %v2434_v37  ;;  %v5404_v46 = vadd.f32 %v2053_v26, %v5337_v34  ;;  %v2055_v9 = vpop.f32.mrb[37].mxu0  ;;  %v2168_v14 = vpop.f32.mrb[53].mxu1 }
 0x4f2   :  { %4027 = vtanh.f32 %v2492_v10  ;;  %v5407_v13 = vadd.f32 %v2166_v57, %v5339_v42  ;;  %v5410_v4 = vadd.f32 %v2055_v9, %v5343_v11  ;;  %v5413_v27 = vadd.f32 %v2168_v14, %v5345_v8  ;;  %v2057_v38 = vpop.f32.mrb[38].mxu0  ;;  %v2170_v15 = vpop.f32.mrb[54].mxu1 }
 0x4f3   :  { %4029 = vtanh.f32 %v2494_v41  ;;  %v2243_v32 = vmul.f32 %v5404_v46, %v5404_v46  ;;  %v5418_v0 = vadd.f32 %v2057_v38, %v5337_v34  ;;  %v5421_v30 = vadd.f32 %v2170_v15, %v5339_v42  ;;  %v2059_v23 = vpop.f32.mrb[39].mxu0  ;;  %v2172_v29 = vpop.f32.mrb[55].mxu1 }
 0x4f4   :  { %6313 = vst [vmem:[#allocation7_spill] sm:$0xff] %v5410_v4  ;;  %6314 = vst [vmem:[#allocation8_spill] sm:$0xff] %v5413_v27  ;;  %4031 = vtanh.f32 %v2495_v54  ;;  %v2245_v25 = vmul.f32 %v5407_v13, %v5407_v13  ;;  %v2244_v2 = vmul.f32 %v5410_v4, %v5410_v4  ;;  %v2246_v61 = vmul.f32 %v5413_v27, %v5413_v27 }
 0x4f5   :  { %4033 = vtanh.f32 %v2497_v43  ;;  %v2307_v28 = vmul.f32 %v2243_v32, %v5404_v46  ;;  %v2247_v58 = vmul.f32 %v5418_v0, %v5418_v0  ;;  %v2249_v1 = vmul.f32 %v5421_v30, %v5421_v30 }
 0x4f6   :  { %4035 = vtanh.f32 %v2496_v21  ;;  %v2309_v59 = vmul.f32 %v2245_v25, %v5407_v13  ;;  %v2308_v36 = vmul.f32 %v2244_v2, %v5410_v4  ;;  %v2310_v31 = vmul.f32 %v2246_v61, %v5413_v27 }
 0x4f7   :  { %4037 = vtanh.f32 %v2498_v16  ;;  %v2371_v50 = vmul.f32 0.044715, %v2307_v28  ;;  %v2311_v45 = vmul.f32 %v2247_v58, %v5418_v0  ;;  %v2313_v24 = vmul.f32 %v2249_v1, %v5421_v30 }
 0x4f8   :  { %v2373_v39 = vmul.f32 0.044715, %v2309_v59  ;;  %v2372_v63 = vmul.f32 0.044715, %v2308_v36  ;;  %v2374_v52 = vmul.f32 0.044715, %v2310_v31  ;;  %v5440_v5 = vadd.f32 %v2059_v23, %v5343_v11 }
 0x4f9   :  { %v2435_v6 = vadd.f32 %v2371_v50, %v5404_v46  ;;  %v2375_v51 = vmul.f32 0.044715, %v2311_v45  ;;  %v2377_v33 = vmul.f32 0.044715, %v2313_v24  ;;  %v5444_v60 = vadd.f32 %v2172_v29, %v5345_v8 }
 0x4fa   :  { %6315 = vst [vmem:[#allocation9_spill] sm:$0xff] %v5440_v5  ;;  %v4024_v22 = vpop.eup %4023  ;;  %v2437_v62 = vadd.f32 %v2373_v39, %v5407_v13  ;;  %v2436_v12 = vadd.f32 %v2372_v63, %v5410_v4  ;;  %v2438_v20 = vadd.f32 %v2374_v52, %v5413_v27  ;;  %v2248_v19 = vmul.f32 %v5440_v5, %v5440_v5  ;;  %v2063_v56 = vpop.f32.mrb[40].mxu0 }
 0x4fb   :  { %6316 = vst [vmem:[#allocation10_spill] sm:$0xff] %v5444_v60  ;;  %v2176_v49 = vpop.f32.mrb[56].mxu1  ;;  %v4026_v55 = vpop.eup %4025  ;;  %v2619_v10 = vadd.f32 1.0, %v4024_v22  ;;  %v2499_v41 = vmul.f32 0.7978846, %v2435_v6  ;;  %v2439_v7 = vadd.f32 %v2375_v51, %v5418_v0  ;;  %v2441_v37 = vadd.f32 %v2377_v33, %v5421_v30 }
 0x4fc   :  { %v2065_v54 = vpop.f32.mrb[41].mxu0  ;;  %v2178_v43 = vpop.f32.mrb[57].mxu1  ;;  %v2621_v57 = vadd.f32 1.0, %v4026_v55  ;;  %v2501_v21 = vmul.f32 0.7978846, %v2437_v62  ;;  %v2312_v9 = vmul.f32 %v2248_v19, %v5440_v5  ;;  %v2250_v31 = vmul.f32 %v5444_v60, %v5444_v60 }
 0x4fd   :  { %v5453_v26 = vpop.eup %4027  ;;  %v2500_v16 = vmul.f32 0.7978846, %v2436_v12  ;;  %v2067_v14 = vpop.f32.mrb[42].mxu0  ;;  %v2683_v15 = vmul.f32 0.5, %v2619_v10  ;;  %4039 = vtanh.f32 %v2499_v41  ;;  %v2502_v32 = vmul.f32 0.7978846, %v2438_v20 }
 0x4fe   :  { %v5456_v38 = vpop.eup %4029  ;;  %v2503_v23 = vmul.f32 0.7978846, %v2439_v7  ;;  %v2180_v29 = vpop.f32.mrb[58].mxu1  ;;  %v2685_v2 = vmul.f32 0.5, %v2621_v57  ;;  %4041 = vtanh.f32 %v2501_v21  ;;  %v2505_v61 = vmul.f32 0.7978846, %v2441_v37 }
 0x4ff   :  { %v4032_v25 = vpop.eup %4031  ;;  %v2376_v28 = vmul.f32 0.044715, %v2312_v9  ;;  %v2069_v58 = vpop.f32.mrb[43].mxu0  ;;  %v5459_v59 = vmul.f32 %v2683_v15, %v5348_v18  ;;  %4043 = vtanh.f32 %v2500_v16  ;;  %v2314_v6 = vmul.f32 %v2250_v31, %v5444_v60 }
 0x500   :  { %v4034_v1 = vpop.eup %4033  ;;  %v2623_v36 = vadd.f32 1.0, %v4032_v25  ;;  %v5463_v50 = vpop.f32.mrb[59].mxu1  ;;  %v5468_v24 = vmul.f32 %v2685_v2, %v5351_v53  ;;  %4045 = vtanh.f32 %v2502_v32  ;;  %v5475_v51 = vadd.f32 %v2063_v56, %v5337_v34 }
 0x501   :  { %v5465_v45 = vpop.eup %4035  ;;  %v2625_v39 = vadd.f32 1.0, %v4034_v1  ;;  %v2440_v63 = vadd.f32 %v2376_v28, %v5440_v5  ;;  %4047 = vtanh.f32 %v2503_v23  ;;  %v5478_v62 = vadd.f32 %v2176_v49, %v5339_v42 }
 0x502   :  { %v5471_v52 = vpop.eup %4037  ;;  %v2687_v18 = vmul.f32 0.5, %v2623_v36  ;;  %4049 = vtanh.f32 %v2505_v61  ;;  %v2378_v12 = vmul.f32 0.044715, %v2314_v6  ;;  %v2251_v20 = vmul.f32 %v5475_v51, %v5475_v51 }
 0x503   :  { %v2689_v33 = vmul.f32 0.5, %v2625_v39  ;;  %v2504_v22 = vmul.f32 0.7978846, %v2440_v63  ;;  %v5486_v19 = vadd.f32 %v2065_v54, %v5343_v11  ;;  %v2253_v56 = vmul.f32 %v5478_v62, %v5478_v62 }
 0x504   :  { %v5481_v53 = vmul.f32 %v2687_v18, %v5364_v44  ;;  %v5494_v49 = vadd.f32 %v2178_v43, %v5345_v8  ;;  %v5496_v10 = vpop.f32.mrb[44].mxu0  ;;  %v5498_v44 = vpop.f32.mrb[60].mxu1  ;;  %v2442_v41 = vadd.f32 %v2378_v12, %v5444_v60  ;;  %v2315_v7 = vmul.f32 %v2251_v20, %v5475_v51 }
 0x505   :  { %6317 = vst [vmem:[#allocation11_spill] sm:$0xff] %v5486_v19  ;;  %v5489_v55 = vmul.f32 %v2689_v33, %v5367_v35  ;;  %4051 = vtanh.f32 %v2504_v22  ;;  %v2252_v37 = vmul.f32 %v5486_v19, %v5486_v19  ;;  %v5505_v35 = vadd.f32 %v2067_v14, %v5337_v34  ;;  %v5507_v54 = vpop.f32.mrb[45].mxu0  ;;  %v5509_v57 = vpop.f32.mrb[61].mxu1 }
 0x506   :  { %6318 = vst [vmem:[#allocation12_spill] sm:$0xff] %v5494_v49  ;;  %v2317_v43 = vmul.f32 %v2253_v56, %v5478_v62  ;;  %v2254_v21 = vmul.f32 %v5494_v49, %v5494_v49  ;;  %v5515_v16 = vadd.f32 %v2180_v29, %v5339_v42  ;;  %v5518_v9 = vadd.f32 %v2069_v58, %v5343_v11  ;;  %v5520_v15 = vpop.f32.mrb[46].mxu0  ;;  %v5522_v32 = vpop.f32.mrb[62].mxu1 }
 0x507   :  { %v4040_v14 = vpop.eup %4039  ;;  %v2506_v23 = vmul.f32 0.7978846, %v2442_v41  ;;  %v2379_v25 = vmul.f32 0.044715, %v2315_v7  ;;  %v2316_v2 = vmul.f32 %v2252_v37, %v5486_v19  ;;  %v2255_v61 = vmul.f32 %v5505_v35, %v5505_v35  ;;  %v5527_v28 = vpop.f32.mrb[47].mxu0 }
 0x508   :  { %6319 = vst [vmem:[#allocation13_spill] sm:$0xff] %v5518_v9  ;;  %v5529_v1 = vpop.f32.mrb[63].mxu1  ;;  %v4042_v29 = vpop.eup %4041  ;;  %v2627_v36 = vadd.f32 1.0, %v4040_v14  ;;  %v2381_v58 = vmul.f32 0.044715, %v2317_v43  ;;  %v2318_v31 = vmul.f32 %v2254_v21, %v5494_v49  ;;  %v2257_v39 = vmul.f32 %v5515_v16, %v5515_v16 }
 0x509   :  { %v5534_v63 = vpop.eup %4043  ;;  %v2629_v18 = vadd.f32 1.0, %v4042_v29  ;;  %4053 = vtanh.f32 %v2506_v23  ;;  %v2443_v6 = vadd.f32 %v2379_v25, %v5475_v51  ;;  %v2380_v33 = vmul.f32 0.044715, %v2316_v2 }
 0x50a   :  { %6320 = vst [vmem:[#allocation14_spill] sm:$0xff] %v5534_v63  ;;  %v5537_v22 = vpop.eup %4045  ;;  %v2691_v12 = vmul.f32 0.5, %v2627_v36  ;;  %v2445_v20 = vadd.f32 %v2381_v58, %v5478_v62  ;;  %v2382_v56 = vmul.f32 0.044715, %v2318_v31  ;;  %v2319_v41 = vmul.f32 %v2255_v61, %v5505_v35 }
 0x50b   :  { %6321 = vst [vmem:[#allocation15_spill] sm:$0xff] %v5537_v22  ;;  %v4048_v7 = vpop.eup %4047  ;;  %v2693_v37 = vmul.f32 0.5, %v2629_v18  ;;  %v2507_v43 = vmul.f32 0.7978846, %v2443_v6  ;;  %v2444_v21 = vadd.f32 %v2380_v33, %v5486_v19  ;;  %v2321_v14 = vmul.f32 %v2257_v39, %v5515_v16 }
 0x50c   :  { %v4050_v29 = vpop.eup %4049  ;;  %v5544_v23 = vmul.f32 %v2691_v12, %v5404_v46  ;;  %v2631_v25 = vadd.f32 1.0, %v4048_v7  ;;  %v2509_v2 = vmul.f32 0.7978846, %v2445_v20  ;;  %v2446_v36 = vadd.f32 %v2382_v56, %v5494_v49  ;;  %v5547_v3 = vpop.f32.mrb[48].mxu0 }
 0x50d   :  { %v5549_v58 = vpop.f32.mrb[64].mxu1  ;;  %v5552_v61 = vmul.f32 %v2693_v37, %v5407_v13  ;;  %v2633_v31 = vadd.f32 1.0, %v4050_v29  ;;  %4055 = vtanh.f32 %v2507_v43  ;;  %v2508_v18 = vmul.f32 0.7978846, %v2444_v21  ;;  %v5554_v6 = vpop.f32.mrb[49].mxu0 }
 0x50e   :  { %6322 = vst [vmem:[#allocation16_spill] sm:$0xff] %v5544_v23  ;;  %v5556_v39 = vpop.f32.mrb[65].mxu1  ;;  %v2695_v33 = vmul.f32 0.5, %v2631_v25  ;;  %4057 = vtanh.f32 %v2509_v2  ;;  %v2510_v12 = vmul.f32 0.7978846, %v2446_v36  ;;  %v5560_v56 = vpop.f32.mrb[50].mxu0  ;;  %v2256_v13 = vmul.f32 %v5518_v9, %v5518_v9 }
 0x50f   :  { %6323 = vst [vmem:[#allocation17_spill] sm:$0xff] %v5552_v61  ;;  %v5558_v46 = vpop.eup %4051  ;;  %v2383_v20 = vmul.f32 0.044715, %v2319_v41  ;;  %v2697_v7 = vmul.f32 0.5, %v2633_v31  ;;  %4059 = vtanh.f32 %v2508_v18  ;;  %v2385_v49 = vmul.f32 0.044715, %v2321_v14 }
 0x510   :  { %6324 = vst [vmem:[#allocation18_spill] sm:$0xff] %v5558_v46  ;;  %v5564_v37 = vpop.f32.mrb[66].mxu1  ;;  %v5566_v43 = vpop.f32.mrb[51].mxu0  ;;  %v5569_v21 = vmul.f32 %v2695_v33, %v5418_v0  ;;  %4061 = vtanh.f32 %v2510_v12  ;;  %v5574_v41 = vadd.f32 %v5463_v50, %v5345_v8  ;;  %v2320_v36 = vmul.f32 %v2256_v13, %v5518_v9 }
 0x511   :  { %v2447_v29 = vadd.f32 %v2383_v20, %v5505_v35  ;;  %v5576_v25 = vpop.f32.mrb[67].mxu1  ;;  %v5579_v14 = vmul.f32 %v2697_v7, %v5421_v30  ;;  %v2449_v2 = vadd.f32 %v2385_v49, %v5515_v16  ;;  %v5585_v0 = vadd.f32 %v5496_v10, %v5337_v34 }
 0x512   :  { %6325 = vst [vmem:[#allocation19_spill] sm:$0xff] %v5569_v21  ;;  %6326 = vst [vmem:[#allocation20_spill] sm:$0xff] %v5574_v41  ;;  %v2258_v18 = vmul.f32 %v5574_v41, %v5574_v41  ;;  %v5591_v50 = vadd.f32 %v5498_v44, %v5339_v42  ;;  %v5595_v30 = vadd.f32 %v5507_v54, %v5343_v11  ;;  %v2384_v12 = vmul.f32 0.044715, %v2320_v36 }
 0x513   :  { %6327 = vst [vmem:[#allocation21_spill] sm:$0xff] %v5579_v14  ;;  %v2511_v31 = vmul.f32 0.7978846, %v2447_v29  ;;  %v5597_v33 = vpop.eup %4053  ;;  %v2513_v49 = vmul.f32 0.7978846, %v2449_v2  ;;  %v2259_v10 = vmul.f32 %v5585_v0, %v5585_v0  ;;  %v5603_v20 = vadd.f32 %v5509_v57, %v5345_v8 }
 0x514   :  { %6328 = vst [vmem:[#allocation22_spill] sm:$0xff] %v5595_v30  ;;  %6329 = vst [vmem:[#allocation23_spill] sm:$0xff] %v5597_v33  ;;  %v2322_v7 = vmul.f32 %v2258_v18, %v5574_v41  ;;  %v2261_v44 = vmul.f32 %v5591_v50, %v5591_v50  ;;  %v2260_v54 = vmul.f32 %v5595_v30, %v5595_v30  ;;  %v5610_v13 = vpop.f32.mrb[52].mxu0  ;;  %v5612_v29 = vpop.f32.mrb[68].mxu1 }
 0x515   :  { %6330 = vst [vmem:[#allocation24_spill] sm:$0xff] %v5603_v20  ;;  %4063 = vtanh.f32 %v2511_v31  ;;  %v2448_v2 = vadd.f32 %v2384_v12, %v5518_v9  ;;  %v2323_v36 = vmul.f32 %v2259_v10, %v5585_v0  ;;  %v2262_v57 = vmul.f32 %v5603_v20, %v5603_v20  ;;  %v5618_v31 = vpop.f32.mrb[53].mxu0  ;;  %v5620_v18 = vpop.f32.mrb[69].mxu1 }
 0x516   :  { %4065 = vtanh.f32 %v2513_v49  ;;  %v2386_v19 = vmul.f32 0.044715, %v2322_v7  ;;  %v2325_v14 = vmul.f32 %v2261_v44, %v5591_v50  ;;  %v2324_v61 = vmul.f32 %v2260_v54, %v5595_v30  ;;  %v5628_v49 = vpop.f32.mrb[54].mxu0  ;;  %v5630_v12 = vpop.f32.mrb[70].mxu1 }
 0x517   :  { %v5626_v60 = vadd.f32 %v5520_v15, %v5337_v34  ;;  %6331 = vst [vmem:[#allocation25_spill] sm:$0xff] %v5630_v12  ;;  %v4056_v10 = vpop.eup %4055  ;;  %v2512_v9 = vmul.f32 0.7978846, %v2448_v2  ;;  %v2387_v21 = vmul.f32 0.044715, %v2323_v36  ;;  %v2326_v23 = vmul.f32 %v2262_v57, %v5603_v20  ;;  %v5637_v44 = vpop.f32.mrb[55].mxu0 }
 0x518   :  { %v5635_v7 = vadd.f32 %v5522_v32, %v5339_v42  ;;  %6332 = vst [vmem:[#allocation26_spill] sm:$0xff] %v5637_v44  ;;  %v5639_v54 = vpop.f32.mrb[71].mxu1  ;;  %v4058_v27 = vpop.eup %4057  ;;  %v2635_v15 = vadd.f32 1.0, %v4056_v10  ;;  %v2450_v5 = vadd.f32 %v2386_v19, %v5574_v41  ;;  %v2389_v4 = vmul.f32 0.044715, %v2325_v14 }
 0x519   :  { %6333 = vst [vmem:[#allocation27_spill] sm:$0xff] %v5639_v54  ;;  %v2388_v33 = vmul.f32 0.044715, %v2324_v61  ;;  %v5642_v22 = vpop.eup %4059  ;;  %v2637_v2 = vadd.f32 1.0, %v4058_v27  ;;  %4067 = vtanh.f32 %v2512_v9  ;;  %v2451_v36 = vadd.f32 %v2387_v21, %v5585_v0 }
 0x51a   :  { %v2390_v57 = vmul.f32 0.044715, %v2326_v23  ;;  %v5645_v46 = vpop.eup %4061  ;;  %v2699_v32 = vmul.f32 0.5, %v2635_v15  ;;  %v2514_v63 = vmul.f32 0.7978846, %v2450_v5  ;;  %v2453_v44 = vadd.f32 %v2389_v4, %v5591_v50 }
 0x51b   :  { %6334 = vst [vmem:[#allocation28_spill] sm:$0xff] %v5645_v46  ;;  %v2452_v54 = vadd.f32 %v2388_v33, %v5595_v30  ;;  %v2701_v10 = vmul.f32 0.5, %v2637_v2  ;;  %v2515_v12 = vmul.f32 0.7978846, %v2451_v36  ;;  %v2263_v61 = vmul.f32 %v5626_v60, %v5626_v60 }
 0x51c   :  { %v2454_v19 = vadd.f32 %v2390_v57, %v5603_v20  ;;  %v5653_v27 = vmul.f32 %v2699_v32, %v5475_v51  ;;  %4069 = vtanh.f32 %v2514_v63  ;;  %v2517_v9 = vmul.f32 0.7978846, %v2453_v44  ;;  %v5655_v21 = vpop.f32.mrb[56].mxu0  ;;  %v5657_v5 = vpop.f32.mrb[72].mxu1 }
 0x51d   :  { %v2516_v23 = vmul.f32 0.7978846, %v2452_v54  ;;  %v5660_v4 = vmul.f32 %v2701_v10, %v5478_v62  ;;  %4071 = vtanh.f32 %v2515_v12  ;;  %v2327_v33 = vmul.f32 %v2263_v61, %v5626_v60  ;;  %v5663_v15 = vpop.f32.mrb[57].mxu0  ;;  %v5665_v2 = vpop.f32.mrb[73].mxu1 }
 0x51e   :  { %6335 = vst [vmem:[#allocation29_spill] sm:$0xff] %v5653_v27  ;;  %v2518_v14 = vmul.f32 0.7978846, %v2454_v19  ;;  %4073 = vtanh.f32 %v2517_v9  ;;  %v2265_v63 = vmul.f32 %v5635_v7, %v5635_v7  ;;  %v5671_v44 = vadd.f32 %v5527_v28, %v5343_v11  ;;  %v5677_v12 = vpop.f32.mrb[58].mxu0  ;;  %v5679_v54 = vpop.f32.mrb[74].mxu1 }
 0x51f   :  { %6336 = vst [vmem:[#allocation30_spill] sm:$0xff] %v5660_v4  ;;  %v4064_v51 = vpop.eup %4063  ;;  %v5675_v62 = vadd.f32 %v5529_v1, %v5345_v8  ;;  %4075 = vtanh.f32 %v2516_v23  ;;  %v2391_v32 = vmul.f32 0.044715, %v2327_v33  ;;  %v5683_v10 = vadd.f32 %v5547_v3, %v5337_v34  ;;  %v5685_v19 = vpop.f32.mrb[59].mxu0 }
 0x520   :  { %6337 = vst [vmem:[#allocation31_spill] sm:$0xff] %v5671_v44  ;;  %v4066_v36 = vpop.eup %4065  ;;  %v2639_v57 = vadd.f32 1.0, %v4064_v51  ;;  %v5687_v28 = vpop.f32.mrb[75].mxu1  ;;  %4077 = vtanh.f32 %v2518_v14  ;;  %v2329_v1 = vmul.f32 %v2265_v63, %v5635_v7  ;;  %v2264_v9 = vmul.f32 %v5671_v44, %v5671_v44 }
 0x521   :  { %6338 = vst [vmem:[#allocation32_spill] sm:$0xff] %v5675_v62  ;;  %v2641_v61 = vadd.f32 1.0, %v4066_v36  ;;  %v2455_v51 = vadd.f32 %v2391_v32, %v5626_v60  ;;  %v2266_v23 = vmul.f32 %v5675_v62, %v5675_v62  ;;  %v2267_v3 = vmul.f32 %v5683_v10, %v5683_v10 }
 0x522   :  { %v2703_v20 = vmul.f32 0.5, %v2639_v57  ;;  %v2393_v30 = vmul.f32 0.044715, %v2329_v1  ;;  %v2328_v41 = vmul.f32 %v2264_v9, %v5671_v44  ;;  %v5700_v14 = vadd.f32 %v5549_v58, %v5339_v42 }
 0x523   :  { %v2705_v33 = vmul.f32 0.5, %v2641_v61  ;;  %v5702_v63 = vpop.eup %4067  ;;  %v2519_v57 = vmul.f32 0.7978846, %v2455_v51  ;;  %v2330_v32 = vmul.f32 %v2266_v23, %v5675_v62  ;;  %v2331_v4 = vmul.f32 %v2267_v3, %v5683_v10 }
 0x524   :  { %v5705_v36 = vmul.f32 %v2703_v20, %v5505_v35  ;;  %v2457_v61 = vadd.f32 %v2393_v30, %v5635_v7  ;;  %v2392_v1 = vmul.f32 0.044715, %v2328_v41  ;;  %v2269_v58 = vmul.f32 %v5700_v14, %v5700_v14  ;;  %v5715_v9 = vpop.f32.mrb[60].mxu0  ;;  %v5717_v46 = vpop.f32.mrb[76].mxu1 }
 0x525   :  { %v5710_v27 = vmul.f32 %v2705_v33, %v5515_v16  ;;  %6341 = vst [vmem:[#allocation35_spill] sm:$0xff] %v5715_v9  ;;  %6342 = vst [vmem:[#allocation36_spill] sm:$0xff] %v5717_v46  ;;  %4079 = vtanh.f32 %v2519_v57  ;;  %v2394_v35 = vmul.f32 0.044715, %v2330_v32  ;;  %v2395_v20 = vmul.f32 0.044715, %v2331_v4 }
 0x526   :  { %6339 = vst [vmem:[#allocation33_spill] sm:$0xff] %v5705_v36  ;;  %v5721_v51 = vadd.f32 %v5554_v6, %v5343_v11  ;;  %v5723_v23 = vpop.f32.mrb[61].mxu0  ;;  %v5725_v16 = vpop.f32.mrb[77].mxu1  ;;  %v2521_v41 = vmul.f32 0.7978846, %v2457_v61  ;;  %v2456_v3 = vadd.f32 %v2392_v1, %v5671_v44  ;;  %v2333_v33 = vmul.f32 %v2269_v58, %v5700_v14 }
 0x527   :  { %6340 = vst [vmem:[#allocation34_spill] sm:$0xff] %v5710_v27  ;;  %6344 = vst [vmem:[#allocation38_spill] sm:$0xff] %v5723_v23  ;;  %v5727_v30 = vpop.eup %4069  ;;  %v5733_v57 = vadd.f32 %v5556_v39, %v5345_v8  ;;  %v5735_v4 = vpop.f32.mrb[62].mxu0  ;;  %v2458_v23 = vadd.f32 %v2394_v35, %v5675_v62  ;;  %v5745_v1 = vadd.f32 %v5560_v56, %v5337_v34 }
 0x528   :  { %6343 = vst [vmem:[#allocation37_spill] sm:$0xff] %v5721_v51  ;;  %6345 = vst [vmem:[#allocation39_spill] sm:$0xff] %v5725_v16  ;;  %v5737_v32 = vpop.f32.mrb[78].mxu1  ;;  %v4072_v6 = vpop.eup %4071  ;;  %v2459_v16 = vadd.f32 %v2395_v20, %v5683_v10  ;;  %v2268_v61 = vmul.f32 %v5721_v51, %v5721_v51  ;;  %4081 = vtanh.f32 %v2521_v41  ;;  %v2397_v46 = vmul.f32 0.044715, %v2333_v33 }
 0x529   :  { %6346 = vst [vmem:[#allocation40_spill] sm:$0xff] %v5733_v57  ;;  %6347 = vst [vmem:[#allocation41_spill] sm:$0xff] %v5735_v4  ;;  %v5747_v58 = vpop.f32.mrb[63].mxu0  ;;  %v5749_v39 = vpop.f32.mrb[79].mxu1  ;;  %v2643_v4 = vadd.f32 1.0, %v4072_v6 }
 0x52a   :  { %6348 = vst [vmem:[#allocation42_spill] sm:$0xff] %v5737_v32  ;;  %6349 = vst [vmem:[#allocation43_spill] sm:$0xff] %v5747_v58  ;;  %v4074_v44 = vpop.eup %4073  ;;  %v2520_v32 = vmul.f32 0.7978846, %v2456_v3  ;;  %v2522_v20 = vmul.f32 0.7978846, %v2458_v23  ;;  %v2332_v27 = vmul.f32 %v2268_v61, %v5721_v51  ;;  %v2461_v58 = vadd.f32 %v2397_v46, %v5700_v14 }
 0x52b   :  { %6350 = vst [vmem:[#allocation44_spill] sm:$0xff] %v5749_v39  ;;  %v5751_v9 = vpop.eup %4075  ;;  %v2645_v35 = vadd.f32 1.0, %v4074_v44  ;;  %v2523_v62 = vmul.f32 0.7978846, %v2459_v16  ;;  %v2707_v56 = vmul.f32 0.5, %v2643_v4  ;;  %v2270_v39 = vmul.f32 %v5733_v57, %v5733_v57 }
 0x52c   :  { %v5754_v36 = vpop.eup %4077  ;;  %4083 = vtanh.f32 %v2520_v32  ;;  %v2396_v41 = vmul.f32 0.044715, %v2332_v27  ;;  %v2271_v3 = vmul.f32 %v5745_v1, %v5745_v1  ;;  %v2525_v23 = vmul.f32 0.7978846, %v2461_v58 }
 0x52d   :  { %v2709_v6 = vmul.f32 0.5, %v2645_v35  ;;  %4085 = vtanh.f32 %v2522_v20  ;;  %v5762_v44 = vmul.f32 %v2707_v56, %v5585_v0  ;;  %v2334_v16 = vmul.f32 %v2270_v39, %v5733_v57 }
 0x52e   :  { %4087 = vtanh.f32 %v2523_v62  ;;  %v2460_v46 = vadd.f32 %v2396_v41, %v5721_v51  ;;  %v2335_v4 = vmul.f32 %v2271_v3, %v5745_v1  ;;  %v5772_v27 = vadd.f32 %v5564_v37, %v5339_v42 }
 0x52f   :  { %v5766_v33 = vmul.f32 %v2709_v6, %v5591_v50  ;;  %4089 = vtanh.f32 %v2525_v23  ;;  %v2398_v32 = vmul.f32 0.044715, %v2334_v16  ;;  %v5776_v0 = vadd.f32 %v5566_v43, %v5343_v11  ;;  %v4080_v50 = vpop.eup %4079 }
 0x530   :  { %v5780_v62 = vadd.f32 %v5576_v25, %v5345_v8  ;;  %v2524_v61 = vmul.f32 0.7978846, %v2460_v46  ;;  %v2399_v58 = vmul.f32 0.044715, %v2335_v4  ;;  %v2273_v39 = vmul.f32 %v5772_v27, %v5772_v27 }
 0x531   :  { %6351 = vst [vmem:[#allocation45_spill] sm:$0xff] %v5776_v0  ;;  %v2620_v35 = vadd.f32 1.0, %v5453_v26  ;;  %v2647_v37 = vadd.f32 1.0, %v4080_v50  ;;  %v2462_v20 = vadd.f32 %v2398_v32, %v5733_v57  ;;  %v2272_v56 = vmul.f32 %v5776_v0, %v5776_v0 }
 0x532   :  { %v2274_v43 = vmul.f32 %v5780_v62, %v5780_v62  ;;  %4091 = vtanh.f32 %v2524_v61  ;;  %v2463_v25 = vadd.f32 %v2399_v58, %v5745_v1  ;;  %v2337_v6 = vmul.f32 %v2273_v39, %v5772_v27  ;;  %v4082_v3 = vpop.eup %4081 }
 0x533   :  { %v2624_v41 = vadd.f32 1.0, %v5465_v45  ;;  %v2711_v23 = vmul.f32 0.5, %v2647_v37  ;;  %v2526_v16 = vmul.f32 0.7978846, %v2462_v20  ;;  %v2336_v26 = vmul.f32 %v2272_v56, %v5776_v0 }
 0x534   :  { %v2338_v46 = vmul.f32 %v2274_v43, %v5780_v62  ;;  %v2649_v4 = vadd.f32 1.0, %v4082_v3  ;;  %v2527_v32 = vmul.f32 0.7978846, %v2463_v25  ;;  %v2401_v50 = vmul.f32 0.044715, %v2337_v6 }
 0x535   :  { %v2684_v57 = vmul.f32 0.5, %v2620_v35  ;;  %v5798_v61 = vmul.f32 %v2711_v23, %v5626_v60  ;;  %4093 = vtanh.f32 %v2526_v16  ;;  %v2400_v58 = vmul.f32 0.044715, %v2336_v26 }
 0x536   :  { %v5795_v51 = vpop.eup %4083  ;;  %v2402_v39 = vmul.f32 0.044715, %v2338_v46  ;;  %v2713_v37 = vmul.f32 0.5, %v2649_v4  ;;  %4095 = vtanh.f32 %v2527_v32  ;;  %v2465_v20 = vadd.f32 %v2401_v50, %v5772_v27 }
 0x537   :  { %v5800_v45 = vpop.eup %4085  ;;  %v2688_v56 = vmul.f32 0.5, %v2624_v41  ;;  %v2464_v25 = vadd.f32 %v2400_v58, %v5776_v0  ;;  %v2748_v6 = vmul.f32 %v2684_v57, %v5354_v17  ;;  %v2622_v60 = vadd.f32 1.0, %v5456_v38 }
 0x538   :  { %v4088_v43 = vpop.eup %4087  ;;  %v2466_v35 = vadd.f32 %v2402_v39, %v5780_v62  ;;  %v5808_v3 = vmul.f32 %v2713_v37, %v5635_v7  ;;  %v2529_v16 = vmul.f32 0.7978846, %v2465_v20  ;;  %v2626_v41 = vadd.f32 1.0, %v5471_v52 }
 0x539   :  { %v2651_v23 = vadd.f32 1.0, %v4088_v43  ;;  %v2752_v26 = vmul.f32 %v2688_v56, %v5374_v40  ;;  %v4090_v46 = vpop.eup %4089  ;;  %v2528_v4 = vmul.f32 0.7978846, %v2464_v25  ;;  %v2686_v50 = vmul.f32 0.5, %v2622_v60 }
 0x53a   :  { %v2530_v32 = vmul.f32 0.7978846, %v2466_v35  ;;  %v2653_v0 = vadd.f32 1.0, %v4090_v46  ;;  %4097 = vtanh.f32 %v2529_v16  ;;  %v2690_v17 = vmul.f32 0.5, %v2626_v41  ;;  %v6354_v35 = vld [vmem:[#allocation26_spill] sm:$0xff] }
 0x53b   :  { %v2715_v58 = vmul.f32 0.5, %v2651_v23  ;;  %v2812_v39 = vpack.c.bf16 %v2752_v26, %v2748_v6  ;;  %4099 = vtanh.f32 %v2528_v4  ;;  %v2750_v38 = vmul.f32 %v2686_v50, %v5357_v47 }
 0x53c   :  { %v2811_v7 = vpack.c.bf16 %v5481_v53, %v5459_v59  ;;  %v5815_v57 = vpop.eup %4091  ;;  %v2717_v37 = vmul.f32 0.5, %v2653_v0  ;;  %4101 = vtanh.f32 %v2530_v32  ;;  %v2813_v52 = vpack.c.bf16 %v5489_v55, %v5468_v24  ;;  %v6353_v55 = vld [vmem:[#allocation25_spill] sm:$0xff] }
 0x53d   :  { %v5818_v40 = vmul.f32 %v2715_v58, %v5683_v10  ;;  %2845 = vmatprep.subr.bf16.mxu0 %v2812_v39  ;;  %v2754_v20 = vmul.f32 %v2690_v17, %v5377_v48  ;;  %v5825_v47 = vadd.f32 %v5610_v13, %v5337_v34  ;;  %v5829_v59 = vadd.f32 %v5612_v29, %v5339_v42  ;;  %v6355_v17 = vld [vmem:[#allocation27_spill] sm:$0xff] }
 0x53e   :  { %2846 = vmatpush1.bf16.msra.mxu0 %v2811_v7  ;;  %v5833_v53 = vadd.f32 %v5618_v31, %v5343_v11  ;;  %v5836_v10 = vmul.f32 %v2717_v37, %v5700_v14  ;;  %v5840_v24 = vadd.f32 %v5620_v18, %v5345_v8  ;;  %v5844_v48 = vadd.f32 %v5628_v49, %v5337_v34 }
 0x53f   :  { %v5848_v13 = vadd.f32 %v6353_v55, %v5339_v42  ;;  %v5850_v29 = vpop.eup %4093  ;;  %v2814_v0 = vpack.c.bf16 %v2754_v20, %v2750_v38  ;;  %v2275_v31 = vmul.f32 %v5825_v47, %v5825_v47  ;;  %v2277_v14 = vmul.f32 %v5829_v59, %v5829_v59 }
 0x540   :  { %6352 = vst [vmem:[#allocation46_spill] sm:$0xff] %v5840_v24  ;;  %v2276_v18 = vmul.f32 %v5833_v53, %v5833_v53  ;;  %v4096_v56 = vpop.eup %4095  ;;  %v2278_v49 = vmul.f32 %v5840_v24, %v5840_v24  ;;  %v2279_v43 = vmul.f32 %v5844_v48, %v5844_v48  ;;  %v5866_v6 = vadd.f32 %v6354_v35, %v5343_v11 }
 0x541   :  { %v2281_v25 = vmul.f32 %v5848_v13, %v5848_v13  ;;  %v2655_v60 = vadd.f32 1.0, %v4096_v56  ;;  %2886 = vmatprep.subr.bf16.mxu1 %v2814_v0  ;;  %v2339_v23 = vmul.f32 %v2275_v31, %v5825_v47  ;;  %v2341_v16 = vmul.f32 %v2277_v14, %v5829_v59 }
 0x542   :  { %v2340_v26 = vmul.f32 %v2276_v18, %v5833_v53  ;;  %2887 = vmatpush1.bf16.msra.mxu1 %v2813_v52  ;;  %v2342_v46 = vmul.f32 %v2278_v49, %v5840_v24  ;;  %v2343_v4 = vmul.f32 %v2279_v43, %v5844_v48  ;;  %v2280_v41 = vmul.f32 %v5866_v6, %v5866_v6 }
 0x543   :  { %v2345_v32 = vmul.f32 %v2281_v25, %v5848_v13  ;;  %v2719_v50 = vmul.f32 0.5, %v2655_v60  ;;  %v2403_v58 = vmul.f32 0.044715, %v2339_v23  ;;  %v2405_v39 = vmul.f32 0.044715, %v2341_v16 }
 0x544   :  { %v5878_v38 = vadd.f32 %v6355_v17, %v5345_v8  ;;  %v4098_v7 = vpop.eup %4097  ;;  %v2404_v37 = vmul.f32 0.044715, %v2340_v26  ;;  %v2406_v20 = vmul.f32 0.044715, %v2342_v46  ;;  %v2407_v52 = vmul.f32 0.044715, %v2343_v4 }
 0x545   :  { %v2344_v55 = vmul.f32 %v2280_v41, %v5866_v6  ;;  %v5881_v0 = vpop.eup %4099  ;;  %v5884_v31 = vmul.f32 %v2719_v50, %v5745_v1  ;;  %v2657_v14 = vadd.f32 1.0, %v4098_v7  ;;  %v2467_v18 = vadd.f32 %v2403_v58, %v5825_v47  ;;  %v6357_v7 = vld [vmem:[#allocation14_spill] sm:$0xff] }
 0x546   :  { %6356 = vst [vmem:[#allocation25_spill] sm:$0xff] %v5878_v38  ;;  %v2469_v56 = vadd.f32 %v2405_v39, %v5829_v59  ;;  %v5888_v49 = vpop.eup %4101  ;;  %v2468_v43 = vadd.f32 %v2404_v37, %v5833_v53  ;;  %v2470_v25 = vadd.f32 %v2406_v20, %v5840_v24  ;;  %v2471_v35 = vadd.f32 %v2407_v52, %v5844_v48  ;;  %v6358_v20 = vld [vmem:[#allocation18_spill] sm:$0xff]  ;;  %v6368_v24 = vld [vmem:[#allocation21_spill] sm:$0xff] }
 0x547   :  { %v2409_v60 = vmul.f32 0.044715, %v2345_v32  ;;  %v2721_v23 = vmul.f32 0.5, %v2657_v14  ;;  %v2531_v16 = vmul.f32 0.7978846, %v2467_v18  ;;  %v2282_v1 = vmul.f32 %v5878_v38, %v5878_v38 }
 0x548   :  { %v2533_v26 = vmul.f32 0.7978846, %v2469_v56  ;;  %v2532_v46 = vmul.f32 0.7978846, %v2468_v43  ;;  %v2534_v4 = vmul.f32 0.7978846, %v2470_v25 }
 0x549   :  { %v2535_v41 = vmul.f32 0.7978846, %v2471_v35  ;;  %v2473_v50 = vadd.f32 %v2409_v60, %v5848_v13  ;;  %v5897_v58 = vmul.f32 %v2721_v23, %v5772_v27  ;;  %4103 = vtanh.f32 %v2531_v16  ;;  %v6359_v56 = vld [vmem:[#allocation15_spill] sm:$0xff] }
 0x54a   :  { %v2408_v39 = vmul.f32 0.044715, %v2344_v55  ;;  %v2346_v17 = vmul.f32 %v2282_v1, %v5878_v38  ;;  %4105 = vtanh.f32 %v2533_v26  ;;  %v2628_v37 = vadd.f32 1.0, %v6357_v7  ;;  %v6360_v35 = vld [vmem:[#allocation23_spill] sm:$0xff] }
 0x54b   :  { %v2537_v32 = vmul.f32 0.7978846, %v2473_v50  ;;  %v2632_v52 = vadd.f32 1.0, %v6358_v20  ;;  %4107 = vtanh.f32 %v2532_v46  ;;  %v2630_v43 = vadd.f32 1.0, %v6359_v56  ;;  %v6361_v26 = vld [vmem:[#allocation7_spill] sm:$0xff]  ;;  %v6362_v50 = vld [vmem:[#allocation9_spill] sm:$0xff] }
 0x54c   :  { %v2472_v14 = vadd.f32 %v2408_v39, %v5866_v6  ;;  %v2410_v18 = vmul.f32 0.044715, %v2346_v17  ;;  %4109 = vtanh.f32 %v2534_v4  ;;  %v2692_v25 = vmul.f32 0.5, %v2628_v37  ;;  %v6363_v17 = vld [vmem:[#allocation8_spill] sm:$0xff]  ;;  %v6365_v37 = vld [vmem:[#allocation19_spill] sm:$0xff] }
 0x54d   :  { %v2696_v27 = vmul.f32 0.5, %v2632_v52  ;;  %v2634_v60 = vadd.f32 1.0, %v6360_v35  ;;  %4111 = vtanh.f32 %v2535_v41  ;;  %v2694_v16 = vmul.f32 0.5, %v2630_v43  ;;  %v6364_v4 = vld [vmem:[#allocation16_spill] sm:$0xff]  ;;  %v6366_v35 = vld [vmem:[#allocation10_spill] sm:$0xff] }
 0x54e   :  { %v2536_v55 = vmul.f32 0.7978846, %v2472_v14  ;;  %v2474_v23 = vadd.f32 %v2410_v18, %v5878_v38  ;;  %4113 = vtanh.f32 %v2537_v32  ;;  %v2756_v1 = vmul.f32 %v2692_v25, %v6361_v26  ;;  %v6367_v14 = vld [vmem:[#allocation17_spill] sm:$0xff] }
 0x54f   :  { %v2760_v46 = vmul.f32 %v2696_v27, %v6362_v50  ;;  %v2698_v7 = vmul.f32 0.5, %v2634_v60  ;;  %v2758_v20 = vmul.f32 %v2694_v16, %v6363_v17  ;;  %v2815_v52 = vpack.c.bf16 %v6365_v37, %v6364_v4 }
 0x550   :  { %4115 = vtanh.f32 %v2536_v55  ;;  %v2538_v39 = vmul.f32 0.7978846, %v2474_v23  ;;  %v2817_v18 = vpack.c.bf16 %v6368_v24, %v6367_v14  ;;  %v5916_v32 = vadd.f32 %v5655_v21, %v5337_v34 }
 0x551   :  { %v2816_v56 = vpack.c.bf16 %v2760_v46, %v2756_v1  ;;  %v2762_v41 = vmul.f32 %v2698_v7, %v6366_v35  ;;  %v5920_v43 = vadd.f32 %v5657_v5, %v5339_v42  ;;  %v5924_v25 = vadd.f32 %v5663_v15, %v5343_v11 }
 0x552   :  { %4117 = vtanh.f32 %v2538_v39  ;;  %v5928_v27 = vadd.f32 %v5665_v2, %v5345_v8  ;;  %v2283_v24 = vmul.f32 %v5916_v32, %v5916_v32  ;;  %v5934_v21 = vadd.f32 %v5677_v12, %v5337_v34 }
 0x553   :  { %2847 = vmatprep.subr.bf16.mxu0 %v2816_v56  ;;  %v2818_v60 = vpack.c.bf16 %v2762_v41, %v2758_v20  ;;  %v5938_v5 = vadd.f32 %v5679_v54, %v5339_v42  ;;  %v4104_v55 = vpop.eup %4103  ;;  %v2285_v15 = vmul.f32 %v5920_v43, %v5920_v43  ;;  %v2284_v2 = vmul.f32 %v5924_v25, %v5924_v25 }
 0x554   :  { %6369 = vst [vmem:[#allocation26_spill] sm:$0xff] %v5928_v27  ;;  %2848 = vmatpush1.bf16.msra.mxu0 %v2815_v52  ;;  %v2286_v23 = vmul.f32 %v5928_v27, %v5928_v27  ;;  %v5948_v16 = vadd.f32 %v5685_v19, %v5343_v11  ;;  %v4106_v12 = vpop.eup %4105  ;;  %v2659_v26 = vadd.f32 1.0, %v4104_v55  ;;  %v2347_v54 = vmul.f32 %v2283_v24, %v5916_v32 }
 0x555   :  { %2888 = vmatprep.subr.bf16.mxu1 %v2818_v60  ;;  %v2287_v1 = vmul.f32 %v5934_v21, %v5934_v21  ;;  %v2289_v50 = vmul.f32 %v5938_v5, %v5938_v5  ;;  %v5955_v46 = vpop.eup %4107  ;;  %v2661_v7 = vadd.f32 1.0, %v4106_v12  ;;  %v2349_v39 = vmul.f32 %v2285_v15, %v5920_v43 }
 0x556   :  { %2889 = vmatpush1.bf16.msra.mxu1 %v2817_v18  ;;  %v2348_v19 = vmul.f32 %v2284_v2, %v5924_v25  ;;  %v2350_v17 = vmul.f32 %v2286_v23, %v5928_v27  ;;  %v5960_v20 = vpop.eup %4109  ;;  %v2723_v4 = vmul.f32 0.5, %v2659_v26  ;;  %v2411_v37 = vmul.f32 0.044715, %v2347_v54 }
 0x557   :  { %v2351_v52 = vmul.f32 %v2287_v1, %v5934_v21  ;;  %v2353_v56 = vmul.f32 %v2289_v50, %v5938_v5  ;;  %v4112_v35 = vpop.eup %4111  ;;  %v2725_v41 = vmul.f32 0.5, %v2661_v7  ;;  %v2413_v14 = vmul.f32 0.044715, %v2349_v39 }
 0x558   :  { %v2412_v60 = vmul.f32 0.044715, %v2348_v19  ;;  %v2288_v18 = vmul.f32 %v5948_v16, %v5948_v16  ;;  %v4114_v24 = vpop.eup %4113  ;;  %v5967_v55 = vmul.f32 %v2723_v4, %v5825_v47  ;;  %v2663_v15 = vadd.f32 1.0, %v4112_v35 }
 0x559   :  { %v2475_v2 = vadd.f32 %v2411_v37, %v5916_v32  ;;  %v2414_v23 = vmul.f32 0.044715, %v2350_v17  ;;  %v5973_v26 = vmul.f32 %v2725_v41, %v5829_v59  ;;  %v2665_v54 = vadd.f32 1.0, %v4114_v24 }
 0x55a   :  { %v5970_v12 = vpop.eup %4115  ;;  %v2477_v1 = vadd.f32 %v2413_v14, %v5920_v43  ;;  %v2476_v50 = vadd.f32 %v2412_v60, %v5924_v25  ;;  %v2727_v7 = vmul.f32 0.5, %v2663_v15  ;;  %v2415_v47 = vmul.f32 0.044715, %v2351_v52 }
 0x55b   :  { %v2539_v39 = vmul.f32 0.7978846, %v2475_v2  ;;  %v2478_v19 = vadd.f32 %v2414_v23, %v5928_v27  ;;  %v2729_v35 = vmul.f32 0.5, %v2665_v54  ;;  %v2352_v38 = vmul.f32 %v2288_v18, %v5948_v16 }
 0x55c   :  { %v5978_v4 = vpop.eup %4117  ;;  %v2541_v37 = vmul.f32 0.7978846, %v2477_v1  ;;  %v2540_v17 = vmul.f32 0.7978846, %v2476_v50  ;;  %v5982_v59 = vmul.f32 %v2727_v7, %v5844_v48  ;;  %v2479_v14 = vadd.f32 %v2415_v47, %v5934_v21 }
 0x55d   :  { %4119 = vtanh.f32 %v2539_v39  ;;  %v2542_v41 = vmul.f32 0.7978846, %v2478_v19  ;;  %v5986_v60 = vmul.f32 %v2729_v35, %v5848_v13  ;;  %v2417_v24 = vmul.f32 0.044715, %v2353_v56  ;;  %v6371_v56 = vld [vmem:[#allocation28_spill] sm:$0xff]  ;;  %v6372_v19 = vld [vmem:[#allocation11_spill] sm:$0xff] }
 0x55e   :  { %4121 = vtanh.f32 %v2541_v37  ;;  %v2416_v52 = vmul.f32 0.044715, %v2352_v38  ;;  %v2543_v15 = vmul.f32 0.7978846, %v2479_v14  ;;  %v5990_v2 = vadd.f32 %v5687_v28, %v5345_v8  ;;  %v6373_v37 = vld [vmem:[#allocation29_spill] sm:$0xff] }
 0x55f   :  { %4123 = vtanh.f32 %v2540_v17  ;;  %v2636_v18 = vadd.f32 1.0, %v5642_v22  ;;  %v2481_v48 = vadd.f32 %v2417_v24, %v5938_v5  ;;  %v2640_v54 = vadd.f32 1.0, %v5702_v63  ;;  %v6374_v17 = vld [vmem:[#allocation33_spill] sm:$0xff] }
 0x560   :  { %6370 = vst [vmem:[#allocation27_spill] sm:$0xff] %v5990_v2  ;;  %4125 = vtanh.f32 %v2542_v41  ;;  %v2480_v23 = vadd.f32 %v2416_v52, %v5948_v16  ;;  %v2290_v13 = vmul.f32 %v5990_v2, %v5990_v2  ;;  %v2638_v1 = vadd.f32 1.0, %v6371_v56  ;;  %v6375_v41 = vld [vmem:[#allocation13_spill] sm:$0xff]  ;;  %v6376_v52 = vld [vmem:[#allocation30_spill] sm:$0xff]  ;;  %v6380_v56 = vld [vmem:[#allocation20_spill] sm:$0xff] }
 0x561   :  { %4127 = vtanh.f32 %v2543_v15  ;;  %v2700_v38 = vmul.f32 0.5, %v2636_v18  ;;  %v2545_v50 = vmul.f32 0.7978846, %v2481_v48  ;;  %v2704_v28 = vmul.f32 0.5, %v2640_v54  ;;  %v6377_v15 = vld [vmem:[#allocation34_spill] sm:$0xff] }
 0x562   :  { %v2544_v7 = vmul.f32 0.7978846, %v2480_v23  ;;  %v2642_v39 = vadd.f32 1.0, %v5727_v30  ;;  %v2354_v22 = vmul.f32 %v2290_v13, %v5990_v2  ;;  %v2702_v35 = vmul.f32 0.5, %v2638_v1  ;;  %v6378_v23 = vld [vmem:[#allocation12_spill] sm:$0xff]  ;;  %v6379_v30 = vld [vmem:[#allocation35_spill] sm:$0xff] }
 0x563   :  { %v2764_v47 = vmul.f32 %v2700_v38, %v6372_v19  ;;  %v2819_v63 = vpack.c.bf16 %v6374_v17, %v6373_v37  ;;  %4129 = vtanh.f32 %v2545_v50  ;;  %v2768_v14 = vmul.f32 %v2704_v28, %v6375_v41  ;;  %v6381_v19 = vld [vmem:[#allocation36_spill] sm:$0xff]  ;;  %v6382_v28 = vld [vmem:[#allocation38_spill] sm:$0xff] }
 0x564   :  { %v2706_v24 = vmul.f32 0.5, %v2642_v39  ;;  %v2821_v18 = vpack.c.bf16 %v6377_v15, %v6376_v52  ;;  %4131 = vtanh.f32 %v2544_v7  ;;  %v2418_v48 = vmul.f32 0.044715, %v2354_v22 }
 0x565   :  { %v2766_v54 = vmul.f32 %v2702_v35, %v6378_v23  ;;  %v6010_v13 = vadd.f32 %v6379_v30, %v5337_v34  ;;  %v2820_v38 = vpack.c.bf16 %v2768_v14, %v2764_v47  ;;  %v6015_v50 = vadd.f32 %v6381_v19, %v5339_v42  ;;  %v6383_v35 = vld [vmem:[#allocation39_spill] sm:$0xff]  ;;  %v6384_v47 = vld [vmem:[#allocation41_spill] sm:$0xff] }
 0x566   :  { %v2770_v1 = vmul.f32 %v2706_v24, %v6380_v56  ;;  %v6019_v39 = vadd.f32 %v6382_v28, %v5343_v11  ;;  %v2482_v7 = vadd.f32 %v2418_v48, %v5990_v2  ;;  %v6026_v17 = vadd.f32 %v6383_v35, %v5345_v8 }
 0x567   :  { %v4120_v37 = vpop.eup %4119  ;;  %v2291_v22 = vmul.f32 %v6010_v13, %v6010_v13  ;;  %v6030_v41 = vadd.f32 %v6384_v47, %v5337_v34  ;;  %2849 = vmatprep.subr.bf16.mxu0 %v2820_v38  ;;  %v2293_v15 = vmul.f32 %v6015_v50, %v6015_v50 }
 0x568   :  { %v4122_v14 = vpop.eup %4121  ;;  %v2667_v24 = vadd.f32 1.0, %v4120_v37  ;;  %v2822_v52 = vpack.c.bf16 %v2770_v1, %v2766_v54  ;;  %v2292_v48 = vmul.f32 %v6019_v39, %v6019_v39  ;;  %v2546_v56 = vmul.f32 0.7978846, %v2482_v7  ;;  %2850 = vmatpush1.bf16.msra.mxu0 %v2819_v63 }
 0x569   :  { %v6036_v23 = vpop.eup %4123  ;;  %v2669_v30 = vadd.f32 1.0, %v4122_v14  ;;  %v2355_v19 = vmul.f32 %v2291_v22, %v6010_v13  ;;  %v2294_v34 = vmul.f32 %v6026_v17, %v6026_v17  ;;  %v2357_v54 = vmul.f32 %v2293_v15, %v6015_v50 }
 0x56a   :  { %v6041_v28 = vpop.eup %4125  ;;  %v2731_v38 = vmul.f32 0.5, %v2667_v24  ;;  %2890 = vmatprep.subr.bf16.mxu1 %v2822_v52  ;;  %v2356_v1 = vmul.f32 %v2292_v48, %v6019_v39  ;;  %v2295_v37 = vmul.f32 %v6030_v41, %v6030_v41  ;;  %4133 = vtanh.f32 %v2546_v56 }
 0x56b   :  { %v4128_v35 = vpop.eup %4127  ;;  %v2733_v47 = vmul.f32 0.5, %v2669_v30  ;;  %2891 = vmatpush1.bf16.msra.mxu1 %v2821_v18  ;;  %v2419_v63 = vmul.f32 0.044715, %v2355_v19  ;;  %v2358_v7 = vmul.f32 %v2294_v34, %v6026_v17  ;;  %v2421_v24 = vmul.f32 0.044715, %v2357_v54 }
 0x56c   :  { %v6049_v22 = vmul.f32 %v2731_v38, %v5916_v32  ;;  %v2671_v14 = vadd.f32 1.0, %v4128_v35  ;;  %v2420_v52 = vmul.f32 0.044715, %v2356_v1  ;;  %v2359_v27 = vmul.f32 %v2295_v37, %v6030_v41  ;;  %v6385_v32 = vld [vmem:[#allocation42_spill] sm:$0xff] }
 0x56d   :  { %v6052_v15 = vmul.f32 %v2733_v47, %v5920_v43  ;;  %v2483_v48 = vadd.f32 %v2419_v63, %v6010_v13  ;;  %v2422_v2 = vmul.f32 0.044715, %v2358_v7  ;;  %v4130_v30 = vpop.eup %4129  ;;  %v2485_v18 = vadd.f32 %v2421_v24, %v6015_v50 }
 0x56e   :  { %v2735_v56 = vmul.f32 0.5, %v2671_v14  ;;  %v2484_v19 = vadd.f32 %v2420_v52, %v6019_v39  ;;  %v6060_v34 = vadd.f32 %v6385_v32, %v5339_v42  ;;  %v6062_v38 = vpop.eup %4131  ;;  %v2673_v54 = vadd.f32 1.0, %v4130_v30 }
 0x56f   :  { %v2547_v43 = vmul.f32 0.7978846, %v2483_v48  ;;  %v2486_v1 = vadd.f32 %v2422_v2, %v6026_v17  ;;  %v2423_v35 = vmul.f32 0.044715, %v2359_v27  ;;  %v2549_v37 = vmul.f32 0.7978846, %v2485_v18 }
 0x570   :  { %v6066_v47 = vmul.f32 %v2735_v56, %v5934_v21  ;;  %v2548_v63 = vmul.f32 0.7978846, %v2484_v19  ;;  %v2297_v7 = vmul.f32 %v6060_v34, %v6060_v34  ;;  %v2737_v14 = vmul.f32 0.5, %v2673_v54  ;;  %v6386_v48 = vld [vmem:[#allocation43_spill] sm:$0xff]  ;;  %v6387_v27 = vld [vmem:[#allocation44_spill] sm:$0xff] }
 0x571   :  { %4135 = vtanh.f32 %v2547_v43  ;;  %v2550_v24 = vmul.f32 0.7978846, %v2486_v1  ;;  %v2487_v42 = vadd.f32 %v2423_v35, %v6030_v41  ;;  %v6074_v2 = vadd.f32 %v6386_v48, %v5343_v11 }
 0x572   :  { %4137 = vtanh.f32 %v2549_v37  ;;  %v2361_v52 = vmul.f32 %v2297_v7, %v6060_v34  ;;  %v6078_v21 = vadd.f32 %v6387_v27, %v5345_v8  ;;  %v6081_v30 = vmul.f32 %v2737_v14, %v5938_v5  ;;  %v6388_v7 = vld [vmem:[#allocation22_spill] sm:$0xff]  ;;  %v6389_v27 = vld [vmem:[#allocation31_spill] sm:$0xff] }
 0x573   :  { %4139 = vtanh.f32 %v2548_v63  ;;  %v2551_v56 = vmul.f32 0.7978846, %v2487_v42  ;;  %v2644_v18 = vadd.f32 1.0, %v5751_v9  ;;  %v2296_v32 = vmul.f32 %v6074_v2, %v6074_v2 }
 0x574   :  { %4141 = vtanh.f32 %v2550_v24  ;;  %v2425_v19 = vmul.f32 0.044715, %v2361_v52  ;;  %v2298_v11 = vmul.f32 %v6078_v21, %v6078_v21  ;;  %v6088_v54 = vpop.eup %4133  ;;  %v2648_v8 = vadd.f32 1.0, %v5795_v51 }
 0x575   :  { %4143 = vtanh.f32 %v2551_v56  ;;  %v2708_v43 = vmul.f32 0.5, %v2644_v18  ;;  %v2646_v5 = vadd.f32 1.0, %v5754_v36  ;;  %v2360_v9 = vmul.f32 %v2296_v32, %v6074_v2 }
 0x576   :  { %v2489_v1 = vadd.f32 %v2425_v19, %v6060_v34  ;;  %v2362_v35 = vmul.f32 %v2298_v11, %v6078_v21  ;;  %v2650_v37 = vadd.f32 1.0, %v5800_v45  ;;  %v2712_v63 = vmul.f32 0.5, %v2648_v8  ;;  %v6390_v19 = vld [vmem:[#allocation24_spill] sm:$0xff] }
 0x577   :  { %v2772_v14 = vmul.f32 %v2708_v43, %v6388_v7  ;;  %v2710_v24 = vmul.f32 0.5, %v2646_v5  ;;  %v2823_v42 = vpack.c.bf16 %v5798_v61, %v5762_v44  ;;  %v2424_v51 = vmul.f32 0.044715, %v2360_v9  ;;  %v6391_v5 = vld [vmem:[#allocation32_spill] sm:$0xff] }
 0x578   :  { %v2553_v52 = vmul.f32 0.7978846, %v2489_v1  ;;  %v2426_v48 = vmul.f32 0.044715, %v2362_v35  ;;  %v2825_v36 = vpack.c.bf16 %v5808_v3, %v5766_v33  ;;  %v2776_v56 = vmul.f32 %v2712_v63, %v6389_v27 }
 0x579   :  { %v2714_v18 = vmul.f32 0.5, %v2650_v37  ;;  %v2774_v32 = vmul.f32 %v2710_v24, %v6390_v19  ;;  %v2652_v45 = vadd.f32 1.0, %v5815_v57  ;;  %v2488_v11 = vadd.f32 %v2424_v51, %v6074_v2  ;;  %v6392_v51 = vld [vmem:[#allocation37_spill] sm:$0xff] }
 0x57a   :  { %4145 = vtanh.f32 %v2553_v52  ;;  %v2490_v8 = vadd.f32 %v2426_v48, %v6078_v21  ;;  %v2656_v44 = vadd.f32 1.0, %v5881_v0  ;;  %v2824_v43 = vpack.c.bf16 %v2776_v56, %v2772_v14 }
 0x57b   :  { %v4136_v61 = vpop.eup %4135  ;;  %v2778_v1 = vmul.f32 %v2714_v18, %v6391_v5  ;;  %v2716_v9 = vmul.f32 0.5, %v2652_v45  ;;  %v2654_v33 = vadd.f32 1.0, %v5850_v29  ;;  %v2552_v37 = vmul.f32 0.7978846, %v2488_v11  ;;  %v6393_v29 = vld [vmem:[#allocation45_spill] sm:$0xff] }
 0x57c   :  { %v4138_v3 = vpop.eup %4137  ;;  %v2675_v35 = vadd.f32 1.0, %v4136_v61  ;;  %v2554_v63 = vmul.f32 0.7978846, %v2490_v8  ;;  %v2720_v7 = vmul.f32 0.5, %v2656_v44  ;;  %2851 = vmatprep.subr.bf16.mxu0 %v2824_v43  ;;  %v2658_v0 = vadd.f32 1.0, %v5888_v49  ;;  %v6394_v61 = vld [vmem:[#allocation40_spill] sm:$0xff] }
 0x57d   :  { %v6109_v57 = vpop.eup %4139  ;;  %v2677_v24 = vadd.f32 1.0, %v4138_v3  ;;  %v2826_v52 = vpack.c.bf16 %v2778_v1, %v2774_v32  ;;  %v2780_v48 = vmul.f32 %v2716_v9, %v6392_v51  ;;  %4147 = vtanh.f32 %v2552_v37  ;;  %2852 = vmatpush1.bf16.msra.mxu0 %v2823_v42 }
 0x57e   :  { %v6113_v14 = vpop.eup %4141  ;;  %v2739_v27 = vmul.f32 0.5, %v2675_v35  ;;  %v2784_v56 = vmul.f32 %v2720_v7, %v6393_v29  ;;  %v2718_v18 = vmul.f32 0.5, %v2654_v33  ;;  %4149 = vtanh.f32 %v2554_v63 }
 0x57f   :  { %v4144_v19 = vpop.eup %4143  ;;  %v2741_v45 = vmul.f32 0.5, %v2677_v24  ;;  %2892 = vmatprep.subr.bf16.mxu1 %v2826_v52  ;;  %v2722_v11 = vmul.f32 0.5, %v2658_v0  ;;  %v2827_v32 = vpack.c.bf16 %v5884_v31, %v5818_v40  ;;  %v2829_v1 = vpack.c.bf16 %v5897_v58, %v5836_v10 }
 0x580   :  { %v6119_v8 = vmul.f32 %v2739_v27, %v6010_v13  ;;  %v2679_v49 = vadd.f32 1.0, %v4144_v19  ;;  %2893 = vmatpush1.bf16.msra.mxu1 %v2825_v36  ;;  %v2828_v44 = vpack.c.bf16 %v2784_v56, %v2780_v48  ;;  %v2782_v43 = vmul.f32 %v2718_v18, %v6394_v61  ;;  %v6397_v19 = vld [vmem:[#allocation26_spill] sm:$0xff] }
 0x581   :  { %v6123_v42 = vmul.f32 %v2741_v45, %v6015_v50  ;;  %v2786_v5 = vmul.f32 %v2722_v11, %v5780_v62  ;;  %v2660_v9 = vadd.f32 1.0, %v5955_v46  ;;  %v2664_v40 = vadd.f32 1.0, %v5970_v12 }
 0x582   :  { %v2743_v33 = vmul.f32 0.5, %v2679_v49  ;;  %2853 = vmatprep.subr.bf16.mxu0 %v2828_v44  ;;  %v2662_v31 = vadd.f32 1.0, %v5960_v20  ;;  %v2666_v13 = vadd.f32 1.0, %v5978_v4  ;;  %v2831_v50 = vpack.c.bf16 %v5982_v59, %v5967_v55  ;;  %v6395_v59 = vld [vmem:[#allocation46_spill] sm:$0xff] }
 0x583   :  { %v2830_v36 = vpack.c.bf16 %v2786_v5, %v2782_v43  ;;  %2854 = vmatpush1.bf16.msra.mxu0 %v2827_v32  ;;  %v2724_v3 = vmul.f32 0.5, %v2660_v9  ;;  %v2833_v62 = vpack.c.bf16 %v5986_v60, %v5973_v26  ;;  %v2728_v46 = vmul.f32 0.5, %v2664_v40  ;;  %v6396_v26 = vld [vmem:[#allocation25_spill] sm:$0xff] }
 0x584   :  { %v4146_v10 = vpop.eup %4145  ;;  %v2807_v58 = vmul.f32 %v2743_v33, %v6030_v41  ;;  %v2726_v35 = vmul.f32 0.5, %v2662_v31  ;;  %v2730_v37 = vmul.f32 0.5, %v2666_v13  ;;  %v2668_v4 = vadd.f32 1.0, %v6036_v23  ;;  %v3832_v40 = vld [vmem:[%s6289_s12 + $0xc0] sm:$0xff]   ;;  %v3836_v31 = vld [vmem:[%s6289_s12 + $0xc8] sm:$0xff]  }
 0x585   :  { %v2681_v12 = vadd.f32 1.0, %v4146_v10  ;;  %2894 = vmatprep.subr.bf16.mxu1 %v2830_v36  ;;  %v2788_v20 = vmul.f32 %v2724_v3, %v5833_v53  ;;  %v2672_v63 = vadd.f32 1.0, %v6062_v38  ;;  %v2792_v55 = vmul.f32 %v2728_v46, %v5866_v6  ;;  %v3837_v13 = vld [vmem:[%s6289_s12 + $0x8] sm:$0xff]   ;;  %v3839_v3 = vld [vmem:[%s6289_s12 + $0x50] sm:$0xff]   ;;  %v3844_v46 = vld [vmem:[%s6289_s12 + $0xd8] sm:$0xff]  }
 0x586   :  { %2895 = vmatpush1.bf16.msra.mxu1 %v2829_v1  ;;  %v2790_v7 = vmul.f32 %v2726_v35, %v6395_v59  ;;  %v2794_v60 = vmul.f32 %v2730_v37, %v6396_v26  ;;  %v2670_v41 = vadd.f32 1.0, %v6041_v28  ;;  %v2732_v52 = vmul.f32 0.5, %v2668_v4  ;;  %v3838_v36 = vld [vmem:[%s6289_s12 + $0x88] sm:$0xff]   ;;  %v3842_v10 = vld [vmem:[%s6289_s12 + $0x90] sm:$0xff]   ;;  %v3845_v35 = vld [vmem:[%s6289_s12 + $0x18] sm:$0xff]  }
 0x587   :  { %v2745_v24 = vmul.f32 0.5, %v2681_v12  ;;  %v2736_v51 = vmul.f32 0.5, %v2672_v63  ;;  %v2674_v48 = vadd.f32 1.0, %v6088_v54  ;;  %v4148_v0 = vpop.eup %4147  ;;  %v2832_v53 = vpack.c.bf16 %v2792_v55, %v2788_v20  ;;  %v3846_v37 = vld [vmem:[%s6289_s12 + $0x98] sm:$0xff]   ;;  %v3847_v12 = vld [vmem:[%s6289_s12 + $0x60] sm:$0xff]   ;;  %v3851_v55 = vld [vmem:[%s6289_s12 + $0x68] sm:$0xff]  }
 0x588   :  { %v2834_v27 = vpack.c.bf16 %v2794_v60, %v2790_v7  ;;  %v2734_v23 = vmul.f32 0.5, %v2670_v41  ;;  %v2835_v38 = vpack.c.bf16 %v6066_v47, %v6049_v22  ;;  %v4150_v29 = vpop.eup %4149  ;;  %v2796_v56 = vmul.f32 %v2732_v52, %v5924_v25  ;;  %v6398_v47 = vld [vmem:[#allocation27_spill] sm:$0xff]  ;;  %v3848_v20 = vld [vmem:[%s6289_s12 + $0xe0] sm:$0xff]  }
 0x589   :  { %v2809_v6 = vmul.f32 %v2745_v24, %v6060_v34  ;;  %v2800_v18 = vmul.f32 %v2736_v51, %v5948_v16  ;;  %v2738_v28 = vmul.f32 0.5, %v2674_v48  ;;  %2855 = vmatprep.subr.bf16.mxu0 %v2832_v53  ;;  %v2837_v54 = vpack.c.bf16 %v6081_v30, %v6052_v15  ;;  %v3849_v4 = vld [vmem:[%s6289_s12 + $0x20] sm:$0xff]   ;;  %v3852_v59 = vld [vmem:[%s6289_s12 + $0xe8] sm:$0xff]   ;;  %v3855_v60 = vld [vmem:[%s6289_s12 + $0x70] sm:$0xff]  }
 0x58a   :  { %2896 = vmatprep.subr.bf16.mxu1 %v2834_v27  ;;  %v2798_v45 = vmul.f32 %v2734_v23, %v6397_v19  ;;  %v2676_v11 = vadd.f32 1.0, %v6109_v57  ;;  %v2680_v32 = vadd.f32 1.0, %v4148_v0  ;;  %2856 = vmatpush1.bf16.msra.mxu0 %v2831_v50  ;;  %v2678_v25 = vadd.f32 1.0, %v6113_v14  ;;  %v3840_v50 = vld [vmem:[%s6289_s12 + $0xd0] sm:$0xff]   ;;  %v3850_v63 = vld [vmem:[%s6289_s12 + $0xa0] sm:$0xff]   ;;  %v3853_v7 = vld [vmem:[%s6289_s12 + $0x28] sm:$0xff]  }
 0x58b   :  { %2897 = vmatpush1.bf16.msra.mxu1 %v2833_v62  ;;  %v2836_v22 = vpack.c.bf16 %v2800_v18, %v2796_v56  ;;  %v2802_v34 = vmul.f32 %v2738_v28, %v6398_v47  ;;  %v2682_v49 = vadd.f32 1.0, %v4150_v29  ;;  %v2839_v61 = vpack.c.bf16 %v2807_v58, %v6119_v8  ;;  %v3831_v8 = vld [vmem:[%s6289_s12 + $0x40] sm:$0xff]   ;;  %v3841_v62 = vld [vmem:[%s6289_s12 + $0x10] sm:$0xff]   ;;  %v3843_v58 = vld [vmem:[%s6289_s12 + $0x58] sm:$0xff]  }
 0x58c   :  { %v2740_v16 = vmul.f32 0.5, %v2676_v11  ;;  %v2744_v44 = vmul.f32 0.5, %v2680_v32  ;;  %v2841_v43 = vpack.c.bf16 %v2809_v6, %v6123_v42  ;;  %v2742_v15 = vmul.f32 0.5, %v2678_v25  ;;  %v3854_v26 = vld [vmem:[%s6289_s12 + $0xa8] sm:$0xff]   ;;  %v3856_v41 = vld [vmem:[%s6289_s12 + $0xf0] sm:$0xff]   ;;  %v3859_v51 = vld [vmem:[%s6289_s12 + $0x78] sm:$0xff]  }
 0x58d   :  { %2857 = vmatprep.subr.bf16.mxu0 %v2836_v22  ;;  %v2838_v5 = vpack.c.bf16 %v2802_v34, %v2798_v45  ;;  %v2746_v30 = vmul.f32 0.5, %v2682_v49  ;;  %v3857_v24 = vld [vmem:[%s6289_s12 + $0x30] sm:$0xff]   ;;  %v3860_v48 = vld [vmem:[%s6289_s12 + $0xf8] sm:$0xff]   ;;  %v4176_v27 = vmov 1983009808   ;;  %v6399_v6 = vld [vmem:[#allocation6_spill] sm:$0xff] }
 0x58e   :  { %v2804_v57 = vmul.f32 %v2740_v16, %v6019_v39  ;;  %v2808_v1 = vmul.f32 %v2744_v44, %v6074_v2  ;;  %2858 = vmatpush1.bf16.msra.mxu0 %v2835_v38  ;;  %v2806_v9 = vmul.f32 %v2742_v15, %v6026_v17  ;;  %v2844_v39 = vld [vmem:[%s6278_s1] sm:$0x1]  ;;  %v3858_v52 = vld [vmem:[%s6289_s12 + $0xb0] sm:$0xff]   ;;  %v3861_v0 = vld [vmem:[%s6289_s12 + $0x38] sm:$0xff]   ;;  %v2934_v23 = vunpack.c.l.s4 %v4176_v27 }
 0x58f   :  { %2898 = vmatprep.subr.bf16.mxu1 %v2838_v5  ;;  %v2810_v14 = vmul.f32 %v2746_v30, %v6078_v21  ;;  %v3833_v17 = vld [vmem:[%s6289_s12] sm:$0xff]   ;;  %v3835_v21 = vld [vmem:[%s6289_s12 + $0x48] sm:$0xff]   ;;  %v3862_v53 = vld [vmem:[%s6289_s12 + $0xb8] sm:$0xff]  }
 0x590   :  { %2899 = vmatpush1.bf16.msra.mxu1 %v2837_v54  ;;  %v2840_v33 = vpack.c.bf16 %v2808_v1, %v2804_v57  ;;  %v3834_v2 = vld [vmem:[%s6289_s12 + $0x80] sm:$0xff]   ;;  %v2935_v38 = vunpack.c.0.s8 %v2934_v23 }
 0x591   :  { %v2842_v42 = vpack.c.bf16 %v2810_v14, %v2806_v9 }
 0x592   :  { %2859 = vmatprep.subr.bf16.mxu0 %v2840_v33  ;;  %v2938_v56 = vsub.s32 %v2935_v38, %v6399_v6  ;;  %v3454_v33 = vld [vmem:[%s6290_s13] ss:$0 sm:$0xff] }
 0x593   :  { %2900 = vmatprep.subr.bf16.mxu1 %v2842_v42  ;;  %2860 = vmatpush1.bf16.msra.mxu0 %v2839_v61 }
 0x594   :  { %2901 = vmatpush1.bf16.msra.mxu1 %v2841_v43  ;;  %3536 = vmatprep.subr.bf16.mxu0 %v3831_v8 }
 0x595   :  { %3558 = vmatprep.subr.bf16.mxu1 %v3832_v40 }
 0x596   :  { %2878 = vmatmul.mubr.bf16.vlgmr.msra.gmra.mrb[64].mxu0 %v2844_v39 }
 0x597   :  { %2919 = vmatmul.mubr.bf16.vlgmr.msra.gmra.mrb[80].mxu1 %v2844_v39  ;;  %3537 = vmatpush3.bf16.msra.mxu0 %v3833_v17 }
 0x598   :  { %3559 = vmatpush3.bf16.msra.mxu1 %v3834_v2  ;;  %3538 = vmatprep.subr.bf16.mxu0 %v3835_v21 }
 0x599   :  { %3560 = vmatprep.subr.bf16.mxu1 %v3836_v31 }
 0x59b   :  { %3539 = vmatpush3.bf16.msra.mxu0 %v3837_v13 }
 0x59c   :  { %3561 = vmatpush3.bf16.msra.mxu1 %v3838_v36  ;;  %3540 = vmatprep.subr.bf16.mxu0 %v3839_v3 }
 0x59d   :  { %3562 = vmatprep.subr.bf16.mxu1 %v3840_v50 }
 0x59f   :  { %3541 = vmatpush3.bf16.msra.mxu0 %v3841_v62 }
 0x5a0   :  { %3563 = vmatpush3.bf16.msra.mxu1 %v3842_v10  ;;  %3542 = vmatprep.subr.bf16.mxu0 %v3843_v58 }
 0x5a1   :  { %3564 = vmatprep.subr.bf16.mxu1 %v3844_v46 }
 0x5a3   :  { %3543 = vmatpush3.bf16.msra.mxu0 %v3845_v35 }
 0x5a4   :  { %3565 = vmatpush3.bf16.msra.mxu1 %v3846_v37  ;;  %3544 = vmatprep.subr.bf16.mxu0 %v3847_v12 }
 0x5a5   :  { %3566 = vmatprep.subr.bf16.mxu1 %v3848_v20 }
 0x5a7   :  { %3545 = vmatpush3.bf16.msra.mxu0 %v3849_v4 }
 0x5a8   :  { %3567 = vmatpush3.bf16.msra.mxu1 %v3850_v63  ;;  %3546 = vmatprep.subr.bf16.mxu0 %v3851_v55 }
 0x5a9   :  { %3568 = vmatprep.subr.bf16.mxu1 %v3852_v59 }
 0x5ab   :  { %3547 = vmatpush3.bf16.msra.mxu0 %v3853_v7 }
 0x5ac   :  { %3569 = vmatpush3.bf16.msra.mxu1 %v3854_v26  ;;  %3548 = vmatprep.subr.bf16.mxu0 %v3855_v60 }
 0x5ad   :  { %3570 = vmatprep.subr.bf16.mxu1 %v3856_v41 }
 0x5af   :  { %3549 = vmatpush3.bf16.msra.mxu0 %v3857_v24 }
 0x5b0   :  { %3571 = vmatpush3.bf16.msra.mxu1 %v3858_v52  ;;  %3550 = vmatprep.subr.bf16.mxu0 %v3859_v51 }
 0x5b1   :  { %3572 = vmatprep.subr.bf16.mxu1 %v3860_v48 }
 0x5b3   :  { %3551 = vmatpush3.bf16.msra.mxu0 %v3861_v0 }
 0x5b4   :  { %3573 = vmatpush3.bf16.msra.mxu1 %v3862_v53 }
 0x669   :  { %v2879_v29 = vpop.f32.mrb[64].mxu0 }
 0x66a   :  { %v2920_v18 = vpop.f32.mrb[80].mxu1  ;;  %v2881_v28 = vpop.f32.mrb[65].mxu0 }
 0x66b   :  { %v2931_v19 = vcombine.low %v2879_v29, %v2881_v28  ;;  %v2922_v45 = vpop.f32.mrb[81].mxu1  ;;  %v2883_v54 = vpop.f32.mrb[66].mxu0 }
 0x66c   :  { %v2932_v11 = vcombine.low %v2920_v18, %v2922_v45  ;;  %v2924_v32 = vpop.f32.mrb[82].mxu1  ;;  %v2884_v22 = vpop.f32.mrb[67].mxu0 }
 0x66d   :  { %v2939_v47 = vrot.slane %v2931_v19, %v2938_v56  ;;  %v2925_v34 = vpop.f32.mrb[83].mxu1 }
 0x66e   :  { %v2946_v25 = vrot.slane %v2932_v11, %v2938_v56 }
 0x670   :  { %v2947_v49 = vcombine.low %v2939_v47, %v2946_v25  ;;  %v3487_v16 = vcombine.low %v2946_v25, %v2946_v25 }
 0x672   :  { %v2963_v44 = vrot.slane %v2947_v49, %v2938_v56  ;;  %v2970_v61 = vrot.slane %v3487_v16, %v2938_v56 }
 0x674   :  { %v2971_v43 = vcombine.high %v2963_v44, %v2963_v44  ;;  %v2972_v5 = vcombine.high %v2970_v61, %v2970_v61  ;;  %v2977_v57 = vpack.c.bf16 %v2963_v44, %v2963_v44  ;;  %v2979_v1 = vpack.c.bf16 %v2970_v61, %v2970_v61 }
 0x676   :  { %v2978_v15 = vpack.c.bf16 %v2971_v43, %v2971_v43  ;;  %v2980_v30 = vpack.c.bf16 %v2972_v5, %v2972_v5 }
 0x678   :  { %3276 = vmatprep.mubr.bf16.mxu0 %v2978_v15  ;;  %3316 = vmatprep.mubr.bf16.mxu1 %v2980_v30 }
 0x679   :  { %3277 = vmatmul.mubr.bf16.vlgmr.msra.gmra.mrb[68].mxu0 %v2977_v57  ;;  %3317 = vmatmul.mubr.bf16.vlgmr.msra.gmra.mrb[84].mxu1 %v2979_v1 }
 0x74c   :  { %v3552_v9 = vpop.f32.mrb[68].mxu0  ;;  %v3574_v14 = vpop.f32.mrb[84].mxu1 }
 0x74d   :  { %v3553_v8 = vpop.f32.mrb[69].mxu0  ;;  %v3575_v42 = vpop.f32.mrb[85].mxu1 }
 0x74e   :  { %v3554_v40 = vadd.f32 %v3553_v8, %v3552_v9  ;;  %v3576_v39 = vadd.f32 %v3575_v42, %v3574_v14  ;;  %v3555_v17 = vpop.f32.mrb[70].mxu0  ;;  %v3577_v2 = vpop.f32.mrb[86].mxu1 }
 0x74f   :  { %v3556_v21 = vpop.f32.mrb[71].mxu0  ;;  %v3578_v31 = vpop.f32.mrb[87].mxu1 }
 0x750   :  { %v3279_v13 = vadd.f32 %v3554_v40, %v3454_v33 }
 0x752   :  { %v3319_v36 = vadd.f32 %v3576_v39, %v3279_v13 }
 0x754   :  { %3324 = vst [vmem:[#allocation3] sm:$0x3] %v3319_v36 }
 0x755   :  { %4162 = shalt.err (!%p4159_p4)
}
 0x756   :  { %s4163_s0 = scalar_lea.hbm %s6291_s14, 32 }
 0x757   :  { %p4164_p5 = scmp.ne.s32.totalorder %s6291_s14, %s4163_s0  ;;  %p4167_p6 = scmp.lt.u32.totalorder %s4163_s0, %s6291_s14 }
 0x759   :  { %p4169_p7 = pnand %p4167_p6, %p4164_p5 }
 0x75b   :  { %4172 = shalt.err (!%p4169_p7)
}
 0x75c   :  { %3334 = dma.vmem_to_hbm [thread:$0]  %s3332_s16, 32, %s6291_s14, [#allocation4]  }
 0x75d   :  { %4173 = dma.done.wait [#allocation4], 32  }
 0x75e   :  { %4174 = vsyncadd [#allocation4], 4294967264 }
 0x75f   :  { %3338 = vsyncpa [#allocation4], 1 }

</bundles_post_ra>
